<compile_context>
chip_gen: v7x
topology: tpu7x:2x2x1
jax: 0.10.0
libtpu: 0.0.40
codegen_flags: <defaults>
</compile_context>

<pallas_src>
import jax
import jax.numpy as jnp
from jax.experimental import pallas as pl
from jax.experimental.pallas import tpu as pltpu


_VMEM_SPEC = pl.BlockSpec(memory_space=pltpu.MemorySpace.VMEM)


# ----------------------------- Pallas kernels ------------------------------

def _conv_kernel(a_ref, h_ref, m_ref, w_ref, y_ref, st_ref):
    """One row-block of a 4x4 / stride-2 / pad-1 conv as MXU matmuls.

    a_ref : (TR, K)      bf16  gathered input rows for this block.
    h_ref : (HH, K)      bf16  halo rows just below the block (only used when
                               the weight has two vertical taps).
    m_ref : (TR, 1)      f32   1.0 for rows that are real conv outputs.
    w_ref : (T, K, Cout) bf16  rearranged conv weight, T in {1, 2} taps.
    y_ref : (TR, Cout)   bf16  raw conv output rows (pre-BN).
    st_ref: (2, Cout)    f32   per-block [sum, sum_of_squares] for BN stats.
    """
    a = a_ref[...]
    acc = jnp.dot(a, w_ref[0, :, :], preferred_element_type=jnp.float32)
    if w_ref.shape[0] == 2:
        s = h_ref.shape[0]            # vertical-tap shift == halo rows (8-aligned)
        if s == a.shape[0]:
            shifted = h_ref[...]
        else:
            shifted = jnp.concatenate([a[s:, :], h_ref[...]], axis=0)
        acc = acc + jnp.dot(shifted, w_ref[1, :, :],
                            preferred_element_type=jnp.float32)
    acc = acc * m_ref[...]            # zero out junk / padding rows
    y_ref[...] = acc.astype(y_ref.dtype)
    st_ref[0:1, :] = jnp.sum(acc, axis=0, keepdims=True)
    st_ref[1:2, :] = jnp.sum(acc * acc, axis=0, keepdims=True)


def _final_conv_kernel(x_ref, w_ref, o_ref):
    # 4x4 valid conv to a single channel == per-row dot product: VPU multiply
    # + lane reduce instead of an (M, K) @ (K, 1) MXU call.
    x = x_ref[...].astype(jnp.float32)
    o_ref[...] = jnp.sum(x * w_ref[...], axis=1, keepdims=True)


# ------------------------------ JAX glue -----------------------------------

def _round_up(x, m):
    return (x + m - 1) // m * m


def _cdiv(a, b):
    return -(-a // b)


def _pick_row_tile(m, hh, k, cout, ntaps,
                   target_rows=1024, vmem_budget=26 * 1024 * 1024):
    """Rows per grid step: multiple of hh, ~target_rows, >=2 grid steps when
    possible, bounded so double-buffered blocks stay well inside VMEM."""
    w_bytes = 2 * ntaps * k * cout * 2                 # double-buffered weight
    per_row = 2 * (2 * k + 2 * cout + 4 * 128)         # a + y (+ mask lane pad)
    avail = max(vmem_budget - w_bytes, per_row * hh)
    k_budget = max(1, avail // (per_row * hh))
    k_target = max(1, target_rows // hh)
    k_two = max(1, _cdiv(m, 2 * hh))                   # aim for >=2 grid steps
    return hh * int(min(k_target, k_two, k_budget))


def _space_to_depth(act):
    """NHWC (N,H,W,C) -> (N, Ho+1, Wo+1, 4C): zero-pad by 1 and fold the
    stride-2 2x2 sub-pixel grid into channels, channel order (sh, sw, c)."""
    n, h, w, c = act.shape
    ho, wo = h // 2, w // 2
    xp = jnp.pad(act, ((0, 0), (1, 1), (1, 1), (0, 0)))
    sd = xp.reshape(n, ho + 1, 2, wo + 1, 2, c)
    return sd.transpose(0, 1, 3, 2, 4, 5).reshape(n, ho + 1, wo + 1, 4 * c)


def _rearrange_weight(w, ntaps):
    """(Cout, Cin, 4, 4) torch conv weight -> (ntaps, 16*Cin/ntaps, Cout) bf16.

    Row order (dh, dw, sh, sw, ci) with kernel tap (kh, kw) = (2dh+sh, 2dw+sw),
    matching the wrapper gather transforms below.
    """
    cout, cin, kh, kw = w.shape
    assert kh == 4 and kw == 4
    wr = w.reshape(cout, cin, 2, 2, 2, 2)        # (co, ci, dh, sh, dw, sw)
    wr = wr.transpose(2, 4, 3, 5, 1, 0)          # (dh, dw, sh, sw, ci, co)
    return wr.reshape(ntaps, 16 * cin // ntaps, cout).astype(jnp.bfloat16)


def _conv_stats(act, w):
    """Conv2d(k=4, s=2, p=1, bias=False) on an NHWC bf16 input.

    Returns (y, part): y = raw (pre-BN) conv output NHWC bf16, part =
    (num_blocks, 2, Cout) f32 partial [sum, sum_sq] over the valid outputs.
    """
    n, h, wdim, cin = act.shape
    assert h % 2 == 0 and wdim % 2 == 0
    cout = w.shape[0]
    ho, wo = h // 2, wdim // 2
    sd = _space_to_depth(act)

    full_taps = 16 * cin <= 128
    if full_taps:
        # Small Cin: gather all 16 taps in the wrapper -> a single K=16*Cin
        # matmul per block and zero junk rows.
        ntaps = 1
        cols = [sd[:, dh:dh + ho, dw:dw + wo, :]
                for dh in (0, 1) for dw in (0, 1)]
        rows3 = jnp.concatenate(cols, axis=-1)             # (n, ho, wo, 16cin)
        m = n * ho * wo
        rows = rows3.reshape(m, 16 * cin)
        hh = 8
    else:
        # Deep layers: horizontal (dw) taps folded into channels (K = 8*Cin),
        # vertical (dh) tap handled in-kernel via an 8-aligned row shift; the
        # batch is folded into the flat row (M) axis.
        ntaps = 2
        wo_p = _round_up(wo, 8)
        sd2 = jnp.concatenate([sd[:, :, :wo, :], sd[:, :, 1:wo + 1, :]],
                              axis=-1)                     # (n, ho+1, wo, 8cin)
        if wo_p > wo:
            sd2 = jnp.pad(sd2, ((0, 0), (0, 0), (0, wo_p - wo), (0, 0)))
        pp = (ho + 1) * wo_p
        m = n * pp
        rows = sd2.reshape(m, 8 * cin)
        hh = wo_p

    wk = _rearrange_weight(w, ntaps)
    k = wk.shape[1]
    tr = _pick_row_tile(m, hh, k, cout, ntaps)
    m_pad = _round_up(m, tr)
    ntiles = m_pad // tr

    rows = jnp.pad(rows, ((0, m_pad + hh - m), (0, 0)))

    r = jnp.arange(m_pad, dtype=jnp.int32)
    if full_taps:
        valid = r < m
    else:
        rp = r % pp
        valid = (r < m) & (rp % wo_p < wo) & (rp < ho * wo_p)
    mask = valid.astype(jnp.float32).reshape(m_pad, 1)

    y, part = pl.pallas_call(
        _conv_kernel,
        grid=(ntiles,),
        in_specs=[
            pl.BlockSpec((tr, k), lambda i: (i, 0)),
            pl.BlockSpec((hh, k), lambda i: ((i + 1) * (tr // hh), 0)),
            pl.BlockSpec((tr, 1), lambda i: (i, 0)),
            pl.BlockSpec((ntaps, k, cout), lambda i: (0, 0, 0)),
        ],
        out_specs=(
            pl.BlockSpec((tr, cout), lambda i: (i, 0)),
            pl.BlockSpec((None, 2, cout), lambda i: (i, 0, 0)),
        ),
        out_shape=(
            jax.ShapeDtypeStruct((m_pad, cout), jnp.bfloat16),
            jax.ShapeDtypeStruct((ntiles, 2, cout), jnp.float32),
        ),
        compiler_params=pltpu.CompilerParams(
            dimension_semantics=("parallel",),
            vmem_limit_bytes=32 * 1024 * 1024),
    )(rows, rows, mask, wk)

    if full_taps:
        y_nhwc = y[:m].reshape(n, ho, wo, cout)
    else:
        y_nhwc = y[:m].reshape(n, ho + 1, wo_p, cout)[:, :ho, :wo, :]
    return y_nhwc, part


def _bn_scale_shift(part, gamma, beta, count):
    stats = jnp.sum(part, axis=0)                            # (2, Cout) f32
    mean = stats[0] / count
    var = jnp.maximum(stats[1] / count - mean * mean, 0.0)   # biased (train)
    scale = gamma * jax.lax.rsqrt(var + 1e-5)
    shift = beta - mean * scale
    return scale, shift


def _bn_lrelu(y, scale, shift):
    # BN apply + LeakyReLU(0.2); fused by XLA into the next layer's gather
    # transform (pad / space-to-depth), so no extra HBM pass of the activation.
    z = y.astype(jnp.float32) * scale + shift
    return jnp.where(z > 0, z, 0.2 * z)


def _conv_bn_layer(act, w, gamma, beta):
    """Conv(4,2,1,bias=False); returns raw conv y + folded BN scale/shift."""
    y, part = _conv_stats(act, w)
    n, ho, wo, _ = y.shape
    scale, shift = _bn_scale_shift(part, gamma, beta, float(n * ho * wo))
    return y, scale, shift


def _final_conv(act, w5):
    # layer5: Conv(k=4, s=1, p=0, bias=False) on (N, 4, 4, C) -> (N, 1, 1, 1).
    n, h, wdim, c = act.shape
    assert h == 4 and wdim == 4, "final layer expects 4x4 spatial (64x64 input)"
    k5 = h * wdim * c
    x2d = act.reshape(n, k5).astype(jnp.float32)              # (h, w, c) order
    w_row = w5.transpose(2, 3, 1, 0).reshape(1, k5).astype(jnp.float32)
    out = pl.pallas_call(
        _final_conv_kernel,
        out_shape=jax.ShapeDtypeStruct((n, 1), jnp.float32),
        in_specs=[_VMEM_SPEC, _VMEM_SPEC],
        out_specs=_VMEM_SPEC,
    )(x2d, w_row)
    return out.reshape(n, 1, 1, 1)


# --------------------------- Critic (module) -------------------------------

def init_critic_params(key, ndf):
    """Deterministic synthetic weights mirroring Critic.__init__ shapes."""
    ks = jax.random.split(key, 5)

    def conv_w(k, cout, cin):
        return 0.02 * jax.random.normal(k, (cout, cin, 4, 4), dtype=jnp.float32)

    return {
        "w1": conv_w(ks[0], ndf, 3),
        "g1": jnp.ones((ndf,), jnp.float32), "b1": jnp.zeros((ndf,), jnp.float32),
        "w2": conv_w(ks[1], ndf * 2, ndf),
        "g2": jnp.ones((ndf * 2,), jnp.float32), "b2": jnp.zeros((ndf * 2,), jnp.float32),
        "w3": conv_w(ks[2], ndf * 4, ndf * 2),
        "g3": jnp.ones((ndf * 4,), jnp.float32), "b3": jnp.zeros((ndf * 4,), jnp.float32),
        "w4": conv_w(ks[3], ndf * 8, ndf * 4),
        "g4": jnp.ones((ndf * 8,), jnp.float32), "b4": jnp.zeros((ndf * 8,), jnp.float32),
        "w5": conv_w(ks[4], 1, ndf * 8),
    }


def critic_forward(params, x):
    # x: (N, 3, H, W) NCHW float32 (PyTorch layout).  Convert once at the
    # boundary to NHWC bf16; each layer's BN+LeakyReLU is applied lazily as
    # part of the next layer's input transform.
    act = x.transpose(0, 2, 3, 1).astype(jnp.bfloat16)
    y, sc, sh = _conv_bn_layer(act, params["w1"], params["g1"], params["b1"])
    act = _bn_lrelu(y, sc, sh).astype(jnp.bfloat16)
    y, sc, sh = _conv_bn_layer(act, params["w2"], params["g2"], params["b2"])
    act = _bn_lrelu(y, sc, sh).astype(jnp.bfloat16)
    y, sc, sh = _conv_bn_layer(act, params["w3"], params["g3"], params["b3"])
    act = _bn_lrelu(y, sc, sh).astype(jnp.bfloat16)
    y, sc, sh = _conv_bn_layer(act, params["w4"], params["g4"], params["b4"])
    act = _bn_lrelu(y, sc, sh)               # keep f32 for the tiny final head
    return _final_conv(act, params["w5"])


if __name__ == "__main__":
    # The 5-layer DCGAN critic requires 64x64 inputs
    # (64 -> 32 -> 16 -> 8 -> 4 -> 1 after the final 4x4 valid conv).
    batch, ndf, img = 2, 8, 64
    key = jax.random.PRNGKey(0)
    k_x, k_p = jax.random.split(key)
    x = jax.random.normal(k_x, (batch, 3, img, img), dtype=jnp.float32)
    params = init_critic_params(k_p, ndf)

    out = jax.jit(critic_forward)(params, x)
    out = jax.block_until_ready(out)
    assert out.shape == (batch, 1, 1, 1), out.shape
    assert bool(jnp.all(jnp.isfinite(out)))
    print("KERNEL_OK")
</pallas_src>

<mosaic_0001>
module attributes {stable_mosaic.version = 11 : i64} {
  func.func @_conv_kernel(%arg0: i32, %arg1: memref<1024x48xbf16, #tpu.memory_space<vmem>>, %arg2: memref<8x48xbf16, #tpu.memory_space<vmem>>, %arg3: memref<1024x1xf32, #tpu.memory_space<vmem>>, %arg4: memref<1x48x8xbf16, #tpu.memory_space<vmem>>, %arg5: memref<1024x8xbf16, #tpu.memory_space<vmem>>, %arg6: memref<1x2x8xf32, #tpu.memory_space<vmem>>) attributes {dimension_semantics = [#tpu.dimension_semantics<parallel>], iteration_bounds = array<i64: 2>, scalar_prefetch = 0 : i64, scratch_operands = 0 : i64, tpu.core_type = #tpu.core_type<tc>, window_params = [{transform_indices = @transform_0, window_bounds = array<i64: 1024, 48>}, {transform_indices = @transform_1, window_bounds = array<i64: 8, 48>}, {transform_indices = @transform_2, window_bounds = array<i64: 1024, 1>}, {pipeline_mode = #tpu.pipeline_mode<synchronous>, transform_indices = @transform_3, window_bounds = array<i64: 1, 48, 8>}, {transform_indices = @transform_4, window_bounds = array<i64: 1024, 8>}, {transform_indices = @transform_5, window_bounds = array<i64: 1, 2, 8>}]} {
    %c0 = arith.constant 0 : index
    %c0_0 = arith.constant 0 : index
    %0 = vector.load %arg1[%c0, %c0_0] : memref<1024x48xbf16, #tpu.memory_space<vmem>>, vector<1024x48xbf16>
    %c0_1 = arith.constant 0 : index
    %c0_2 = arith.constant 0 : index
    %c0_3 = arith.constant 0 : index
    %1 = vector.load %arg4[%c0_1, %c0_2, %c0_3] : memref<1x48x8xbf16, #tpu.memory_space<vmem>>, vector<1x48x8xbf16>
    %2 = vector.shape_cast %1 : vector<1x48x8xbf16> to vector<48x8xbf16>
    %cst = arith.constant dense<0.000000e+00> : vector<1024x8xf32>
    %3 = tpu.matmul %0, %2, %cst {dimension_numbers = #tpu.dot_dimension_numbers<[1], [0], [0], [1], [0, 0, 1, 1], [], []>} : vector<1024x48xbf16>, vector<48x8xbf16>, vector<1024x8xf32> -> vector<1024x8xf32>
    %c0_4 = arith.constant 0 : index
    %c0_5 = arith.constant 0 : index
    %4 = vector.load %arg3[%c0_4, %c0_5] : memref<1024x1xf32, #tpu.memory_space<vmem>>, vector<1024x1xf32>
    %5 = vector.broadcast %4 : vector<1024x1xf32> to vector<1024x8xf32>
    %6 = arith.mulf %3, %5 : vector<1024x8xf32>
    %7 = arith.truncf %6 : vector<1024x8xf32> to vector<1024x8xbf16>
    %c0_6 = arith.constant 0 : index
    %c0_7 = arith.constant 0 : index
    %8 = vector.load %arg5[%c0_6, %c0_7] : memref<1024x8xbf16, #tpu.memory_space<vmem>>, vector<1024x8xbf16>
    tpu.vector_store %arg5[%c0_6, %c0_7], %7 {strides = array<i32>} : memref<1024x8xbf16, #tpu.memory_space<vmem>>, vector<1024x8xbf16>,
    %cst_8 = arith.constant dense<0.000000e+00> : vector<8xf32>
    %9 = vector.multi_reduction <add>, %6, %cst_8 [0] : vector<1024x8xf32> to vector<8xf32>
    %10 = vector.shape_cast %9 : vector<8xf32> to vector<1x8xf32>
    %c0_9 = arith.constant 0 : index
    %c0_10 = arith.constant 0 : index
    %c0_11 = arith.constant 0 : index
    %11 = vector.load %arg6[%c0_9, %c0_10, %c0_11] : memref<1x2x8xf32, #tpu.memory_space<vmem>>, vector<1x1x8xf32>
    %12 = vector.shape_cast %11 : vector<1x1x8xf32> to vector<1x8xf32>
    %13 = vector.shape_cast %10 : vector<1x8xf32> to vector<1x1x8xf32>
    tpu.vector_store %arg6[%c0_9, %c0_10, %c0_11], %13 {strides = array<i32>} : memref<1x2x8xf32, #tpu.memory_space<vmem>>, vector<1x1x8xf32>,
    %14 = arith.mulf %6, %6 : vector<1024x8xf32>
    %cst_12 = arith.constant dense<0.000000e+00> : vector<8xf32>
    %15 = vector.multi_reduction <add>, %14, %cst_12 [0] : vector<1024x8xf32> to vector<8xf32>
    %16 = vector.shape_cast %15 : vector<8xf32> to vector<1x8xf32>
    %c0_13 = arith.constant 0 : index
    %c1 = arith.constant 1 : index
    %c0_14 = arith.constant 0 : index
    %17 = vector.load %arg6[%c0_13, %c1, %c0_14] : memref<1x2x8xf32, #tpu.memory_space<vmem>>, vector<1x1x8xf32>
    %18 = vector.shape_cast %17 : vector<1x1x8xf32> to vector<1x8xf32>
    %19 = vector.shape_cast %16 : vector<1x8xf32> to vector<1x1x8xf32>
    tpu.vector_store %arg6[%c0_13, %c1, %c0_14], %19 {strides = array<i32>} : memref<1x2x8xf32, #tpu.memory_space<vmem>>, vector<1x1x8xf32>,
    return
  }
  func.func @transform_0(%arg0: i32) -> (i32, i32) {
    %c0_i32 = arith.constant 0 : i32
    %c0_i32_0 = arith.constant 0 : i32
    return %arg0, %c0_i32 : i32, i32
  }
  func.func @transform_1(%arg0: i32) -> (i32, i32) {
    %c1_i32 = arith.constant 1 : i32
    %0 = arith.addi %arg0, %c1_i32 : i32
    %c128_i32 = arith.constant 128 : i32
    %1 = arith.muli %0, %c128_i32 : i32
    %c0_i32 = arith.constant 0 : i32
    %c0_i32_0 = arith.constant 0 : i32
    return %1, %c0_i32 : i32, i32
  }
  func.func @transform_2(%arg0: i32) -> (i32, i32) {
    %c0_i32 = arith.constant 0 : i32
    %c0_i32_0 = arith.constant 0 : i32
    return %arg0, %c0_i32 : i32, i32
  }
  func.func @transform_3(%arg0: i32) -> (i32, i32, i32) {
    %c0_i32 = arith.constant 0 : i32
    %c0_i32_0 = arith.constant 0 : i32
    %c0_i32_1 = arith.constant 0 : i32
    %c0_i32_2 = arith.constant 0 : i32
    return %c0_i32, %c0_i32_0, %c0_i32_1 : i32, i32, i32
  }
  func.func @transform_4(%arg0: i32) -> (i32, i32) {
    %c0_i32 = arith.constant 0 : i32
    %c0_i32_0 = arith.constant 0 : i32
    return %arg0, %c0_i32 : i32, i32
  }
  func.func @transform_5(%arg0: i32) -> (i32, i32, i32) {
    %c0_i32 = arith.constant 0 : i32
    %c0_i32_0 = arith.constant 0 : i32
    %c0_i32_1 = arith.constant 0 : i32
    return %arg0, %c0_i32, %c0_i32_0 : i32, i32, i32
  }
}

module attributes {stable_mosaic.version = 11 : i64} {
  func.func @_conv_kernel(%arg0: i32, %arg1: memref<256x128xbf16, #tpu.memory_space<vmem>>, %arg2: memref<8x128xbf16, #tpu.memory_space<vmem>>, %arg3: memref<256x1xf32, #tpu.memory_space<vmem>>, %arg4: memref<1x128x16xbf16, #tpu.memory_space<vmem>>, %arg5: memref<256x16xbf16, #tpu.memory_space<vmem>>, %arg6: memref<1x2x16xf32, #tpu.memory_space<vmem>>) attributes {dimension_semantics = [#tpu.dimension_semantics<parallel>], iteration_bounds = array<i64: 2>, scalar_prefetch = 0 : i64, scratch_operands = 0 : i64, tpu.core_type = #tpu.core_type<tc>, window_params = [{transform_indices = @transform_0, window_bounds = array<i64: 256, 128>}, {transform_indices = @transform_1, window_bounds = array<i64: 8, 128>}, {transform_indices = @transform_2, window_bounds = array<i64: 256, 1>}, {pipeline_mode = #tpu.pipeline_mode<synchronous>, transform_indices = @transform_3, window_bounds = array<i64: 1, 128, 16>}, {transform_indices = @transform_4, window_bounds = array<i64: 256, 16>}, {transform_indices = @transform_5, window_bounds = array<i64: 1, 2, 16>}]} {
    %c0 = arith.constant 0 : index
    %c0_0 = arith.constant 0 : index
    %0 = vector.load %arg1[%c0, %c0_0] : memref<256x128xbf16, #tpu.memory_space<vmem>>, vector<256x128xbf16>
    %c0_1 = arith.constant 0 : index
    %c0_2 = arith.constant 0 : index
    %c0_3 = arith.constant 0 : index
    %1 = vector.load %arg4[%c0_1, %c0_2, %c0_3] : memref<1x128x16xbf16, #tpu.memory_space<vmem>>, vector<1x128x16xbf16>
    %2 = vector.shape_cast %1 : vector<1x128x16xbf16> to vector<128x16xbf16>
    %cst = arith.constant dense<0.000000e+00> : vector<256x16xf32>
    %3 = tpu.matmul %0, %2, %cst {dimension_numbers = #tpu.dot_dimension_numbers<[1], [0], [0], [1], [0, 0, 1, 1], [], []>} : vector<256x128xbf16>, vector<128x16xbf16>, vector<256x16xf32> -> vector<256x16xf32>
    %c0_4 = arith.constant 0 : index
    %c0_5 = arith.constant 0 : index
    %4 = vector.load %arg3[%c0_4, %c0_5] : memref<256x1xf32, #tpu.memory_space<vmem>>, vector<256x1xf32>
    %5 = vector.broadcast %4 : vector<256x1xf32> to vector<256x16xf32>
    %6 = arith.mulf %3, %5 : vector<256x16xf32>
    %7 = arith.truncf %6 : vector<256x16xf32> to vector<256x16xbf16>
    %c0_6 = arith.constant 0 : index
    %c0_7 = arith.constant 0 : index
    %8 = vector.load %arg5[%c0_6, %c0_7] : memref<256x16xbf16, #tpu.memory_space<vmem>>, vector<256x16xbf16>
    tpu.vector_store %arg5[%c0_6, %c0_7], %7 {strides = array<i32>} : memref<256x16xbf16, #tpu.memory_space<vmem>>, vector<256x16xbf16>,
    %cst_8 = arith.constant dense<0.000000e+00> : vector<16xf32>
    %9 = vector.multi_reduction <add>, %6, %cst_8 [0] : vector<256x16xf32> to vector<16xf32>
    %10 = vector.shape_cast %9 : vector<16xf32> to vector<1x16xf32>
    %c0_9 = arith.constant 0 : index
    %c0_10 = arith.constant 0 : index
    %c0_11 = arith.constant 0 : index
    %11 = vector.load %arg6[%c0_9, %c0_10, %c0_11] : memref<1x2x16xf32, #tpu.memory_space<vmem>>, vector<1x1x16xf32>
    %12 = vector.shape_cast %11 : vector<1x1x16xf32> to vector<1x16xf32>
    %13 = vector.shape_cast %10 : vector<1x16xf32> to vector<1x1x16xf32>
    tpu.vector_store %arg6[%c0_9, %c0_10, %c0_11], %13 {strides = array<i32>} : memref<1x2x16xf32, #tpu.memory_space<vmem>>, vector<1x1x16xf32>,
    %14 = arith.mulf %6, %6 : vector<256x16xf32>
    %cst_12 = arith.constant dense<0.000000e+00> : vector<16xf32>
    %15 = vector.multi_reduction <add>, %14, %cst_12 [0] : vector<256x16xf32> to vector<16xf32>
    %16 = vector.shape_cast %15 : vector<16xf32> to vector<1x16xf32>
    %c0_13 = arith.constant 0 : index
    %c1 = arith.constant 1 : index
    %c0_14 = arith.constant 0 : index
    %17 = vector.load %arg6[%c0_13, %c1, %c0_14] : memref<1x2x16xf32, #tpu.memory_space<vmem>>, vector<1x1x16xf32>
    %18 = vector.shape_cast %17 : vector<1x1x16xf32> to vector<1x16xf32>
    %19 = vector.shape_cast %16 : vector<1x16xf32> to vector<1x1x16xf32>
    tpu.vector_store %arg6[%c0_13, %c1, %c0_14], %19 {strides = array<i32>} : memref<1x2x16xf32, #tpu.memory_space<vmem>>, vector<1x1x16xf32>,
    return
  }
  func.func @transform_0(%arg0: i32) -> (i32, i32) {
    %c0_i32 = arith.constant 0 : i32
    %c0_i32_0 = arith.constant 0 : i32
    return %arg0, %c0_i32 : i32, i32
  }
  func.func @transform_1(%arg0: i32) -> (i32, i32) {
    %c1_i32 = arith.constant 1 : i32
    %0 = arith.addi %arg0, %c1_i32 : i32
    %c32_i32 = arith.constant 32 : i32
    %1 = arith.muli %0, %c32_i32 : i32
    %c0_i32 = arith.constant 0 : i32
    %c0_i32_0 = arith.constant 0 : i32
    return %1, %c0_i32 : i32, i32
  }
  func.func @transform_2(%arg0: i32) -> (i32, i32) {
    %c0_i32 = arith.constant 0 : i32
    %c0_i32_0 = arith.constant 0 : i32
    return %arg0, %c0_i32 : i32, i32
  }
  func.func @transform_3(%arg0: i32) -> (i32, i32, i32) {
    %c0_i32 = arith.constant 0 : i32
    %c0_i32_0 = arith.constant 0 : i32
    %c0_i32_1 = arith.constant 0 : i32
    %c0_i32_2 = arith.constant 0 : i32
    return %c0_i32, %c0_i32_0, %c0_i32_1 : i32, i32, i32
  }
  func.func @transform_4(%arg0: i32) -> (i32, i32) {
    %c0_i32 = arith.constant 0 : i32
    %c0_i32_0 = arith.constant 0 : i32
    return %arg0, %c0_i32 : i32, i32
  }
  func.func @transform_5(%arg0: i32) -> (i32, i32, i32) {
    %c0_i32 = arith.constant 0 : i32
    %c0_i32_0 = arith.constant 0 : i32
    %c0_i32_1 = arith.constant 0 : i32
    return %arg0, %c0_i32, %c0_i32_0 : i32, i32, i32
  }
}

module attributes {stable_mosaic.version = 11 : i64} {
  func.func @_conv_kernel(%arg0: i32, %arg1: memref<72x128xbf16, #tpu.memory_space<vmem>>, %arg2: memref<8x128xbf16, #tpu.memory_space<vmem>>, %arg3: memref<72x1xf32, #tpu.memory_space<vmem>>, %arg4: memref<2x128x32xbf16, #tpu.memory_space<vmem>>, %arg5: memref<72x32xbf16, #tpu.memory_space<vmem>>, %arg6: memref<1x2x32xf32, #tpu.memory_space<vmem>>) attributes {dimension_semantics = [#tpu.dimension_semantics<parallel>], iteration_bounds = array<i64: 2>, scalar_prefetch = 0 : i64, scratch_operands = 0 : i64, tpu.core_type = #tpu.core_type<tc>, window_params = [{transform_indices = @transform_0, window_bounds = array<i64: 72, 128>}, {transform_indices = @transform_1, window_bounds = array<i64: 8, 128>}, {transform_indices = @transform_2, window_bounds = array<i64: 72, 1>}, {pipeline_mode = #tpu.pipeline_mode<synchronous>, transform_indices = @transform_3, window_bounds = array<i64: 2, 128, 32>}, {transform_indices = @transform_4, window_bounds = array<i64: 72, 32>}, {transform_indices = @transform_5, window_bounds = array<i64: 1, 2, 32>}]} {
    %c0 = arith.constant 0 : index
    %c0_0 = arith.constant 0 : index
    %0 = vector.load %arg1[%c0, %c0_0] : memref<72x128xbf16, #tpu.memory_space<vmem>>, vector<72x128xbf16>
    %c0_1 = arith.constant 0 : index
    %c0_2 = arith.constant 0 : index
    %c0_3 = arith.constant 0 : index
    %1 = vector.load %arg4[%c0_1, %c0_2, %c0_3] : memref<2x128x32xbf16, #tpu.memory_space<vmem>>, vector<1x128x32xbf16>
    %2 = vector.shape_cast %1 : vector<1x128x32xbf16> to vector<128x32xbf16>
    %cst = arith.constant dense<0.000000e+00> : vector<72x32xf32>
    %3 = tpu.matmul %0, %2, %cst {dimension_numbers = #tpu.dot_dimension_numbers<[1], [0], [0], [1], [0, 0, 1, 1], [], []>} : vector<72x128xbf16>, vector<128x32xbf16>, vector<72x32xf32> -> vector<72x32xf32>
    %4 = vector.extract_strided_slice %0 {offsets = [8, 0], sizes = [64, 128], strides = [1, 1]} : vector<72x128xbf16> to vector<64x128xbf16>
    %c0_4 = arith.constant 0 : index
    %c0_5 = arith.constant 0 : index
    %5 = vector.load %arg2[%c0_4, %c0_5] : memref<8x128xbf16, #tpu.memory_space<vmem>>, vector<8x128xbf16>
    %6 = tpu.concatenate %4, %5 in 0 : vector<64x128xbf16>, vector<8x128xbf16> -> vector<72x128xbf16>
    %c1 = arith.constant 1 : index
    %c0_6 = arith.constant 0 : index
    %c0_7 = arith.constant 0 : index
    %7 = vector.load %arg4[%c1, %c0_6, %c0_7] : memref<2x128x32xbf16, #tpu.memory_space<vmem>>, vector<1x128x32xbf16>
    %8 = vector.shape_cast %7 : vector<1x128x32xbf16> to vector<128x32xbf16>
    %cst_8 = arith.constant dense<0.000000e+00> : vector<72x32xf32>
    %9 = tpu.matmul %6, %8, %cst_8 {dimension_numbers = #tpu.dot_dimension_numbers<[1], [0], [0], [1], [0, 0, 1, 1], [], []>} : vector<72x128xbf16>, vector<128x32xbf16>, vector<72x32xf32> -> vector<72x32xf32>
    %10 = arith.addf %3, %9 : vector<72x32xf32>
    %c0_9 = arith.constant 0 : index
    %c0_10 = arith.constant 0 : index
    %11 = vector.load %arg3[%c0_9, %c0_10] : memref<72x1xf32, #tpu.memory_space<vmem>>, vector<72x1xf32>
    %12 = vector.broadcast %11 : vector<72x1xf32> to vector<72x32xf32>
    %13 = arith.mulf %10, %12 : vector<72x32xf32>
    %14 = arith.truncf %13 : vector<72x32xf32> to vector<72x32xbf16>
    %c0_11 = arith.constant 0 : index
    %c0_12 = arith.constant 0 : index
    %15 = vector.load %arg5[%c0_11, %c0_12] : memref<72x32xbf16, #tpu.memory_space<vmem>>, vector<72x32xbf16>
    tpu.vector_store %arg5[%c0_11, %c0_12], %14 {strides = array<i32>} : memref<72x32xbf16, #tpu.memory_space<vmem>>, vector<72x32xbf16>,
    %cst_13 = arith.constant dense<0.000000e+00> : vector<32xf32>
    %16 = vector.multi_reduction <add>, %13, %cst_13 [0] : vector<72x32xf32> to vector<32xf32>
    %17 = vector.shape_cast %16 : vector<32xf32> to vector<1x32xf32>
    %c0_14 = arith.constant 0 : index
    %c0_15 = arith.constant 0 : index
    %c0_16 = arith.constant 0 : index
    %18 = vector.load %arg6[%c0_14, %c0_15, %c0_16] : memref<1x2x32xf32, #tpu.memory_space<vmem>>, vector<1x1x32xf32>
    %19 = vector.shape_cast %18 : vector<1x1x32xf32> to vector<1x32xf32>
    %20 = vector.shape_cast %17 : vector<1x32xf32> to vector<1x1x32xf32>
    tpu.vector_store %arg6[%c0_14, %c0_15, %c0_16], %20 {strides = array<i32>} : memref<1x2x32xf32, #tpu.memory_space<vmem>>, vector<1x1x32xf32>,
    %21 = arith.mulf %13, %13 : vector<72x32xf32>
    %cst_17 = arith.constant dense<0.000000e+00> : vector<32xf32>
    %22 = vector.multi_reduction <add>, %21, %cst_17 [0] : vector<72x32xf32> to vector<32xf32>
    %23 = vector.shape_cast %22 : vector<32xf32> to vector<1x32xf32>
    %c0_18 = arith.constant 0 : index
    %c1_19 = arith.constant 1 : index
    %c0_20 = arith.constant 0 : index
    %24 = vector.load %arg6[%c0_18, %c1_19, %c0_20] : memref<1x2x32xf32, #tpu.memory_space<vmem>>, vector<1x1x32xf32>
    %25 = vector.shape_cast %24 : vector<1x1x32xf32> to vector<1x32xf32>
    %26 = vector.shape_cast %23 : vector<1x32xf32> to vector<1x1x32xf32>
    tpu.vector_store %arg6[%c0_18, %c1_19, %c0_20], %26 {strides = array<i32>} : memref<1x2x32xf32, #tpu.memory_space<vmem>>, vector<1x1x32xf32>,
    return
  }
  func.func @transform_0(%arg0: i32) -> (i32, i32) {
    %c0_i32 = arith.constant 0 : i32
    %c0_i32_0 = arith.constant 0 : i32
    return %arg0, %c0_i32 : i32, i32
  }
  func.func @transform_1(%arg0: i32) -> (i32, i32) {
    %c1_i32 = arith.constant 1 : i32
    %0 = arith.addi %arg0, %c1_i32 : i32
    %c9_i32 = arith.constant 9 : i32
    %1 = arith.muli %0, %c9_i32 : i32
    %c0_i32 = arith.constant 0 : i32
    %c0_i32_0 = arith.constant 0 : i32
    return %1, %c0_i32 : i32, i32
  }
  func.func @transform_2(%arg0: i32) -> (i32, i32) {
    %c0_i32 = arith.constant 0 : i32
    %c0_i32_0 = arith.constant 0 : i32
    return %arg0, %c0_i32 : i32, i32
  }
  func.func @transform_3(%arg0: i32) -> (i32, i32, i32) {
    %c0_i32 = arith.constant 0 : i32
    %c0_i32_0 = arith.constant 0 : i32
    %c0_i32_1 = arith.constant 0 : i32
    %c0_i32_2 = arith.constant 0 : i32
    return %c0_i32, %c0_i32_0, %c0_i32_1 : i32, i32, i32
  }
  func.func @transform_4(%arg0: i32) -> (i32, i32) {
    %c0_i32 = arith.constant 0 : i32
    %c0_i32_0 = arith.constant 0 : i32
    return %arg0, %c0_i32 : i32, i32
  }
  func.func @transform_5(%arg0: i32) -> (i32, i32, i32) {
    %c0_i32 = arith.constant 0 : i32
    %c0_i32_0 = arith.constant 0 : i32
    %c0_i32_1 = arith.constant 0 : i32
    return %arg0, %c0_i32, %c0_i32_0 : i32, i32, i32
  }
}

module attributes {stable_mosaic.version = 11 : i64} {
  func.func @_conv_kernel(%arg0: i32, %arg1: memref<40x256xbf16, #tpu.memory_space<vmem>>, %arg2: memref<8x256xbf16, #tpu.memory_space<vmem>>, %arg3: memref<40x1xf32, #tpu.memory_space<vmem>>, %arg4: memref<2x256x64xbf16, #tpu.memory_space<vmem>>, %arg5: memref<40x64xbf16, #tpu.memory_space<vmem>>, %arg6: memref<1x2x64xf32, #tpu.memory_space<vmem>>) attributes {dimension_semantics = [#tpu.dimension_semantics<parallel>], iteration_bounds = array<i64: 2>, scalar_prefetch = 0 : i64, scratch_operands = 0 : i64, tpu.core_type = #tpu.core_type<tc>, window_params = [{transform_indices = @transform_0, window_bounds = array<i64: 40, 256>}, {transform_indices = @transform_1, window_bounds = array<i64: 8, 256>}, {transform_indices = @transform_2, window_bounds = array<i64: 40, 1>}, {pipeline_mode = #tpu.pipeline_mode<synchronous>, transform_indices = @transform_3, window_bounds = array<i64: 2, 256, 64>}, {transform_indices = @transform_4, window_bounds = array<i64: 40, 64>}, {transform_indices = @transform_5, window_bounds = array<i64: 1, 2, 64>}]} {
    %c0 = arith.constant 0 : index
    %c0_0 = arith.constant 0 : index
    %0 = vector.load %arg1[%c0, %c0_0] : memref<40x256xbf16, #tpu.memory_space<vmem>>, vector<40x256xbf16>
    %c0_1 = arith.constant 0 : index
    %c0_2 = arith.constant 0 : index
    %c0_3 = arith.constant 0 : index
    %1 = vector.load %arg4[%c0_1, %c0_2, %c0_3] : memref<2x256x64xbf16, #tpu.memory_space<vmem>>, vector<1x256x64xbf16>
    %2 = vector.shape_cast %1 : vector<1x256x64xbf16> to vector<256x64xbf16>
    %cst = arith.constant dense<0.000000e+00> : vector<40x64xf32>
    %3 = tpu.matmul %0, %2, %cst {dimension_numbers = #tpu.dot_dimension_numbers<[1], [0], [0], [1], [0, 0, 1, 1], [], []>} : vector<40x256xbf16>, vector<256x64xbf16>, vector<40x64xf32> -> vector<40x64xf32>
    %4 = vector.extract_strided_slice %0 {offsets = [8, 0], sizes = [32, 256], strides = [1, 1]} : vector<40x256xbf16> to vector<32x256xbf16>
    %c0_4 = arith.constant 0 : index
    %c0_5 = arith.constant 0 : index
    %5 = vector.load %arg2[%c0_4, %c0_5] : memref<8x256xbf16, #tpu.memory_space<vmem>>, vector<8x256xbf16>
    %6 = tpu.concatenate %4, %5 in 0 : vector<32x256xbf16>, vector<8x256xbf16> -> vector<40x256xbf16>
    %c1 = arith.constant 1 : index
    %c0_6 = arith.constant 0 : index
    %c0_7 = arith.constant 0 : index
    %7 = vector.load %arg4[%c1, %c0_6, %c0_7] : memref<2x256x64xbf16, #tpu.memory_space<vmem>>, vector<1x256x64xbf16>
    %8 = vector.shape_cast %7 : vector<1x256x64xbf16> to vector<256x64xbf16>
    %cst_8 = arith.constant dense<0.000000e+00> : vector<40x64xf32>
    %9 = tpu.matmul %6, %8, %cst_8 {dimension_numbers = #tpu.dot_dimension_numbers<[1], [0], [0], [1], [0, 0, 1, 1], [], []>} : vector<40x256xbf16>, vector<256x64xbf16>, vector<40x64xf32> -> vector<40x64xf32>
    %10 = arith.addf %3, %9 : vector<40x64xf32>
    %c0_9 = arith.constant 0 : index
    %c0_10 = arith.constant 0 : index
    %11 = vector.load %arg3[%c0_9, %c0_10] : memref<40x1xf32, #tpu.memory_space<vmem>>, vector<40x1xf32>
    %12 = vector.broadcast %11 : vector<40x1xf32> to vector<40x64xf32>
    %13 = arith.mulf %10, %12 : vector<40x64xf32>
    %14 = arith.truncf %13 : vector<40x64xf32> to vector<40x64xbf16>
    %c0_11 = arith.constant 0 : index
    %c0_12 = arith.constant 0 : index
    %15 = vector.load %arg5[%c0_11, %c0_12] : memref<40x64xbf16, #tpu.memory_space<vmem>>, vector<40x64xbf16>
    tpu.vector_store %arg5[%c0_11, %c0_12], %14 {strides = array<i32>} : memref<40x64xbf16, #tpu.memory_space<vmem>>, vector<40x64xbf16>,
    %cst_13 = arith.constant dense<0.000000e+00> : vector<64xf32>
    %16 = vector.multi_reduction <add>, %13, %cst_13 [0] : vector<40x64xf32> to vector<64xf32>
    %17 = vector.shape_cast %16 : vector<64xf32> to vector<1x64xf32>
    %c0_14 = arith.constant 0 : index
    %c0_15 = arith.constant 0 : index
    %c0_16 = arith.constant 0 : index
    %18 = vector.load %arg6[%c0_14, %c0_15, %c0_16] : memref<1x2x64xf32, #tpu.memory_space<vmem>>, vector<1x1x64xf32>
    %19 = vector.shape_cast %18 : vector<1x1x64xf32> to vector<1x64xf32>
    %20 = vector.shape_cast %17 : vector<1x64xf32> to vector<1x1x64xf32>
    tpu.vector_store %arg6[%c0_14, %c0_15, %c0_16], %20 {strides = array<i32>} : memref<1x2x64xf32, #tpu.memory_space<vmem>>, vector<1x1x64xf32>,
    %21 = arith.mulf %13, %13 : vector<40x64xf32>
    %cst_17 = arith.constant dense<0.000000e+00> : vector<64xf32>
    %22 = vector.multi_reduction <add>, %21, %cst_17 [0] : vector<40x64xf32> to vector<64xf32>
    %23 = vector.shape_cast %22 : vector<64xf32> to vector<1x64xf32>
    %c0_18 = arith.constant 0 : index
    %c1_19 = arith.constant 1 : index
    %c0_20 = arith.constant 0 : index
    %24 = vector.load %arg6[%c0_18, %c1_19, %c0_20] : memref<1x2x64xf32, #tpu.memory_space<vmem>>, vector<1x1x64xf32>
    %25 = vector.shape_cast %24 : vector<1x1x64xf32> to vector<1x64xf32>
    %26 = vector.shape_cast %23 : vector<1x64xf32> to vector<1x1x64xf32>
    tpu.vector_store %arg6[%c0_18, %c1_19, %c0_20], %26 {strides = array<i32>} : memref<1x2x64xf32, #tpu.memory_space<vmem>>, vector<1x1x64xf32>,
    return
  }
  func.func @transform_0(%arg0: i32) -> (i32, i32) {
    %c0_i32 = arith.constant 0 : i32
    %c0_i32_0 = arith.constant 0 : i32
    return %arg0, %c0_i32 : i32, i32
  }
  func.func @transform_1(%arg0: i32) -> (i32, i32) {
    %c1_i32 = arith.constant 1 : i32
    %0 = arith.addi %arg0, %c1_i32 : i32
    %c5_i32 = arith.constant 5 : i32
    %1 = arith.muli %0, %c5_i32 : i32
    %c0_i32 = arith.constant 0 : i32
    %c0_i32_0 = arith.constant 0 : i32
    return %1, %c0_i32 : i32, i32
  }
  func.func @transform_2(%arg0: i32) -> (i32, i32) {
    %c0_i32 = arith.constant 0 : i32
    %c0_i32_0 = arith.constant 0 : i32
    return %arg0, %c0_i32 : i32, i32
  }
  func.func @transform_3(%arg0: i32) -> (i32, i32, i32) {
    %c0_i32 = arith.constant 0 : i32
    %c0_i32_0 = arith.constant 0 : i32
    %c0_i32_1 = arith.constant 0 : i32
    %c0_i32_2 = arith.constant 0 : i32
    return %c0_i32, %c0_i32_0, %c0_i32_1 : i32, i32, i32
  }
  func.func @transform_4(%arg0: i32) -> (i32, i32) {
    %c0_i32 = arith.constant 0 : i32
    %c0_i32_0 = arith.constant 0 : i32
    return %arg0, %c0_i32 : i32, i32
  }
  func.func @transform_5(%arg0: i32) -> (i32, i32, i32) {
    %c0_i32 = arith.constant 0 : i32
    %c0_i32_0 = arith.constant 0 : i32
    %c0_i32_1 = arith.constant 0 : i32
    return %arg0, %c0_i32, %c0_i32_0 : i32, i32, i32
  }
}

module attributes {stable_mosaic.version = 11 : i64} {
  func.func @_final_conv_kernel(%arg0: memref<2x1024xf32, #tpu.memory_space<vmem>>, %arg1: memref<1x1024xf32, #tpu.memory_space<vmem>>, %arg2: memref<2x1xf32, #tpu.memory_space<vmem>>) attributes {dimension_semantics = [], scalar_prefetch = 0 : i64, scratch_operands = 0 : i64, tpu.core_type = #tpu.core_type<tc>} {
    %c0 = arith.constant 0 : index
    %c0_0 = arith.constant 0 : index
    %0 = vector.load %arg0[%c0, %c0_0] : memref<2x1024xf32, #tpu.memory_space<vmem>>, vector<2x1024xf32>
    %c0_1 = arith.constant 0 : index
    %c0_2 = arith.constant 0 : index
    %1 = vector.load %arg1[%c0_1, %c0_2] : memref<1x1024xf32, #tpu.memory_space<vmem>>, vector<1x1024xf32>
    %2 = vector.broadcast %1 : vector<1x1024xf32> to vector<2x1024xf32>
    %3 = arith.mulf %0, %2 : vector<2x1024xf32>
    %cst = arith.constant dense<0.000000e+00> : vector<2xf32>
    %4 = vector.multi_reduction <add>, %3, %cst [1] : vector<2x1024xf32> to vector<2xf32>
    %5 = vector.shape_cast %4 : vector<2xf32> to vector<2x1xf32>
    %c0_3 = arith.constant 0 : index
    %c0_4 = arith.constant 0 : index
    %6 = vector.load %arg2[%c0_3, %c0_4] : memref<2x1xf32, #tpu.memory_space<vmem>>, vector<2x1xf32>
    tpu.vector_store %arg2[%c0_3, %c0_4], %5 {strides = array<i32>} : memref<2x1xf32, #tpu.memory_space<vmem>>, vector<2x1xf32>,
    return
  }
}

</mosaic_0001>

<bundles_post_ra>
// kernel: critic_forward.5
= control target key start
LH: loop header
LB: loop body
LE: loop exit
PB: predicated region body
PF: predicated region fallthrough
CT: control target
= control target key end

     0   :  { %s4556_s18 = smov 0   ;;  %s6458_s0 = inlined_call_operand.vmem [shape: bf16[2056,48], index: 0, kind: input, shape index: {}, may-alias: {0,1}]   ;;  %s6459_s1 = inlined_call_operand.vmem [shape: bf16[2056,48], index: 1, kind: input, shape index: {}, may-alias: {0,1}]   ;;  %s6460_s2 = inlined_call_operand.vmem [shape: f32[2048,1], index: 2, kind: input, shape index: {}]   ;;  %s6461_s3 = inlined_call_operand.vmem [shape: bf16[1,48,8], index: 3, kind: input, shape index: {}]   ;;  %s6462_s4 = inlined_call_operand.vmem [shape: bf16[2048,8], index: 4, kind: output, shape index: {0}]   ;;  %s6463_s5 = inlined_call_operand.vmem [shape: f32[2,2,8], index: 5, kind: output, shape index: {1}]  }
   0x1 LB: > { %s4562_s1 = sadd.s32 4294967295, %s4523_s18   ;;  %p3831_p0 = scmp.ge.s32.totalorder %s4523_s18, 1  ;;  %s4523_s18 = sphi %s4556_s18, %s16_s18  }
   0x2   : > { %p227_p1 = scmp.lt.s32.totalorder %s4523_s18, 3 }
   0x4   : > { %p228_p2 = pnand %p3831_p0, %p227_p1 }
   0x6   : > { %231 = sbr.rel (%p228_p2) target bundleno = 532 (0x214), region = 36 }
   0xd   : > { %v4450_v0 = vld [vmem:[%s6461_s3] sm:$0xff]   ;;  %v4525_v1 = vmov 0   ;;  %v4451_v2 = vld [vmem:[%s6461_s3 + $0x8] sm:$0xff]   ;;  %s3832_s23 = sshll.u32 %s4562_s1, 7  ;;  %v4452_v3 = vld [vmem:[%s6461_s3 + $0x10] sm:$0xff]   ;;  %vm785_vm0 = vcmask 392192  }
   0xe   : > { %4449 = vset.pattern.permute.xlu1 %v4525_v1  ;;  %4448 = vset.pattern.permute.xlu0 %v4525_v1  ;;  %p297_p3 = scmp.lt.s32.totalorder %s3832_s23, 255  ;;  %p279_p4 = scmp.lt.s32.totalorder %s3832_s23, 256  ;;  %vm2931_vm1 = vcmask 60416   ;;  %vm3060_vm2 = vcmask 64512   ;;  %vm3322_vm3 = vcmask 57344  }
   0xf   : > { %4299 = vmatprep.subr.bf16.mxu0 %v4450_v0  ;;  %4433 = vmatprep.subr.bf16.mxu1 %v4450_v0  ;;  %p308_p5 = scmp.lt.s32.totalorder %s4562_s1, 1 }
  0x10   : > { %4300 = vmatpush3.bf16.msra.mxu0 %v4450_v0  ;;  %4436 = vmatpush3.bf16.msra.mxu1 %v4450_v0  ;;  %s4573_s24 = scalar_select %p297_p3, %s3832_s23, 255 }
  0x11   : > { %4301 = vmatprep.subr.bf16.mxu0 %v4451_v2  ;;  %4434 = vmatprep.subr.bf16.mxu1 %v4451_v2  ;;  %s6655_s23 = smov (!%p279_p4, %s3832_s23), 256  ;;  %s6657_s1 = smov (!%p308_p5, %s4562_s1), 1 }
  0x12   : > { %s3835_s27 = sshll.u32 %s4573_s24, 3  ;;  %s3833_s6 = sshll.u32 %s6655_s23, 2 }
  0x13   : > { %s4582_s30 = scalar_lea.vmem %s6460_s2, %s3835_s27  ;;  %s4591_s9 = scalar_lea.vmem %s6458_s0, %s3833_s6 }
  0x14   : > { %4302 = vmatpush3.bf16.msra.mxu0 %v4451_v2  ;;  %4437 = vmatpush3.bf16.msra.mxu1 %v4451_v2  ;;  %v1525_v4 = vld [vmem:[%s4582_s30 + $0x10] sm:$0xff]  ;;  %v1523_v5 = vld [vmem:[%s4582_s30] sm:$0xff]  ;;  %v1526_v6 = vld [vmem:[%s4582_s30 + $0x18] sm:$0xff]  ;;  %s3837_s10 = sshll.u32 %s4573_s24, 2  ;;  %s3838_s14 = sshll.u32 %s6657_s1, 1 }
  0x15   : > { %4303 = vmatprep.subr.bf16.mxu0 %v4452_v3  ;;  %4435 = vmatprep.subr.bf16.mxu1 %v4452_v3  ;;  %v1524_v7 = vld [vmem:[%s4582_s30 + $0x8] sm:$0xff]  ;;  %v4453_v8 = vld [vmem:[%s4591_s9] sm:$0xff]   ;;  %v4455_v10 = vld [vmem:[%s4591_s9 + $0x10] sm:$0xff]   ;;  %s4926_s13 = scalar_lea.vmem %s6462_s4, %s3837_s10  ;;  %s311_s17 = scalar_lea.vmem %s6463_s5, %s3838_s14 }
  0x16   : > { %1663 = vperm.xlu1 %4449, %v1525_v4   ;;  %1653 = vperm.xlu0 %4448, %v1523_v5   ;;  %v4454_v9 = vld [vmem:[%s4591_s9 + $0x8] sm:$0xff]   ;;  %v1527_v12 = vld [vmem:[%s4582_s30 + $0x20] sm:$0xff]  ;;  %v1530_v13 = vld [vmem:[%s4582_s30 + $0x38] sm:$0xff] }
  0x17   : > { %4305 = vmatprep.mubr.msk.bf16.mxu0 %vm785_vm0, %v4453_v8  ;;  %v1528_v11 = vld [vmem:[%s4582_s30 + $0x28] sm:$0xff]  ;;  %v1529_v14 = vld [vmem:[%s4582_s30 + $0x30] sm:$0xff]  ;;  %v4456_v15 = vld [vmem:[%s4591_s9 + $0x18] sm:$0xff]  }
  0x18   : > { %4304 = vmatpush3.bf16.msra.mxu0 %v4452_v3  ;;  %4438 = vmatpush3.bf16.msra.mxu1 %v4452_v3  ;;  %v4457_v16 = vld [vmem:[%s4591_s9 + $0x20] sm:$0xff]   ;;  %v1532_v17 = vld [vmem:[%s4582_s30 + $0x48] sm:$0xff]  ;;  %v1534_v19 = vld [vmem:[%s4582_s30 + $0x58] sm:$0xff] }
  0x19   : > { %v1531_v18 = vld [vmem:[%s4582_s30 + $0x40] sm:$0xff]  ;;  %v1533_v20 = vld [vmem:[%s4582_s30 + $0x50] sm:$0xff]  ;;  %v4458_v21 = vld [vmem:[%s4591_s9 + $0x28] sm:$0xff]  }
  0x1a   : > { %1668 = vperm.xlu1 %4449, %v1526_v6   ;;  %1658 = vperm.xlu0 %4448, %v1524_v7   ;;  %v4463_v22 = vld [vmem:[%s4591_s9 + $0x100] sm:$0xff]   ;;  %v4459_v23 = vld [vmem:[%s4591_s9 + $0x30] sm:$0xff]   ;;  %v4464_v24 = vld [vmem:[%s4591_s9 + $0x108] sm:$0xff]  }
  0x1b   : > { %4306 = vmatmul.mubr.msk.bf16.vlgmr.msra.gmra.mrb[0].mxu0 %vm785_vm0, %v4454_v9  ;;  %4369 = vmatprep.mubr.msk.bf16.mxu1 %vm785_vm0, %v4463_v22  ;;  %v1536_v25 = vld [vmem:[%s4582_s30 + $0x68] sm:$0xff]  ;;  %v1535_v26 = vld [vmem:[%s4582_s30 + $0x60] sm:$0xff]  ;;  %v4467_v27 = vld [vmem:[%s4591_s9 + $0x110] sm:$0xff]  }
  0x1c   : > { %4309 = vmatprep.mubr.msk.bf16.mxu0 %vm785_vm0, %v4455_v10  ;;  %4370 = vmatmul.mubr.msk.bf16.vlgmr.msra.gmra.mrb[0].mxu1 %vm785_vm0, %v4464_v24  ;;  %v1538_v28 = vld [vmem:[%s4582_s30 + $0x78] sm:$0xff]  ;;  %v1537_v29 = vld [vmem:[%s4582_s30 + $0x70] sm:$0xff]  ;;  %v4461_v32 = vld [vmem:[%s4591_s9 + $0x40] sm:$0xff]  }
  0x1d   : > { %v4460_v30 = vld [vmem:[%s4591_s9 + $0x38] sm:$0xff]   ;;  %4373 = vmatprep.mubr.msk.bf16.mxu1 %vm785_vm0, %v4467_v27  ;;  %v4471_v33 = vld [vmem:[%s4591_s9 + $0x120] sm:$0xff]   ;;  %v1540_v34 = vld [vmem:[%s4582_s30 + $0x88] sm:$0xff] }
  0x1e   : > { %1678 = vperm.xlu1 %4449, %v1528_v11   ;;  %1673 = vperm.xlu0 %4448, %v1527_v12   ;;  %v4468_v31 = vld [vmem:[%s4591_s9 + $0x118] sm:$0xff]   ;;  %v1539_v35 = vld [vmem:[%s4582_s30 + $0x80] sm:$0xff]  ;;  %v1541_v37 = vld [vmem:[%s4582_s30 + $0x90] sm:$0xff] }
  0x1f   : > { %v1542_v36 = vld [vmem:[%s4582_s30 + $0x98] sm:$0xff]  ;;  %v4462_v38 = vld [vmem:[%s4591_s9 + $0x48] sm:$0xff]   ;;  %v4465_v40 = vld [vmem:[%s4591_s9 + $0x50] sm:$0xff]  }
  0x20   : > { %v4472_v39 = vld [vmem:[%s4591_s9 + $0x128] sm:$0xff]   ;;  %v4475_v41 = vld [vmem:[%s4591_s9 + $0x130] sm:$0xff]   ;;  %v1543_v43 = vld [vmem:[%s4582_s30 + $0xa0] sm:$0xff] }
  0x21   : > { %v1544_v42 = vld [vmem:[%s4582_s30 + $0xa8] sm:$0xff]  ;;  %v1546_v44 = vld [vmem:[%s4582_s30 + $0xb8] sm:$0xff]  ;;  %v1545_v45 = vld [vmem:[%s4582_s30 + $0xb0] sm:$0xff] }
  0x22   : > { %1688 = vperm.xlu1 %4449, %v1530_v13   ;;  %1683 = vperm.xlu0 %4448, %v1529_v14   ;;  %v4466_v46 = vld [vmem:[%s4591_s9 + $0x58] sm:$0xff]   ;;  %v4469_v48 = vld [vmem:[%s4591_s9 + $0x60] sm:$0xff]   ;;  %v1548_v50 = vld [vmem:[%s4582_s30 + $0xc8] sm:$0xff] }
  0x23   : > { %4310 = vmatmul.mubr.msk.bf16.gmra.mrb[4].mxu0 %vm785_vm0, %v4456_v15  ;;  %v4476_v47 = vld [vmem:[%s4591_s9 + $0x138] sm:$0xff]   ;;  %v4479_v49 = vld [vmem:[%s4591_s9 + $0x140] sm:$0xff]   ;;  %v1549_v53 = vld [vmem:[%s4582_s30 + $0xd0] sm:$0xff] }
  0x24   : > { %4313 = vmatprep.mubr.msk.bf16.mxu0 %vm785_vm0, %v4457_v16  ;;  %4374 = vmatmul.mubr.msk.bf16.gmra.mrb[4].mxu1 %vm785_vm0, %v4468_v31  ;;  %v1547_v51 = vld [vmem:[%s4582_s30 + $0xc0] sm:$0xff]  ;;  %v1550_v52 = vld [vmem:[%s4582_s30 + $0xd8] sm:$0xff]  ;;  %v4470_v54 = vld [vmem:[%s4591_s9 + $0x68] sm:$0xff]  }
  0x25   : > { %4377 = vmatprep.mubr.msk.bf16.mxu1 %vm785_vm0, %v4471_v33  ;;  %v4480_v55 = vld [vmem:[%s4591_s9 + $0x148] sm:$0xff]   ;;  %v4473_v56 = vld [vmem:[%s4591_s9 + $0x70] sm:$0xff]   ;;  %v1551_v59 = vld [vmem:[%s4582_s30 + $0xe0] sm:$0xff] }
  0x26   : > { %1698 = vperm.xlu1 %4449, %v1532_v17   ;;  %1693 = vperm.xlu0 %4448, %v1531_v18   ;;  %v4483_v57 = vld [vmem:[%s4591_s9 + $0x150] sm:$0xff]   ;;  %v1552_v58 = vld [vmem:[%s4582_s30 + $0xe8] sm:$0xff]  ;;  %v1554_v60 = vld [vmem:[%s4582_s30 + $0xf8] sm:$0xff] }
  0x27   : > { %v1553_v61 = vld [vmem:[%s4582_s30 + $0xf0] sm:$0xff]  ;;  %v4474_v62 = vld [vmem:[%s4591_s9 + $0x78] sm:$0xff]   ;;  %v4477_v0 = vld [vmem:[%s4591_s9 + $0x80] sm:$0xff]  }
  0x28   : > { %v4484_v63 = vld [vmem:[%s4591_s9 + $0x158] sm:$0xff]   ;;  %v4487_v1 = vld [vmem:[%s4591_s9 + $0x160] sm:$0xff]   ;;  %v1556_v2 = vld [vmem:[%s4582_s30 + $0x108] sm:$0xff] }
  0x29   : > { %v1555_v3 = vld [vmem:[%s4582_s30 + $0x100] sm:$0xff]  ;;  %v1558_v4 = vld [vmem:[%s4582_s30 + $0x118] sm:$0xff]  ;;  %v1557_v5 = vld [vmem:[%s4582_s30 + $0x110] sm:$0xff] }
  0x2a   : > { %1708 = vperm.xlu1 %4449, %v1534_v19   ;;  %1703 = vperm.xlu0 %4448, %v1533_v20   ;;  %v4478_v6 = vld [vmem:[%s4591_s9 + $0x88] sm:$0xff]   ;;  %v4481_v8 = vld [vmem:[%s4591_s9 + $0x90] sm:$0xff]   ;;  %v1559_v11 = vld [vmem:[%s4582_s30 + $0x120] sm:$0xff] }
  0x2b   : > { %4314 = vmatmul.mubr.msk.bf16.gmra.mrb[8].mxu0 %vm785_vm0, %v4458_v21  ;;  %v4488_v7 = vld [vmem:[%s4591_s9 + $0x168] sm:$0xff]   ;;  %v4491_v9 = vld [vmem:[%s4591_s9 + $0x170] sm:$0xff]   ;;  %v1562_v12 = vld [vmem:[%s4582_s30 + $0x138] sm:$0xff] }
  0x2c   : > { %4317 = vmatprep.mubr.msk.bf16.mxu0 %vm785_vm0, %v4459_v23  ;;  %4378 = vmatmul.mubr.msk.bf16.gmra.mrb[8].mxu1 %vm785_vm0, %v4472_v39  ;;  %v1560_v10 = vld [vmem:[%s4582_s30 + $0x128] sm:$0xff]  ;;  %v1561_v13 = vld [vmem:[%s4582_s30 + $0x130] sm:$0xff]  ;;  %v4482_v14 = vld [vmem:[%s4591_s9 + $0x98] sm:$0xff]  }
  0x2d   : > { %4381 = vmatprep.mubr.msk.bf16.mxu1 %vm785_vm0, %v4475_v41  ;;  %v4492_v15 = vld [vmem:[%s4591_s9 + $0x178] sm:$0xff]   ;;  %v4485_v16 = vld [vmem:[%s4591_s9 + $0xa0] sm:$0xff]   ;;  %v1564_v18 = vld [vmem:[%s4582_s30 + $0x148] sm:$0xff] }
  0x2e   : > { %1718 = vperm.xlu1 %4449, %v1536_v25   ;;  %1713 = vperm.xlu0 %4448, %v1535_v26   ;;  %v4495_v17 = vld [vmem:[%s4591_s9 + $0x180] sm:$0xff]   ;;  %v1566_v20 = vld [vmem:[%s4582_s30 + $0x158] sm:$0xff]  ;;  %v1565_v21 = vld [vmem:[%s4582_s30 + $0x150] sm:$0xff] }
  0x2f   : > { %v1563_v19 = vld [vmem:[%s4582_s30 + $0x140] sm:$0xff]  ;;  %v4486_v22 = vld [vmem:[%s4591_s9 + $0xa8] sm:$0xff]   ;;  %v4489_v23 = vld [vmem:[%s4591_s9 + $0xb0] sm:$0xff]  }
  0x30   : > { %v4496_v24 = vld [vmem:[%s4591_s9 + $0x188] sm:$0xff]   ;;  %v4499_v25 = vld [vmem:[%s4591_s9 + $0x190] sm:$0xff]   ;;  %v1567_v27 = vld [vmem:[%s4582_s30 + $0x160] sm:$0xff] }
  0x31   : > { %v1568_v26 = vld [vmem:[%s4582_s30 + $0x168] sm:$0xff]  ;;  %v4500_v31 = vld [vmem:[%s4591_s9 + $0x198] sm:$0xff]   ;;  %v4503_v33 = vld [vmem:[%s4591_s9 + $0x1a0] sm:$0xff]  }
  0x32   : > { %1728 = vperm.xlu1 %4449, %v1538_v28   ;;  %1723 = vperm.xlu0 %4448, %v1537_v29   ;;  %v1570_v28 = vld [vmem:[%s4582_s30 + $0x178] sm:$0xff]  ;;  %v1569_v29 = vld [vmem:[%s4582_s30 + $0x170] sm:$0xff]  ;;  %v4504_v39 = vld [vmem:[%s4591_s9 + $0x1a8] sm:$0xff]  }
  0x33   : > { %4318 = vmatmul.mubr.msk.bf16.gmra.mrb[12].mxu0 %vm785_vm0, %v4460_v30  ;;  %v4490_v30 = vld [vmem:[%s4591_s9 + $0xb8] sm:$0xff]   ;;  %v4507_v41 = vld [vmem:[%s4591_s9 + $0x1b0] sm:$0xff]  }
  0x34   : > { %4321 = vmatprep.mubr.msk.bf16.mxu0 %vm785_vm0, %v4461_v32  ;;  %4382 = vmatmul.mubr.msk.bf16.gmra.mrb[12].mxu1 %vm785_vm0, %v4476_v47  ;;  %v4493_v32 = vld [vmem:[%s4591_s9 + $0xc0] sm:$0xff]   ;;  %v4508_v47 = vld [vmem:[%s4591_s9 + $0x1b8] sm:$0xff]  }
  0x35   : > { %4385 = vmatprep.mubr.msk.bf16.mxu1 %vm785_vm0, %v4479_v49  ;;  %v4509_v49 = vld [vmem:[%s4591_s9 + $0x1c0] sm:$0xff]  }
  0x36   : > { %1738 = vperm.xlu1 %4449, %v1540_v34   ;;  %1733 = vperm.xlu0 %4448, %v1539_v35   ;;  %v1572_v34 = vld [vmem:[%s4582_s30 + $0x188] sm:$0xff]  ;;  %v1571_v35 = vld [vmem:[%s4582_s30 + $0x180] sm:$0xff] }
  0x3a   : > { %1748 = vperm.xlu1 %4449, %v1542_v36   ;;  %1743 = vperm.xlu0 %4448, %v1541_v37   ;;  %v1574_v36 = vld [vmem:[%s4582_s30 + $0x198] sm:$0xff]  ;;  %v1573_v37 = vld [vmem:[%s4582_s30 + $0x190] sm:$0xff] }
  0x3b   : > { %4322 = vmatmul.mubr.msk.bf16.gmra.mrb[16].mxu0 %vm785_vm0, %v4462_v38  ;;  %v4494_v38 = vld [vmem:[%s4591_s9 + $0xc8] sm:$0xff]  }
  0x3c   : > { %4325 = vmatprep.mubr.msk.bf16.mxu0 %vm785_vm0, %v4465_v40  ;;  %4386 = vmatmul.mubr.msk.bf16.gmra.mrb[16].mxu1 %vm785_vm0, %v4480_v55  ;;  %v4497_v40 = vld [vmem:[%s4591_s9 + $0xd0] sm:$0xff]   ;;  %v4510_v55 = vld [vmem:[%s4591_s9 + $0x1c8] sm:$0xff]  }
  0x3d   : > { %4389 = vmatprep.mubr.msk.bf16.mxu1 %vm785_vm0, %v4483_v57  ;;  %v4511_v57 = vld [vmem:[%s4591_s9 + $0x1d0] sm:$0xff]  }
  0x3e   : > { %1758 = vperm.xlu1 %4449, %v1544_v42   ;;  %1753 = vperm.xlu0 %4448, %v1543_v43   ;;  %v1576_v42 = vld [vmem:[%s4582_s30 + $0x1a8] sm:$0xff]  ;;  %v1575_v43 = vld [vmem:[%s4582_s30 + $0x1a0] sm:$0xff] }
  0x42   : > { %1768 = vperm.xlu1 %4449, %v1546_v44   ;;  %1763 = vperm.xlu0 %4448, %v1545_v45   ;;  %v1578_v44 = vld [vmem:[%s4582_s30 + $0x1b8] sm:$0xff]  ;;  %v1577_v45 = vld [vmem:[%s4582_s30 + $0x1b0] sm:$0xff] }
  0x43   : > { %4326 = vmatmul.mubr.msk.bf16.gmra.mrb[20].mxu0 %vm785_vm0, %v4466_v46  ;;  %v4498_v46 = vld [vmem:[%s4591_s9 + $0xd8] sm:$0xff]  }
  0x44   : > { %4329 = vmatprep.mubr.msk.bf16.mxu0 %vm785_vm0, %v4469_v48  ;;  %4390 = vmatmul.mubr.msk.bf16.gmra.mrb[20].mxu1 %vm785_vm0, %v4484_v63  ;;  %v4501_v48 = vld [vmem:[%s4591_s9 + $0xe0] sm:$0xff]   ;;  %v4512_v63 = vld [vmem:[%s4591_s9 + $0x1d8] sm:$0xff]  }
  0x45   : > { %4393 = vmatprep.mubr.msk.bf16.mxu1 %vm785_vm0, %v4487_v1  ;;  %v1588_v1 = vld [vmem:[%s4582_s30 + $0x208] sm:$0xff] }
  0x46   : > { %1778 = vperm.xlu1 %4449, %v1548_v50   ;;  %1773 = vperm.xlu0 %4448, %v1547_v51   ;;  %v1580_v50 = vld [vmem:[%s4582_s30 + $0x1c8] sm:$0xff]  ;;  %v1579_v51 = vld [vmem:[%s4582_s30 + $0x1c0] sm:$0xff] }
  0x4a   : > { %1788 = vperm.xlu1 %4449, %v1550_v52   ;;  %1783 = vperm.xlu0 %4448, %v1549_v53   ;;  %v1582_v52 = vld [vmem:[%s4582_s30 + $0x1d8] sm:$0xff]  ;;  %v1581_v53 = vld [vmem:[%s4582_s30 + $0x1d0] sm:$0xff] }
  0x4b   : > { %4330 = vmatmul.mubr.msk.bf16.gmra.mrb[24].mxu0 %vm785_vm0, %v4470_v54  ;;  %v4502_v54 = vld [vmem:[%s4591_s9 + $0xe8] sm:$0xff]  }
  0x4c   : > { %4333 = vmatprep.mubr.msk.bf16.mxu0 %vm785_vm0, %v4473_v56  ;;  %4394 = vmatmul.mubr.msk.bf16.gmra.mrb[24].mxu1 %vm785_vm0, %v4488_v7  ;;  %v4505_v56 = vld [vmem:[%s4591_s9 + $0xf0] sm:$0xff]   ;;  %v4514_v7 = vld [vmem:[%s4591_s9 + $0x1e8] sm:$0xff]  }
  0x4d   : > { %4397 = vmatprep.mubr.msk.bf16.mxu1 %vm785_vm0, %v4491_v9 }
  0x4e   : > { %1798 = vperm.xlu1 %4449, %v1552_v58   ;;  %1793 = vperm.xlu0 %4448, %v1551_v59   ;;  %v1584_v58 = vld [vmem:[%s4582_s30 + $0x1e8] sm:$0xff]  ;;  %v1583_v59 = vld [vmem:[%s4582_s30 + $0x1e0] sm:$0xff] }
  0x52   : > { %1808 = vperm.xlu1 %4449, %v1554_v60   ;;  %1803 = vperm.xlu0 %4448, %v1553_v61   ;;  %v1586_v60 = vld [vmem:[%s4582_s30 + $0x1f8] sm:$0xff]  ;;  %v1585_v61 = vld [vmem:[%s4582_s30 + $0x1f0] sm:$0xff] }
  0x53   : > { %4334 = vmatmul.mubr.msk.bf16.gmra.mrb[28].mxu0 %vm785_vm0, %v4474_v62  ;;  %v4506_v62 = vld [vmem:[%s4591_s9 + $0xf8] sm:$0xff]  }
  0x54   : > { %4337 = vmatprep.mubr.msk.bf16.mxu0 %vm785_vm0, %v4477_v0  ;;  %4398 = vmatmul.mubr.msk.bf16.gmra.mrb[28].mxu1 %vm785_vm0, %v4492_v15  ;;  %v4513_v0 = vld [vmem:[%s4591_s9 + $0x1e0] sm:$0xff]   ;;  %v1594_v15 = vld [vmem:[%s4582_s30 + $0x238] sm:$0xff] }
  0x55   : > { %4401 = vmatprep.mubr.msk.bf16.mxu1 %vm785_vm0, %v4495_v17  ;;  %v4516_v17 = vld [vmem:[%s4591_s9 + $0x1f8] sm:$0xff]  }
  0x56   : > { %1818 = vperm.xlu1 %4449, %v1556_v2   ;;  %1813 = vperm.xlu0 %4448, %v1555_v3   ;;  %v1587_v2 = vld [vmem:[%s4582_s30 + $0x200] sm:$0xff] }
  0x5a   : > { %1828 = vperm.xlu1 %4449, %v1558_v4   ;;  %1823 = vperm.xlu0 %4448, %v1557_v5   ;;  %v1590_v5 = vld [vmem:[%s4582_s30 + $0x218] sm:$0xff] }
  0x5b   : > { %4338 = vmatmul.mubr.msk.bf16.gmra.mrb[32].mxu0 %vm785_vm0, %v4478_v6  ;;  %v1589_v6 = vld [vmem:[%s4582_s30 + $0x210] sm:$0xff] }
  0x5c   : > { %4341 = vmatprep.mubr.msk.bf16.mxu0 %vm785_vm0, %v4481_v8  ;;  %4402 = vmatmul.mubr.msk.bf16.gmra.mrb[32].mxu1 %vm785_vm0, %v4496_v24  ;;  %v4515_v8 = vld [vmem:[%s4591_s9 + $0x1f0] sm:$0xff]   ;;  %v1598_v24 = vld [vmem:[%s4582_s30 + $0x258] sm:$0xff] }
  0x5d   : > { %4405 = vmatprep.mubr.msk.bf16.mxu1 %vm785_vm0, %v4499_v25  ;;  %v1597_v25 = vld [vmem:[%s4582_s30 + $0x250] sm:$0xff] }
  0x5e   : > { %1838 = vperm.xlu1 %4449, %v1560_v10   ;;  %1833 = vperm.xlu0 %4448, %v1559_v11   ;;  %v1592_v11 = vld [vmem:[%s4582_s30 + $0x228] sm:$0xff] }
  0x62   : > { %1848 = vperm.xlu1 %4449, %v1562_v12   ;;  %1843 = vperm.xlu0 %4448, %v1561_v13   ;;  %v1591_v12 = vld [vmem:[%s4582_s30 + $0x220] sm:$0xff] }
  0x63   : > { %4342 = vmatmul.mubr.msk.bf16.gmra.mrb[36].mxu0 %vm785_vm0, %v4482_v14 }
  0x64   : > { %4345 = vmatprep.mubr.msk.bf16.mxu0 %vm785_vm0, %v4485_v16  ;;  %4406 = vmatmul.mubr.msk.bf16.gmra.mrb[36].mxu1 %vm785_vm0, %v4500_v31  ;;  %v1593_v16 = vld [vmem:[%s4582_s30 + $0x230] sm:$0xff] }
  0x65   : > { %4409 = vmatprep.mubr.msk.bf16.mxu1 %vm785_vm0, %v4503_v33  ;;  %v1601_v33 = vld [vmem:[%s4582_s30 + $0x270] sm:$0xff] }
  0x66   : > { %1858 = vperm.xlu1 %4449, %v1564_v18   ;;  %1853 = vperm.xlu0 %4448, %v1563_v19  }
  0x6a   : > { %1868 = vperm.xlu1 %4449, %v1566_v20   ;;  %1863 = vperm.xlu0 %4448, %v1565_v21   ;;  %v1596_v20 = vld [vmem:[%s4582_s30 + $0x248] sm:$0xff]  ;;  %v1595_v21 = vld [vmem:[%s4582_s30 + $0x240] sm:$0xff] }
  0x6b   : > { %4346 = vmatmul.mubr.msk.bf16.gmra.mrb[40].mxu0 %vm785_vm0, %v4486_v22 }
  0x6c   : > { %4349 = vmatprep.mubr.msk.bf16.mxu0 %vm785_vm0, %v4489_v23  ;;  %4410 = vmatmul.mubr.msk.bf16.gmra.mrb[40].mxu1 %vm785_vm0, %v4504_v39 }
  0x6d   : > { %4413 = vmatprep.mubr.msk.bf16.mxu1 %vm785_vm0, %v4507_v41  ;;  %v1605_v41 = vld [vmem:[%s4582_s30 + $0x290] sm:$0xff] }
  0x6e   : > { %1878 = vperm.xlu1 %4449, %v1568_v26   ;;  %1873 = vperm.xlu0 %4448, %v1567_v27  }
  0x72   : > { %1888 = vperm.xlu1 %4449, %v1570_v28   ;;  %1883 = vperm.xlu0 %4448, %v1569_v29   ;;  %v1600_v28 = vld [vmem:[%s4582_s30 + $0x268] sm:$0xff]  ;;  %v1599_v29 = vld [vmem:[%s4582_s30 + $0x260] sm:$0xff] }
  0x73   : > { %4350 = vmatmul.mubr.msk.bf16.gmra.mrb[44].mxu0 %vm785_vm0, %v4490_v30 }
  0x74   : > { %4353 = vmatprep.mubr.msk.bf16.mxu0 %vm785_vm0, %v4493_v32  ;;  %4414 = vmatmul.mubr.msk.bf16.gmra.mrb[44].mxu1 %vm785_vm0, %v4508_v47  ;;  %v1602_v32 = vld [vmem:[%s4582_s30 + $0x278] sm:$0xff] }
  0x75   : > { %4417 = vmatprep.mubr.msk.bf16.mxu1 %vm785_vm0, %v4509_v49  ;;  %v1609_v49 = vld [vmem:[%s4582_s30 + $0x2b0] sm:$0xff] }
  0x76   : > { %1898 = vperm.xlu1 %4449, %v1572_v34   ;;  %1893 = vperm.xlu0 %4448, %v1571_v35  }
  0x7a   : > { %1908 = vperm.xlu1 %4449, %v1574_v36   ;;  %1903 = vperm.xlu0 %4448, %v1573_v37   ;;  %v1604_v36 = vld [vmem:[%s4582_s30 + $0x288] sm:$0xff]  ;;  %v1603_v37 = vld [vmem:[%s4582_s30 + $0x280] sm:$0xff] }
  0x7b   : > { %4354 = vmatmul.mubr.msk.bf16.gmra.mrb[48].mxu0 %vm785_vm0, %v4494_v38 }
  0x7c   : > { %4357 = vmatprep.mubr.msk.bf16.mxu0 %vm785_vm0, %v4497_v40  ;;  %4418 = vmatmul.mubr.msk.bf16.gmra.mrb[48].mxu1 %vm785_vm0, %v4510_v55  ;;  %v1606_v40 = vld [vmem:[%s4582_s30 + $0x298] sm:$0xff] }
  0x7d   : > { %4421 = vmatprep.mubr.msk.bf16.mxu1 %vm785_vm0, %v4511_v57  ;;  %v1613_v57 = vld [vmem:[%s4582_s30 + $0x2d0] sm:$0xff] }
  0x7e   : > { %1918 = vperm.xlu1 %4449, %v1576_v42   ;;  %1913 = vperm.xlu0 %4448, %v1575_v43  }
  0x82   : > { %1928 = vperm.xlu1 %4449, %v1578_v44   ;;  %1923 = vperm.xlu0 %4448, %v1577_v45   ;;  %v1608_v44 = vld [vmem:[%s4582_s30 + $0x2a8] sm:$0xff]  ;;  %v1607_v45 = vld [vmem:[%s4582_s30 + $0x2a0] sm:$0xff] }
  0x83   : > { %4358 = vmatmul.mubr.msk.bf16.gmra.mrb[52].mxu0 %vm785_vm0, %v4498_v46 }
  0x84   : > { %4361 = vmatprep.mubr.msk.bf16.mxu0 %vm785_vm0, %v4501_v48  ;;  %4422 = vmatmul.mubr.msk.bf16.gmra.mrb[52].mxu1 %vm785_vm0, %v4512_v63  ;;  %v1610_v48 = vld [vmem:[%s4582_s30 + $0x2b8] sm:$0xff] }
  0x85   : > { %4425 = vmatprep.mubr.msk.bf16.mxu1 %vm785_vm0, %v4513_v0  ;;  %v1618_v0 = vld [vmem:[%s4582_s30 + $0x2f8] sm:$0xff] }
  0x86   : > { %1938 = vperm.xlu1 %4449, %v1580_v50   ;;  %1933 = vperm.xlu0 %4448, %v1579_v51  }
  0x8a   : > { %1948 = vperm.xlu1 %4449, %v1582_v52   ;;  %1943 = vperm.xlu0 %4448, %v1581_v53   ;;  %v1612_v52 = vld [vmem:[%s4582_s30 + $0x2c8] sm:$0xff]  ;;  %v1611_v53 = vld [vmem:[%s4582_s30 + $0x2c0] sm:$0xff] }
  0x8b   : > { %4362 = vmatmul.mubr.msk.bf16.gmra.mrb[56].mxu0 %vm785_vm0, %v4502_v54 }
  0x8c   : > { %4365 = vmatprep.mubr.msk.bf16.mxu0 %vm785_vm0, %v4505_v56  ;;  %4426 = vmatmul.mubr.msk.bf16.gmra.mrb[56].mxu1 %vm785_vm0, %v4514_v7  ;;  %v1614_v56 = vld [vmem:[%s4582_s30 + $0x2d8] sm:$0xff]  ;;  %v1619_v7 = vld [vmem:[%s4582_s30 + $0x300] sm:$0xff] }
  0x8d   : > { %4429 = vmatprep.mubr.msk.bf16.mxu1 %vm785_vm0, %v4515_v8 }
  0x8e   : > { %1958 = vperm.xlu1 %4449, %v1584_v58   ;;  %1953 = vperm.xlu0 %4448, %v1583_v59  }
  0x92   : > { %1968 = vperm.xlu1 %4449, %v1586_v60   ;;  %1963 = vperm.xlu0 %4448, %v1585_v61   ;;  %v1616_v60 = vld [vmem:[%s4582_s30 + $0x2e8] sm:$0xff]  ;;  %v1615_v61 = vld [vmem:[%s4582_s30 + $0x2e0] sm:$0xff] }
  0x93   : > { %4366 = vmatmul.mubr.msk.bf16.gmra.mrb[60].mxu0 %vm785_vm0, %v4506_v62 }
  0x94   : > { %4430 = vmatmul.mubr.msk.bf16.gmra.mrb[60].mxu1 %vm785_vm0, %v4516_v17 }
  0x95   : > { %v4777_v3 = vpop.permute.xlu1 %1663  ;;  %v4779_v4 = vpop.permute.xlu0 %1653 }
  0x96   : > { %1978 = vperm.xlu1 %4449, %v1588_v1   ;;  %1973 = vperm.xlu0 %4448, %v1587_v2   ;;  %v1617_v1 = vld [vmem:[%s4582_s30 + $0x2f0] sm:$0xff] }
  0x99   : > { %v4785_v9 = vpop.permute.xlu1 %1668  ;;  %v4787_v10 = vpop.permute.xlu0 %1658 }
  0x9a   : > { %1988 = vperm.xlu1 %4449, %v1590_v5   ;;  %1983 = vperm.xlu0 %4448, %v1589_v6   ;;  %v1620_v6 = vld [vmem:[%s4582_s30 + $0x308] sm:$0xff] }
  0x9d   : > { %v4793_v13 = vpop.permute.xlu1 %1678  ;;  %v4795_v14 = vpop.permute.xlu0 %1673 }
  0x9e   : > { %1998 = vperm.xlu1 %4449, %v1592_v11   ;;  %1993 = vperm.xlu0 %4448, %v1591_v12   ;;  %v1622_v12 = vld [vmem:[%s4582_s30 + $0x318] sm:$0xff] }
  0xa1   : > { %v4800_v18 = vpop.permute.xlu1 %1688  ;;  %v4802_v19 = vpop.permute.xlu0 %1683 }
  0xa2   : > { %2008 = vperm.xlu1 %4449, %v1594_v15   ;;  %2003 = vperm.xlu0 %4448, %v1593_v16   ;;  %v1621_v15 = vld [vmem:[%s4582_s30 + $0x310] sm:$0xff] }
  0xa5   : > { %v4807_v22 = vpop.permute.xlu1 %1698  ;;  %v4809_v23 = vpop.permute.xlu0 %1693 }
  0xa6   : > { %2018 = vperm.xlu1 %4449, %v1596_v20   ;;  %2013 = vperm.xlu0 %4448, %v1595_v21   ;;  %v1624_v20 = vld [vmem:[%s4582_s30 + $0x328] sm:$0xff]  ;;  %v1623_v21 = vld [vmem:[%s4582_s30 + $0x320] sm:$0xff] }
  0xa9   : > { %v4813_v26 = vpop.permute.xlu1 %1708  ;;  %v4815_v27 = vpop.permute.xlu0 %1703 }
  0xaa   : > { %2028 = vperm.xlu1 %4449, %v1598_v24   ;;  %2023 = vperm.xlu0 %4448, %v1597_v25  }
  0xad   : > { %v4819_v30 = vpop.permute.xlu1 %1718  ;;  %v4821_v31 = vpop.permute.xlu0 %1713 }
  0xae   : > { %2038 = vperm.xlu1 %4449, %v1600_v28   ;;  %2033 = vperm.xlu0 %4448, %v1599_v29   ;;  %v1626_v28 = vld [vmem:[%s4582_s30 + $0x338] sm:$0xff]  ;;  %v1625_v29 = vld [vmem:[%s4582_s30 + $0x330] sm:$0xff] }
  0xb1   : > { %v4825_v34 = vpop.permute.xlu1 %1728  ;;  %v4827_v35 = vpop.permute.xlu0 %1723 }
  0xb2   : > { %2048 = vperm.xlu1 %4449, %v1602_v32   ;;  %2043 = vperm.xlu0 %4448, %v1601_v33  }
  0xb5   : > { %v4831_v38 = vpop.permute.xlu1 %1738  ;;  %v4833_v39 = vpop.permute.xlu0 %1733 }
  0xb6   : > { %2058 = vperm.xlu1 %4449, %v1604_v36   ;;  %2053 = vperm.xlu0 %4448, %v1603_v37   ;;  %v1628_v36 = vld [vmem:[%s4582_s30 + $0x348] sm:$0xff]  ;;  %v1627_v37 = vld [vmem:[%s4582_s30 + $0x340] sm:$0xff] }
  0xb9   : > { %v4837_v42 = vpop.permute.xlu1 %1748  ;;  %v4839_v43 = vpop.permute.xlu0 %1743 }
  0xba   : > { %2068 = vperm.xlu1 %4449, %v1606_v40   ;;  %2063 = vperm.xlu0 %4448, %v1605_v41  }
  0xbd   : > { %v4843_v46 = vpop.permute.xlu1 %1758  ;;  %v4845_v47 = vpop.permute.xlu0 %1753 }
  0xbe   : > { %2078 = vperm.xlu1 %4449, %v1608_v44   ;;  %2073 = vperm.xlu0 %4448, %v1607_v45   ;;  %v1630_v44 = vld [vmem:[%s4582_s30 + $0x358] sm:$0xff]  ;;  %v1629_v45 = vld [vmem:[%s4582_s30 + $0x350] sm:$0xff] }
  0xc1   : > { %v4849_v50 = vpop.permute.xlu1 %1768  ;;  %v4851_v51 = vpop.permute.xlu0 %1763 }
  0xc2   : > { %2088 = vperm.xlu1 %4449, %v1610_v48   ;;  %2083 = vperm.xlu0 %4448, %v1609_v49  }
  0xc5   : > { %v4855_v54 = vpop.permute.xlu1 %1778  ;;  %v4857_v55 = vpop.permute.xlu0 %1773 }
  0xc6   : > { %2098 = vperm.xlu1 %4449, %v1612_v52   ;;  %2093 = vperm.xlu0 %4448, %v1611_v53   ;;  %v1632_v52 = vld [vmem:[%s4582_s30 + $0x368] sm:$0xff]  ;;  %v1631_v53 = vld [vmem:[%s4582_s30 + $0x360] sm:$0xff] }
  0xc9   : > { %v4861_v58 = vpop.permute.xlu1 %1788  ;;  %v4863_v59 = vpop.permute.xlu0 %1783 }
  0xca   : > { %2108 = vperm.xlu1 %4449, %v1614_v56   ;;  %2103 = vperm.xlu0 %4448, %v1613_v57  }
  0xcd   : > { %v4867_v62 = vpop.permute.xlu1 %1798  ;;  %v4869_v63 = vpop.permute.xlu0 %1793 }
  0xce   : > { %2118 = vperm.xlu1 %4449, %v1616_v60   ;;  %2113 = vperm.xlu0 %4448, %v1615_v61  }
  0xd1   : > { %v4873_v2 = vpop.permute.xlu1 %1808  ;;  %v4875_v5 = vpop.permute.xlu0 %1803 }
  0xd2   : > { %2128 = vperm.xlu1 %4449, %v1618_v0   ;;  %2123 = vperm.xlu0 %4448, %v1617_v1   ;;  %v1634_v1 = vld [vmem:[%s4582_s30 + $0x378] sm:$0xff] }
  0xd5   : > { %v4879_v8 = vpop.permute.xlu1 %1818  ;;  %v4881_v11 = vpop.permute.xlu0 %1813 }
  0xd6   : > { %2138 = vperm.xlu1 %4449, %v1620_v6   ;;  %2133 = vperm.xlu0 %4448, %v1619_v7   ;;  %v1633_v6 = vld [vmem:[%s4582_s30 + $0x370] sm:$0xff] }
  0xd9   : > { %v4885_v16 = vpop.permute.xlu1 %1828  ;;  %v4887_v17 = vpop.permute.xlu0 %1823 }
  0xda   : > { %2148 = vperm.xlu1 %4449, %v1622_v12   ;;  %2143 = vperm.xlu0 %4448, %v1621_v15  }
  0xdd   : > { %v4891_v24 = vpop.permute.xlu1 %1838  ;;  %v4893_v25 = vpop.permute.xlu0 %1833 }
  0xde   : > { %2158 = vperm.xlu1 %4449, %v1624_v20   ;;  %2153 = vperm.xlu0 %4448, %v1623_v21  }
  0xe1   : > { %v4897_v32 = vpop.permute.xlu1 %1848  ;;  %v4899_v33 = vpop.permute.xlu0 %1843 }
  0xe2   : > { %2168 = vperm.xlu1 %4449, %v1626_v28   ;;  %2163 = vperm.xlu0 %4448, %v1625_v29  }
  0xe5   : > { %v4903_v40 = vpop.permute.xlu1 %1858  ;;  %v4905_v41 = vpop.permute.xlu0 %1853 }
  0xe6   : > { %2178 = vperm.xlu1 %4449, %v1628_v36   ;;  %2173 = vperm.xlu0 %4448, %v1627_v37   ;;  %v1636_v37 = vld [vmem:[%s4582_s30 + $0x388] sm:$0xff] }
  0xe9   : > { %v4909_v48 = vpop.permute.xlu1 %1868  ;;  %v4911_v49 = vpop.permute.xlu0 %1863 }
  0xea   : > { %2188 = vperm.xlu1 %4449, %v1630_v44   ;;  %2183 = vperm.xlu0 %4448, %v1629_v45   ;;  %v1635_v44 = vld [vmem:[%s4582_s30 + $0x380] sm:$0xff] }
  0xed   : > { %v4916_v56 = vpop.permute.xlu1 %1878  ;;  %v4918_v57 = vpop.permute.xlu0 %1873 }
  0xee   : > { %6534 = vst [vmem:[#allocation2_spill] sm:$0xff] %v4916_v56  ;;  %2198 = vperm.xlu1 %4449, %v1632_v52   ;;  %2193 = vperm.xlu0 %4448, %v1631_v53   ;;  %v4307_v60 = vpop.f32.mrb[0].mxu0 }
  0xef   : > { %v2293_v61 = vmul.f32 %v4307_v60, %v4777_v3  ;;  %v1012_v0 = vpop.f32.mrb[1].mxu0 }
  0xf0   : > { %v2291_v7 = vmul.f32 %v4779_v4, %v1012_v0  ;;  %v4308_v12 = vpop.f32.mrb[2].mxu0 }
  0xf1   : > { %v4106_v15 = vpack.c.bf16 %v2293_v61, %v2293_v61  ;;  %v4929_v20 = vpop.permute.xlu1 %1888  ;;  %v4931_v3 = vpop.permute.xlu0 %1883  ;;  %v2294_v21 = vmul.f32 %v4308_v12, %v4785_v9  ;;  %v3326_v52 = vmul.f32 %v2293_v61, %v2293_v61 }
  0xf2   : > { %6535 = vst [vmem:[#allocation3_spill] sm:$0xff] %v4929_v20  ;;  %v4104_v28 = vpack.c.bf16 %v2291_v7, %v2291_v7  ;;  %2208 = vperm.xlu1 %4449, %v1634_v1   ;;  %2203 = vperm.xlu0 %4448, %v1633_v6   ;;  %v1015_v29 = vpop.f32.mrb[3].mxu0  ;;  %v3324_v4 = vmul.f32 %v2291_v7, %v2291_v7  ;;  %v3061_v60 = vsel %vm3060_vm2, %v2291_v7, 0.0 }
  0xf3   : > { %2934 = vst.msk [vmem:[%s4926_s13 + $0x8] sm:$0xf] %vm2931_vm1, %v4106_v15  ;;  %v4107_v36 = vpack.c.bf16 %v2294_v21, %v2294_v21  ;;  %v2292_v45 = vmul.f32 %v4787_v10, %v1015_v29  ;;  %v3064_v10 = vsel %vm3060_vm2, %v2293_v61, 0.0  ;;  %v3327_v56 = vmul.f32 %v2294_v21, %v2294_v21 }
  0xf4   : > { %2932 = vst.msk [vmem:[%s4926_s13] sm:$0xf] %vm2931_vm1, %v4104_v28 }
  0xf5   : > { %2935 = vst.msk [vmem:[%s4926_s13 + $0xc] sm:$0xf] %vm2931_vm1, %v4107_v36  ;;  %v4943_v9 = vpop.permute.xlu1 %1898  ;;  %v4945_v53 = vpop.permute.xlu0 %1893  ;;  %v4105_v0 = vpack.c.bf16 %v2292_v45, %v2292_v45  ;;  %v3062_v1 = vsel %vm3060_vm2, %v2292_v45, 0.0  ;;  %v3325_v6 = vmul.f32 %v2292_v45, %v2292_v45  ;;  %v1638_v36 = vld [vmem:[%s4582_s30 + $0x398] sm:$0xff] }
  0xf6   : > { %6536 = vst [vmem:[#allocation4_spill] sm:$0xff] %v4943_v9  ;;  %6537 = vst [vmem:[#allocation5_spill] sm:$0xff] %v4945_v53  ;;  %2218 = vperm.xlu1 %4449, %v1636_v37   ;;  %2213 = vperm.xlu0 %4448, %v1635_v44   ;;  %v4311_v12 = vpop.f32.mrb[4].mxu0  ;;  %v3063_v15 = vadd.f32 %v3062_v1, %v3061_v60  ;;  %v1637_v9 = vld [vmem:[%s4582_s30 + $0x390] sm:$0xff]  ;;  %v3452_v53 = vsel %vm3060_vm2, %v3324_v4, 0.0  ;;  %v3455_v44 = vsel %vm3060_vm2, %v3326_v52, 0.0 }
  0xf7   : > { %v2297_v28 = vmul.f32 %v4311_v12, %v4802_v19  ;;  %v1028_v29 = vpop.f32.mrb[5].mxu0  ;;  %2933 = vst.msk [vmem:[%s4926_s13 + $0x4] sm:$0xf] %vm2931_vm1, %v4105_v0  ;;  %v3453_v7 = vsel %vm3060_vm2, %v3325_v6, 0.0  ;;  %v3066_v4 = vsel %vm3060_vm2, %v2294_v21, 0.0 }
  0xf8   : > { %v2295_v45 = vmul.f32 %v4795_v14, %v1028_v29  ;;  %v4312_v37 = vpop.f32.mrb[6].mxu0  ;;  %v3065_v61 = vadd.f32 %v3064_v10, %v3063_v15  ;;  %v3454_v60 = vadd.f32 %v3453_v7, %v3452_v53  ;;  %v1640_v7 = vld [vmem:[%s4582_s30 + $0x3a8] sm:$0xff] }
  0xf9   : > { %v4110_v19 = vpack.c.bf16 %v2297_v28, %v2297_v28  ;;  %v4959_v1 = vpop.permute.xlu1 %1908  ;;  %v4961_v12 = vpop.permute.xlu0 %1903  ;;  %v2298_v53 = vmul.f32 %v4312_v37, %v4800_v18 }
  0xfa   : > { %6538 = vst [vmem:[#allocation6_spill] sm:$0xff] %v4959_v1  ;;  %6539 = vst [vmem:[#allocation7_spill] sm:$0xff] %v4961_v12  ;;  %v4108_v0 = vpack.c.bf16 %v2295_v45, %v2295_v45  ;;  %v3068_v6 = vsel %vm3060_vm2, %v2295_v45, 0.0  ;;  %v3328_v14 = vmul.f32 %v2295_v45, %v2295_v45  ;;  %2228 = vperm.xlu1 %4449, %v1638_v36   ;;  %2223 = vperm.xlu0 %4448, %v1637_v9   ;;  %v1031_v29 = vpop.f32.mrb[7].mxu0  ;;  %v1639_v1 = vld [vmem:[%s4582_s30 + $0x3a0] sm:$0xff] }
  0xfb   : > { %v3067_v52 = vadd.f32 %v3066_v4, %v3065_v61  ;;  %v3456_v10 = vadd.f32 %v3455_v44, %v3454_v60  ;;  %2938 = vst.msk [vmem:[%s4926_s13 + $0x18] sm:$0xf] %vm2931_vm1, %v4110_v19  ;;  %v2296_v15 = vmul.f32 %v4793_v13, %v1031_v29  ;;  %v3457_v12 = vsel %vm3060_vm2, %v3327_v56, 0.0  ;;  %v4980_v19 = vpop.f32.mrb[0].mxu1  ;;  %v1641_v29 = vld [vmem:[%s4582_s30 + $0x3b0] sm:$0xff] }
  0xfc   : > { %2936 = vst.msk [vmem:[%s4926_s13 + $0x10] sm:$0xf] %vm2931_vm1, %v4108_v0  ;;  %v3459_v21 = vsel %vm3060_vm2, %v3328_v14, 0.0  ;;  %v3330_v9 = vmul.f32 %v2297_v28, %v2297_v28  ;;  %v4111_v44 = vpack.c.bf16 %v2298_v53, %v2298_v53  ;;  %v1642_v14 = vld [vmem:[%s4582_s30 + $0x3b8] sm:$0xff] }
  0xfd   : > { %v3458_v36 = vadd.f32 %v3457_v12, %v3456_v10  ;;  %v3069_v45 = vadd.f32 %v3068_v6, %v3067_v52  ;;  %v4975_v61 = vpop.permute.xlu1 %1918  ;;  %v4977_v18 = vpop.permute.xlu0 %1913  ;;  %v4109_v13 = vpack.c.bf16 %v2296_v15, %v2296_v15  ;;  %v3070_v37 = vsel %vm3060_vm2, %v2296_v15, 0.0 }
  0xfe   : > { %6540 = vst [vmem:[#allocation8_spill] sm:$0xff] %v4975_v61  ;;  %6541 = vst [vmem:[#allocation9_spill] sm:$0xff] %v4977_v18  ;;  %v3329_v56 = vmul.f32 %v2296_v15, %v2296_v15  ;;  %2238 = vperm.xlu1 %4449, %v1640_v7   ;;  %2233 = vperm.xlu0 %4448, %v1639_v1   ;;  %v4315_v60 = vpop.f32.mrb[8].mxu0  ;;  %v4987_v52 = vpop.f32.mrb[1].mxu1  ;;  %v3072_v10 = vsel %vm3060_vm2, %v2297_v28, 0.0  ;;  %v3331_v61 = vmul.f32 %v2298_v53, %v2298_v53 }
  0xff   : > { %v3460_v12 = vadd.f32 %v3459_v21, %v3458_v36  ;;  %2939 = vst.msk [vmem:[%s4926_s13 + $0x1c] sm:$0xf] %vm2931_vm1, %v4111_v44  ;;  %v3071_v4 = vadd.f32 %v3070_v37, %v3069_v45  ;;  %v2301_v0 = vmul.f32 %v4315_v60, %v4815_v27  ;;  %v1044_v6 = vpop.f32.mrb[9].mxu0  ;;  %2937 = vst.msk [vmem:[%s4926_s13 + $0x14] sm:$0xf] %vm2931_vm1, %v4109_v13  ;;  %v4994_v21 = vpop.f32.mrb[2].mxu1 }
 0x100   : > { %v3461_v1 = vsel %vm3060_vm2, %v3329_v56, 0.0  ;;  %v2299_v15 = vmul.f32 %v4809_v23, %v1044_v6  ;;  %v4316_v7 = vpop.f32.mrb[10].mxu0  ;;  %v3463_v36 = vsel %vm3060_vm2, %v3330_v9, 0.0  ;;  %v3074_v13 = vsel %vm3060_vm2, %v2298_v53, 0.0  ;;  %v5003_v6 = vpop.f32.mrb[3].mxu1  ;;  %v1643_v53 = vld [vmem:[%s4582_s30 + $0x3c0] sm:$0xff] }
 0x101   : > { %v3073_v27 = vadd.f32 %v3072_v10, %v3071_v4  ;;  %v3462_v45 = vadd.f32 %v3461_v1, %v3460_v12  ;;  %v4114_v44 = vpack.c.bf16 %v2301_v0, %v2301_v0  ;;  %v4997_v37 = vpop.permute.xlu1 %1928  ;;  %v4999_v28 = vpop.permute.xlu0 %1923  ;;  %v2302_v10 = vmul.f32 %v4316_v7, %v4813_v26 }
 0x102   : > { %6542 = vst [vmem:[#allocation10_spill] sm:$0xff] %v4997_v37  ;;  %6543 = vst [vmem:[#allocation11_spill] sm:$0xff] %v4999_v28  ;;  %v4112_v56 = vpack.c.bf16 %v2299_v15, %v2299_v15  ;;  %v3076_v23 = vsel %vm3060_vm2, %v2299_v15, 0.0  ;;  %v3332_v60 = vmul.f32 %v2299_v15, %v2299_v15  ;;  %2248 = vperm.xlu1 %4449, %v1642_v14   ;;  %2243 = vperm.xlu0 %4448, %v1641_v29   ;;  %v1047_v9 = vpop.f32.mrb[11].mxu0  ;;  %v1644_v37 = vld [vmem:[%s4582_s30 + $0x3c8] sm:$0xff] }
 0x103   : > { %v3075_v12 = vadd.f32 %v3074_v13, %v3073_v27  ;;  %v3464_v4 = vadd.f32 %v3463_v36, %v3462_v45  ;;  %2942 = vst.msk [vmem:[%s4926_s13 + $0x28] sm:$0xf] %vm2931_vm1, %v4114_v44  ;;  %v2300_v1 = vmul.f32 %v4807_v22, %v1047_v9  ;;  %v3465_v18 = vsel %vm3060_vm2, %v3331_v61, 0.0  ;;  %v5020_v44 = vpop.f32.mrb[4].mxu1  ;;  %v1645_v9 = vld [vmem:[%s4582_s30 + $0x3d0] sm:$0xff] }
 0x104   : > { %2940 = vst.msk [vmem:[%s4926_s13 + $0x20] sm:$0xf] %vm2931_vm1, %v4112_v56  ;;  %v3467_v14 = vsel %vm3060_vm2, %v3332_v60, 0.0  ;;  %v3334_v15 = vmul.f32 %v2301_v0, %v2301_v0  ;;  %v4115_v36 = vpack.c.bf16 %v2302_v10, %v2302_v10  ;;  %v1646_v60 = vld [vmem:[%s4582_s30 + $0x3d8] sm:$0xff] }
 0x105   : > { %v3466_v29 = vadd.f32 %v3465_v18, %v3464_v4  ;;  %v3077_v28 = vadd.f32 %v3076_v23, %v3075_v12  ;;  %v5015_v27 = vpop.permute.xlu1 %1938  ;;  %v5017_v26 = vpop.permute.xlu0 %1933  ;;  %v4113_v22 = vpack.c.bf16 %v2300_v1, %v2300_v1  ;;  %v3078_v7 = vsel %vm3060_vm2, %v2300_v1, 0.0 }
 0x106   : > { %6544 = vst [vmem:[#allocation12_spill] sm:$0xff] %v5015_v27  ;;  %6545 = vst [vmem:[#allocation13_spill] sm:$0xff] %v5017_v26  ;;  %v3333_v61 = vmul.f32 %v2300_v1, %v2300_v1  ;;  %2258 = vperm.xlu1 %4449, %v1644_v37   ;;  %2253 = vperm.xlu0 %4448, %v1643_v53   ;;  %v4319_v45 = vpop.f32.mrb[12].mxu0  ;;  %v5027_v12 = vpop.f32.mrb[5].mxu1  ;;  %v3080_v4 = vsel %vm3060_vm2, %v2301_v0, 0.0  ;;  %v3335_v27 = vmul.f32 %v2302_v10, %v2302_v10 }
 0x107   : > { %v3468_v18 = vadd.f32 %v3467_v14, %v3466_v29  ;;  %2943 = vst.msk [vmem:[%s4926_s13 + $0x2c] sm:$0xf] %vm2931_vm1, %v4115_v36  ;;  %v3079_v13 = vadd.f32 %v3078_v7, %v3077_v28  ;;  %v2305_v56 = vmul.f32 %v4319_v45, %v4827_v35  ;;  %v1060_v23 = vpop.f32.mrb[13].mxu0  ;;  %2941 = vst.msk [vmem:[%s4926_s13 + $0x24] sm:$0xf] %vm2931_vm1, %v4113_v22  ;;  %v5034_v14 = vpop.f32.mrb[6].mxu1 }
 0x108   : > { %v3469_v37 = vsel %vm3060_vm2, %v3333_v61, 0.0  ;;  %v2303_v1 = vmul.f32 %v4821_v31, %v1060_v23  ;;  %v4320_v53 = vpop.f32.mrb[14].mxu0  ;;  %v3471_v28 = vsel %vm3060_vm2, %v3334_v15, 0.0  ;;  %v3082_v22 = vsel %vm3060_vm2, %v2302_v10, 0.0  ;;  %v5043_v23 = vpop.f32.mrb[7].mxu1  ;;  %v1647_v10 = vld [vmem:[%s4582_s30 + $0x3e0] sm:$0xff] }
 0x109   : > { %v3081_v35 = vadd.f32 %v3080_v4, %v3079_v13  ;;  %v3470_v29 = vadd.f32 %v3469_v37, %v3468_v18  ;;  %v4118_v36 = vpack.c.bf16 %v2305_v56, %v2305_v56  ;;  %v5037_v7 = vpop.permute.xlu1 %1948  ;;  %v5039_v0 = vpop.permute.xlu0 %1943  ;;  %v2306_v4 = vmul.f32 %v4320_v53, %v4825_v34 }
 0x10a   : > { %6546 = vst [vmem:[#allocation14_spill] sm:$0xff] %v5037_v7  ;;  %6547 = vst [vmem:[#allocation15_spill] sm:$0xff] %v5039_v0  ;;  %v4116_v61 = vpack.c.bf16 %v2303_v1, %v2303_v1  ;;  %v3084_v31 = vsel %vm3060_vm2, %v2303_v1, 0.0  ;;  %v3336_v45 = vmul.f32 %v2303_v1, %v2303_v1  ;;  %2268 = vperm.xlu1 %4449, %v1646_v60   ;;  %2263 = vperm.xlu0 %4448, %v1645_v9   ;;  %v1063_v15 = vpop.f32.mrb[15].mxu0  ;;  %v1648_v7 = vld [vmem:[%s4582_s30 + $0x3e8] sm:$0xff] }
 0x10b   : > { %v3083_v18 = vadd.f32 %v3082_v22, %v3081_v35  ;;  %v3472_v13 = vadd.f32 %v3471_v28, %v3470_v29  ;;  %2946 = vst.msk [vmem:[%s4926_s13 + $0x38] sm:$0xf] %vm2931_vm1, %v4118_v36  ;;  %v2304_v37 = vmul.f32 %v4819_v30, %v1063_v15  ;;  %v3473_v26 = vsel %vm3060_vm2, %v3335_v27, 0.0  ;;  %v5060_v36 = vpop.f32.mrb[8].mxu1  ;;  %v1649_v15 = vld [vmem:[%s4582_s30 + $0x3f0] sm:$0xff] }
 0x10c   : > { %2944 = vst.msk [vmem:[%s4926_s13 + $0x30] sm:$0xf] %vm2931_vm1, %v4116_v61  ;;  %v3475_v60 = vsel %vm3060_vm2, %v3336_v45, 0.0  ;;  %v3338_v1 = vmul.f32 %v2305_v56, %v2305_v56  ;;  %v4119_v28 = vpack.c.bf16 %v2306_v4, %v2306_v4  ;;  %v1650_v45 = vld [vmem:[%s4582_s30 + $0x3f8] sm:$0xff] }
 0x10d   : > { %v3474_v9 = vadd.f32 %v3473_v26, %v3472_v13  ;;  %v3085_v0 = vadd.f32 %v3084_v31, %v3083_v18  ;;  %v5055_v35 = vpop.permute.xlu1 %1958  ;;  %v5057_v34 = vpop.permute.xlu0 %1953  ;;  %v4117_v30 = vpack.c.bf16 %v2304_v37, %v2304_v37  ;;  %v3086_v53 = vsel %vm3060_vm2, %v2304_v37, 0.0 }
 0x10e   : > { %6548 = vst [vmem:[#allocation16_spill] sm:$0xff] %v5055_v35  ;;  %6549 = vst [vmem:[#allocation17_spill] sm:$0xff] %v5057_v34  ;;  %v3337_v27 = vmul.f32 %v2304_v37, %v2304_v37  ;;  %2278 = vperm.xlu1 %4449, %v1648_v7   ;;  %2273 = vperm.xlu0 %4448, %v1647_v10   ;;  %v4323_v29 = vpop.f32.mrb[16].mxu0  ;;  %v5067_v18 = vpop.f32.mrb[9].mxu1  ;;  %v3088_v13 = vsel %vm3060_vm2, %v2305_v56, 0.0  ;;  %v3339_v35 = vmul.f32 %v2306_v4, %v2306_v4 }
 0x10f   : > { %v3476_v26 = vadd.f32 %v3475_v60, %v3474_v9  ;;  %2947 = vst.msk [vmem:[%s4926_s13 + $0x3c] sm:$0xf] %vm2931_vm1, %v4119_v28  ;;  %v3087_v22 = vadd.f32 %v3086_v53, %v3085_v0  ;;  %v2309_v61 = vmul.f32 %v4323_v29, %v4839_v43  ;;  %v1076_v31 = vpop.f32.mrb[17].mxu0  ;;  %2945 = vst.msk [vmem:[%s4926_s13 + $0x34] sm:$0xf] %vm2931_vm1, %v4117_v30  ;;  %v5074_v60 = vpop.f32.mrb[10].mxu1 }
 0x110   : > { %v3477_v7 = vsel %vm3060_vm2, %v3337_v27, 0.0  ;;  %v2307_v37 = vmul.f32 %v4833_v39, %v1076_v31  ;;  %v4324_v10 = vpop.f32.mrb[18].mxu0  ;;  %v3479_v0 = vsel %vm3060_vm2, %v3338_v1, 0.0  ;;  %v3090_v30 = vsel %vm3060_vm2, %v2306_v4, 0.0  ;;  %v5083_v34 = vpop.f32.mrb[11].mxu1 }
 0x111   : > { %v3089_v43 = vadd.f32 %v3088_v13, %v3087_v22  ;;  %v3478_v9 = vadd.f32 %v3477_v7, %v3476_v26  ;;  %v4122_v28 = vpack.c.bf16 %v2309_v61, %v2309_v61  ;;  %v5077_v53 = vpop.permute.xlu1 %1968  ;;  %v5079_v56 = vpop.permute.xlu0 %1963  ;;  %v2310_v26 = vmul.f32 %v4324_v10, %v4837_v42 }
 0x112   : > { %6550 = vst [vmem:[#allocation18_spill] sm:$0xff] %v5077_v53  ;;  %6551 = vst [vmem:[#allocation19_spill] sm:$0xff] %v5079_v56  ;;  %v4120_v29 = vpack.c.bf16 %v2307_v37, %v2307_v37  ;;  %v3092_v27 = vsel %vm3060_vm2, %v2307_v37, 0.0  ;;  %v3340_v39 = vmul.f32 %v2307_v37, %v2307_v37  ;;  %2288 = vperm.xlu1 %4449, %v1650_v45   ;;  %2283 = vperm.xlu0 %4448, %v1649_v15   ;;  %v1079_v31 = vpop.f32.mrb[19].mxu0 }
 0x113   : > { %v3091_v1 = vadd.f32 %v3090_v30, %v3089_v43  ;;  %v3480_v22 = vadd.f32 %v3479_v0, %v3478_v9  ;;  %2950 = vst.msk [vmem:[%s4926_s13 + $0x48] sm:$0xf] %vm2931_vm1, %v4122_v28  ;;  %v2308_v13 = vmul.f32 %v4831_v38, %v1079_v31  ;;  %v3481_v4 = vsel %vm3060_vm2, %v3339_v35, 0.0  ;;  %v5094_v38 = vpop.f32.mrb[12].mxu1 }
 0x114   : > { %2948 = vst.msk [vmem:[%s4926_s13 + $0x40] sm:$0xf] %vm2931_vm1, %v4120_v29  ;;  %v3483_v7 = vsel %vm3060_vm2, %v3340_v39, 0.0  ;;  %v4123_v37 = vpack.c.bf16 %v2310_v26, %v2310_v26  ;;  %v3342_v0 = vmul.f32 %v2309_v61, %v2309_v61  ;;  %v5104_v39 = vpop.f32.mrb[13].mxu1  ;;  %v3096_v31 = vsel %vm3060_vm2, %v2309_v61, 0.0 }
 0x115   : > { %v3482_v45 = vadd.f32 %v3481_v4, %v3480_v22  ;;  %v3093_v15 = vadd.f32 %v3092_v27, %v3091_v1  ;;  %v1979_v53 = vpop.permute.xlu1 %1978  ;;  %v1974_v56 = vpop.permute.xlu0 %1973  ;;  %v4121_v43 = vpack.c.bf16 %v2308_v13, %v2308_v13  ;;  %v3094_v9 = vsel %vm3060_vm2, %v2308_v13, 0.0 }
 0x116   : > { %v3341_v42 = vmul.f32 %v2308_v13, %v2308_v13  ;;  %v4327_v10 = vpop.f32.mrb[20].mxu0  ;;  %2951 = vst.msk [vmem:[%s4926_s13 + $0x4c] sm:$0xf] %vm2931_vm1, %v4123_v37  ;;  %v5099_v30 = vmul.f32 %v1974_v56, %v4987_v52  ;;  %v5102_v29 = vmul.f32 %v1979_v53, %v5003_v6  ;;  %v3343_v1 = vmul.f32 %v2310_v26, %v2310_v26 }
 0x117   : > { %v3484_v28 = vadd.f32 %v3483_v7, %v3482_v45  ;;  %v3095_v35 = vadd.f32 %v3094_v9, %v3093_v15  ;;  %v1092_v27 = vpop.f32.mrb[21].mxu0  ;;  %2949 = vst.msk [vmem:[%s4926_s13 + $0x44] sm:$0xf] %vm2931_vm1, %v4121_v43  ;;  %v2313_v13 = vmul.f32 %v4327_v10, %v4851_v51  ;;  %v5111_v7 = vpop.f32.mrb[14].mxu1  ;;  %v3487_v15 = vsel %vm3060_vm2, %v3342_v0, 0.0 }
 0x118   : > { %6552 = vst [vmem:[#allocation20_spill] sm:$0xff] %v5099_v30  ;;  %6553 = vst [vmem:[#allocation21_spill] sm:$0xff] %v5102_v29  ;;  %v3485_v22 = vsel %vm3060_vm2, %v3341_v42, 0.0  ;;  %v4328_v4 = vpop.f32.mrb[22].mxu0  ;;  %v4168_v53 = vpack.c.bf16 %v5099_v30, %v5099_v30  ;;  %v2311_v45 = vmul.f32 %v4845_v47, %v1092_v27  ;;  %v3098_v37 = vsel %vm3060_vm2, %v2310_v26, 0.0  ;;  %v5120_v9 = vpop.f32.mrb[15].mxu1 }
 0x119   : > { %v3097_v52 = vadd.f32 %v3096_v31, %v3095_v35  ;;  %v3486_v6 = vadd.f32 %v3485_v22, %v3484_v28  ;;  %v1989_v56 = vpop.permute.xlu1 %1988  ;;  %v1984_v61 = vpop.permute.xlu0 %1983  ;;  %v4169_v51 = vpack.c.bf16 %v5102_v29, %v5102_v29  ;;  %v4126_v28 = vpack.c.bf16 %v2313_v13, %v2313_v13 }
 0x11a   : > { %v1095_v43 = vpop.f32.mrb[23].mxu0  ;;  %2996 = vst.msk [vmem:[%s4926_s13 + $0x100] sm:$0xf] %vm2931_vm1, %v4168_v53  ;;  %v3489_v35 = vsel %vm3060_vm2, %v3343_v1, 0.0  ;;  %v5128_v47 = vmul.f32 %v4994_v21, %v1989_v56  ;;  %v5133_v0 = vmul.f32 %v4980_v19, %v1984_v61  ;;  %v4124_v27 = vpack.c.bf16 %v2311_v45, %v2311_v45  ;;  %v5138_v53 = vpop.f32.mrb[16].mxu1 }
 0x11b   : > { %v3099_v42 = vadd.f32 %v3098_v37, %v3097_v52  ;;  %v3488_v10 = vadd.f32 %v3487_v15, %v3486_v6  ;;  %2997 = vst.msk [vmem:[%s4926_s13 + $0x104] sm:$0xf] %vm2931_vm1, %v4169_v51  ;;  %2954 = vst.msk [vmem:[%s4926_s13 + $0x58] sm:$0xf] %vm2931_vm1, %v4126_v28  ;;  %v3100_v31 = vsel %vm3060_vm2, %v2311_v45, 0.0  ;;  %v5144_v61 = vpop.f32.mrb[17].mxu1  ;;  %v3344_v15 = vmul.f32 %v2311_v45, %v2311_v45 }
 0x11c   : > { %6554 = vst [vmem:[#allocation22_spill] sm:$0xff] %v5128_v47  ;;  %6555 = vst [vmem:[#allocation23_spill] sm:$0xff] %v5133_v0  ;;  %v4171_v1 = vpack.c.bf16 %v5128_v47, %v5128_v47  ;;  %v4170_v21 = vpack.c.bf16 %v5133_v0, %v5133_v0  ;;  %v2314_v37 = vmul.f32 %v4328_v4, %v4849_v50  ;;  %v5150_v28 = vpop.f32.mrb[18].mxu1 }
 0x11d   : > { %v3490_v26 = vadd.f32 %v3489_v35, %v3488_v10  ;;  %v1999_v22 = vpop.permute.xlu1 %1998  ;;  %v1994_v52 = vpop.permute.xlu0 %1993  ;;  %2952 = vst.msk [vmem:[%s4926_s13 + $0x50] sm:$0xf] %vm2931_vm1, %v4124_v27  ;;  %v3101_v56 = vadd.f32 %v3100_v31, %v3099_v42  ;;  %v2312_v51 = vmul.f32 %v4843_v46, %v1095_v43  ;;  %v3346_v45 = vmul.f32 %v2313_v13, %v2313_v13 }
 0x11e   : > { %v4331_v6 = vpop.f32.mrb[24].mxu0  ;;  %2999 = vst.msk [vmem:[%s4926_s13 + $0x10c] sm:$0xf] %vm2931_vm1, %v4171_v1  ;;  %2998 = vst.msk [vmem:[%s4926_s13 + $0x108] sm:$0xf] %vm2931_vm1, %v4170_v21  ;;  %v5155_v35 = vmul.f32 %v1994_v52, %v5027_v12  ;;  %v5158_v42 = vmul.f32 %v1999_v22, %v5043_v23  ;;  %v3491_v50 = vsel %vm3060_vm2, %v3344_v15, 0.0  ;;  %v4127_v4 = vpack.c.bf16 %v2314_v37, %v2314_v37 }
 0x11f   : > { %v1108_v19 = vpop.f32.mrb[25].mxu0  ;;  %v5162_v46 = vmul.f32 %v4331_v6, %v4863_v59  ;;  %v5164_v1 = vpop.f32.mrb[19].mxu1  ;;  %v3492_v21 = vadd.f32 %v3491_v50, %v3490_v26  ;;  %v4125_v12 = vpack.c.bf16 %v2312_v51, %v2312_v51  ;;  %v3102_v52 = vsel %vm3060_vm2, %v2312_v51, 0.0 }
 0x120   : > { %v4332_v10 = vpop.f32.mrb[26].mxu0  ;;  %6556 = vst [vmem:[#allocation24_spill] sm:$0xff] %v5155_v35  ;;  %6557 = vst [vmem:[#allocation25_spill] sm:$0xff] %v5158_v42  ;;  %v3345_v23 = vmul.f32 %v2312_v51, %v2312_v51  ;;  %v3103_v22 = vadd.f32 %v3102_v52, %v3101_v56  ;;  %v4172_v47 = vpack.c.bf16 %v5155_v35, %v5155_v35  ;;  %v3104_v15 = vsel %vm3060_vm2, %v2313_v13, 0.0  ;;  %v5181_v13 = vpop.f32.mrb[20].mxu1 }
 0x121   : > { %v2009_v27 = vpop.permute.xlu1 %2008  ;;  %v2004_v31 = vpop.permute.xlu0 %2003  ;;  %2955 = vst.msk [vmem:[%s4926_s13 + $0x5c] sm:$0xf] %vm2931_vm1, %v4127_v4  ;;  %v3347_v59 = vmul.f32 %v2314_v37, %v2314_v37  ;;  %2953 = vst.msk [vmem:[%s4926_s13 + $0x54] sm:$0xf] %vm2931_vm1, %v4125_v12  ;;  %v4173_v26 = vpack.c.bf16 %v5158_v42, %v5158_v42  ;;  %v4130_v56 = vpack.c.bf16 %v5162_v46, %v5162_v46  ;;  %v3495_v12 = vsel %vm3060_vm2, %v3346_v45, 0.0 }
 0x122   : > { %v1111_v43 = vpop.f32.mrb[27].mxu0  ;;  %v3493_v6 = vsel %vm3060_vm2, %v3345_v23, 0.0  ;;  %v3105_v0 = vadd.f32 %v3104_v15, %v3103_v22  ;;  %3000 = vst.msk [vmem:[%s4926_s13 + $0x110] sm:$0xf] %vm2931_vm1, %v4172_v47  ;;  %v3106_v23 = vsel %vm3060_vm2, %v2314_v37, 0.0  ;;  %v5188_v42 = vmul.f32 %v5034_v14, %v2009_v27 }
 0x123   : > { %v3494_v4 = vadd.f32 %v3493_v6, %v3492_v21  ;;  %3001 = vst.msk [vmem:[%s4926_s13 + $0x114] sm:$0xf] %vm2931_vm1, %v4173_v26  ;;  %v5192_v21 = vpop.f32.mrb[21].mxu1  ;;  %2958 = vst.msk [vmem:[%s4926_s13 + $0x68] sm:$0xf] %vm2931_vm1, %v4130_v56  ;;  %v5197_v15 = vmul.f32 %v5020_v44, %v2004_v31  ;;  %v3497_v14 = vsel %vm3060_vm2, %v3347_v59, 0.0  ;;  %v2315_v44 = vmul.f32 %v4857_v55, %v1108_v19 }
 0x124   : > { %6558 = vst [vmem:[#allocation26_spill] sm:$0xff] %v5188_v42  ;;  %v3107_v47 = vadd.f32 %v3106_v23, %v3105_v0  ;;  %v5201_v37 = vpop.f32.mrb[22].mxu1  ;;  %v4175_v27 = vpack.c.bf16 %v5188_v42, %v5188_v42  ;;  %v2318_v31 = vmul.f32 %v4332_v10, %v4861_v58  ;;  %v2316_v59 = vmul.f32 %v4855_v54, %v1111_v43 }
 0x125   : > { %v2019_v50 = vpop.permute.xlu1 %2018  ;;  %v2014_v51 = vpop.permute.xlu0 %2013  ;;  %v3496_v22 = vadd.f32 %v3495_v12, %v3494_v4  ;;  %6559 = vst [vmem:[#allocation27_spill] sm:$0xff] %v5197_v15  ;;  %v4174_v0 = vpack.c.bf16 %v5197_v15, %v5197_v15  ;;  %v3350_v54 = vmul.f32 %v5162_v46, %v5162_v46 }
 0x126   : > { %v4335_v52 = vpop.f32.mrb[28].mxu0  ;;  %v5210_v56 = vpop.f32.mrb[23].mxu1  ;;  %3003 = vst.msk [vmem:[%s4926_s13 + $0x11c] sm:$0xf] %vm2931_vm1, %v4175_v27  ;;  %v5220_v12 = vmul.f32 %v2014_v51, %v5067_v18  ;;  %v5223_v23 = vmul.f32 %v2019_v50, %v5083_v34  ;;  %v3348_v27 = vmul.f32 %v2315_v44, %v2315_v44  ;;  %v4131_v15 = vpack.c.bf16 %v2318_v31, %v2318_v31 }
 0x127   : > { %v5190_v35 = vpop.f32.mrb[29].mxu0  ;;  %v3498_v29 = vadd.f32 %v3497_v14, %v3496_v22  ;;  %3002 = vst.msk [vmem:[%s4926_s13 + $0x118] sm:$0xf] %vm2931_vm1, %v4174_v0  ;;  %v4128_v22 = vpack.c.bf16 %v2315_v44, %v2315_v44  ;;  %v3108_v14 = vsel %vm3060_vm2, %v2315_v44, 0.0  ;;  %v4129_v10 = vpack.c.bf16 %v2316_v59, %v2316_v59  ;;  %v5233_v34 = vpop.f32.mrb[24].mxu1 }
 0x128   : > { %v5199_v45 = vpop.f32.mrb[30].mxu0  ;;  %6560 = vst [vmem:[#allocation28_spill] sm:$0xff] %v5220_v12  ;;  %6561 = vst [vmem:[#allocation29_spill] sm:$0xff] %v5223_v23  ;;  %v3109_v58 = vadd.f32 %v3108_v14, %v3107_v47  ;;  %v5229_v18 = vmul.f32 %v4335_v52, %v4875_v5  ;;  %v3499_v50 = vsel %vm3060_vm2, %v3348_v27, 0.0  ;;  %v3110_v51 = vsel %vm3060_vm2, %v2316_v59, 0.0  ;;  %v5245_v5 = vpop.f32.mrb[25].mxu1 }
 0x129   : > { %v2029_v6 = vpop.permute.xlu1 %2028  ;;  %v2024_v26 = vpop.permute.xlu0 %2023  ;;  %2956 = vst.msk [vmem:[%s4926_s13 + $0x60] sm:$0xf] %vm2931_vm1, %v4128_v22  ;;  %2959 = vst.msk [vmem:[%s4926_s13 + $0x6c] sm:$0xf] %vm2931_vm1, %v4131_v15  ;;  %v3349_v0 = vmul.f32 %v2316_v59, %v2316_v59  ;;  %v4176_v47 = vpack.c.bf16 %v5220_v12, %v5220_v12  ;;  %v3500_v52 = vadd.f32 %v3499_v50, %v3498_v29  ;;  %v3112_v15 = vsel %vm3060_vm2, %v5162_v46, 0.0 }
 0x12a   : > { %v5208_v4 = vpop.f32.mrb[31].mxu0  ;;  %2957 = vst.msk [vmem:[%s4926_s13 + $0x64] sm:$0xf] %vm2931_vm1, %v4129_v10  ;;  %v3111_v14 = vadd.f32 %v3110_v51, %v3109_v58  ;;  %v5251_v27 = vpop.f32.mrb[26].mxu1  ;;  %v3351_v59 = vmul.f32 %v2318_v31, %v2318_v31  ;;  %v4177_v29 = vpack.c.bf16 %v5223_v23, %v5223_v23  ;;  %v4134_v12 = vpack.c.bf16 %v5229_v18, %v5229_v18 }
 0x12b   : > { %v3501_v42 = vsel %vm3060_vm2, %v3349_v0, 0.0  ;;  %3004 = vst.msk [vmem:[%s4926_s13 + $0x120] sm:$0xf] %vm2931_vm1, %v4176_v47  ;;  %v5268_v46 = vpop.f32.mrb[27].mxu1  ;;  %v3503_v0 = vsel %vm3060_vm2, %v3350_v54, 0.0  ;;  %v3114_v47 = vsel %vm3060_vm2, %v2318_v31, 0.0  ;;  %v5275_v23 = vmul.f32 %v5074_v60, %v2029_v6 }
 0x12c   : > { %v3113_v10 = vadd.f32 %v3112_v15, %v3111_v14  ;;  %v3502_v51 = vadd.f32 %v3501_v42, %v3500_v52  ;;  %3005 = vst.msk [vmem:[%s4926_s13 + $0x124] sm:$0xf] %vm2931_vm1, %v4177_v29  ;;  %2962 = vst.msk [vmem:[%s4926_s13 + $0x78] sm:$0xf] %vm2931_vm1, %v4134_v12  ;;  %v5280_v42 = vmul.f32 %v5060_v36, %v2024_v26  ;;  %v3505_v52 = vsel %vm3060_vm2, %v3351_v59, 0.0  ;;  %v5293_v12 = vpop.f32.mrb[28].mxu1 }
 0x12d   : > { %v2039_v55 = vpop.permute.xlu1 %2038  ;;  %v2034_v19 = vpop.permute.xlu0 %2033  ;;  %6562 = vst [vmem:[#allocation30_spill] sm:$0xff] %v5275_v23  ;;  %v4179_v54 = vpack.c.bf16 %v5275_v23, %v5275_v23  ;;  %v2319_v36 = vmul.f32 %v4869_v63, %v5190_v35  ;;  %v2322_v26 = vmul.f32 %v5199_v45, %v4873_v2  ;;  %v2320_v59 = vmul.f32 %v4867_v62, %v5208_v4 }
 0x12e   : > { %v5231_v43 = vpop.f32.mrb[32].mxu0  ;;  %v3115_v20 = vadd.f32 %v3114_v47, %v3113_v10  ;;  %v3504_v14 = vadd.f32 %v3503_v0, %v3502_v51  ;;  %6563 = vst [vmem:[#allocation31_spill] sm:$0xff] %v5280_v42  ;;  %v4178_v60 = vpack.c.bf16 %v5280_v42, %v5280_v42  ;;  %v5305_v51 = vpop.f32.mrb[29].mxu1  ;;  %v5310_v0 = vmul.f32 %v2034_v19, %v5104_v39 }
 0x12f   : > { %v5243_v44 = vpop.f32.mrb[33].mxu0  ;;  %3007 = vst.msk [vmem:[%s4926_s13 + $0x12c] sm:$0xf] %vm2931_vm1, %v4179_v54  ;;  %v5313_v47 = vmul.f32 %v2039_v55, %v5120_v9  ;;  %v5317_v2 = vpop.f32.mrb[30].mxu1  ;;  %v4132_v35 = vpack.c.bf16 %v2319_v36, %v2319_v36  ;;  %v3116_v62 = vsel %vm3060_vm2, %v2319_v36, 0.0  ;;  %v3352_v45 = vmul.f32 %v2319_v36, %v2319_v36 }
 0x130   : > { %v5249_v22 = vpop.f32.mrb[34].mxu0  ;;  %v3506_v29 = vadd.f32 %v3505_v52, %v3504_v14  ;;  %3006 = vst.msk [vmem:[%s4926_s13 + $0x128] sm:$0xf] %vm2931_vm1, %v4178_v60  ;;  %6564 = vst [vmem:[#allocation32_spill] sm:$0xff] %v5310_v0  ;;  %v4135_v4 = vpack.c.bf16 %v2322_v26, %v2322_v26  ;;  %v3354_v39 = vmul.f32 %v5229_v18, %v5229_v18  ;;  %v5332_v60 = vpop.f32.mrb[31].mxu1  ;;  %v3118_v23 = vsel %vm3060_vm2, %v2320_v59, 0.0 }
 0x131   : > { %v5260_v50 = vpop.permute.xlu1 %2048  ;;  %v5262_v58 = vpop.permute.xlu0 %2043  ;;  %6565 = vst [vmem:[#allocation33_spill] sm:$0xff] %v5313_v47  ;;  %v3117_v9 = vadd.f32 %v3116_v62, %v3115_v20  ;;  %v4133_v55 = vpack.c.bf16 %v2320_v59, %v2320_v59  ;;  %v5328_v19 = vmul.f32 %v5231_v43, %v4887_v17  ;;  %2960 = vst.msk [vmem:[%s4926_s13 + $0x70] sm:$0xf] %vm2931_vm1, %v4132_v35  ;;  %v3507_v36 = vsel %vm3060_vm2, %v3352_v45, 0.0 }
 0x132   : > { %v5266_v30 = vpop.f32.mrb[35].mxu0  ;;  %2963 = vst.msk [vmem:[%s4926_s13 + $0x7c] sm:$0xf] %vm2931_vm1, %v4135_v4  ;;  %v3353_v42 = vmul.f32 %v2320_v59, %v2320_v59  ;;  %v4180_v20 = vpack.c.bf16 %v5310_v0, %v5310_v0  ;;  %v3508_v62 = vadd.f32 %v3507_v36, %v3506_v29  ;;  %v3120_v43 = vsel %vm3060_vm2, %v5229_v18, 0.0  ;;  %v5359_v18 = vpop.f32.mrb[32].mxu1 }
 0x133   : > { %2961 = vst.msk [vmem:[%s4926_s13 + $0x74] sm:$0xf] %vm2931_vm1, %v4133_v55  ;;  %v3119_v17 = vadd.f32 %v3118_v23, %v3117_v9  ;;  %v4181_v45 = vpack.c.bf16 %v5313_v47, %v5313_v47  ;;  %v4138_v23 = vpack.c.bf16 %v5328_v19, %v5328_v19  ;;  %6566 = vst [vmem:[#allocation34_spill] sm:$0xff] %v5359_v18 }
 0x134   : > { %v3509_v35 = vsel %vm3060_vm2, %v3353_v42, 0.0  ;;  %3008 = vst.msk [vmem:[%s4926_s13 + $0x130] sm:$0xf] %vm2931_vm1, %v4180_v20  ;;  %v3511_v42 = vsel %vm3060_vm2, %v3354_v39, 0.0  ;;  %v3355_v55 = vmul.f32 %v2322_v26, %v2322_v26  ;;  %v5366_v20 = vmul.f32 %v5111_v7, %v5260_v50 }
 0x135   : > { %v5285_v15 = vpop.permute.xlu1 %2058  ;;  %v5287_v31 = vpop.permute.xlu0 %2053  ;;  %v3121_v29 = vadd.f32 %v3120_v43, %v3119_v17  ;;  %v3510_v36 = vadd.f32 %v3509_v35, %v3508_v62  ;;  %3009 = vst.msk [vmem:[%s4926_s13 + $0x134] sm:$0xf] %vm2931_vm1, %v4181_v45  ;;  %2966 = vst.msk [vmem:[%s4926_s13 + $0x88] sm:$0xf] %vm2931_vm1, %v4138_v23  ;;  %v5376_v43 = vmul.f32 %v5094_v38, %v5262_v58  ;;  %v3122_v23 = vsel %vm3060_vm2, %v2322_v26, 0.0 }
 0x136   : > { %v5291_v6 = vpop.f32.mrb[36].mxu0  ;;  %6567 = vst [vmem:[#allocation35_spill] sm:$0xff] %v5366_v20  ;;  %v5370_v17 = vpop.f32.mrb[33].mxu1  ;;  %v2323_v39 = vmul.f32 %v4881_v11, %v5243_v44  ;;  %v4183_v50 = vpack.c.bf16 %v5366_v20, %v5366_v20 }
 0x137   : > { %v5303_v10 = vpop.f32.mrb[37].mxu0  ;;  %v3512_v62 = vadd.f32 %v3511_v42, %v3510_v36  ;;  %6568 = vst [vmem:[#allocation36_spill] sm:$0xff] %v5376_v43  ;;  %v5382_v7 = vpop.f32.mrb[34].mxu1  ;;  %v4182_v38 = vpack.c.bf16 %v5376_v43, %v5376_v43  ;;  %v3513_v42 = vsel %vm3060_vm2, %v3355_v55, 0.0  ;;  %v3123_v0 = vadd.f32 %v3122_v23, %v3121_v29 }
 0x138   : > { %v5315_v63 = vpop.f32.mrb[38].mxu0  ;;  %6569 = vst [vmem:[#allocation37_spill] sm:$0xff] %v5382_v7  ;;  %v4136_v58 = vpack.c.bf16 %v2323_v39, %v2323_v39  ;;  %v5395_v44 = vpop.f32.mrb[35].mxu1  ;;  %3011 = vst.msk [vmem:[%s4926_s13 + $0x13c] sm:$0xf] %vm2931_vm1, %v4183_v50  ;;  %v3124_v20 = vsel %vm3060_vm2, %v2323_v39, 0.0  ;;  %v3356_v18 = vmul.f32 %v2323_v39, %v2323_v39  ;;  %v2326_v43 = vmul.f32 %v5249_v22, %v4885_v16 }
 0x139   : > { %v5320_v14 = vpop.permute.xlu1 %2068  ;;  %v5322_v52 = vpop.permute.xlu0 %2063  ;;  %6570 = vst [vmem:[#allocation38_spill] sm:$0xff] %v5395_v44  ;;  %3010 = vst.msk [vmem:[%s4926_s13 + $0x138] sm:$0xf] %vm2931_vm1, %v4182_v38  ;;  %v3514_v26 = vadd.f32 %v3513_v42, %v3512_v62  ;;  %v2324_v7 = vmul.f32 %v4879_v8, %v5266_v30  ;;  %v3125_v44 = vadd.f32 %v3124_v20, %v3123_v0  ;;  %v3128_v42 = vsel %vm3060_vm2, %v5328_v19, 0.0 }
 0x13a   : > { %v5330_v54 = vpop.f32.mrb[39].mxu0  ;;  %2964 = vst.msk [vmem:[%s4926_s13 + $0x80] sm:$0xf] %vm2931_vm1, %v4136_v58  ;;  %v3515_v55 = vsel %vm3060_vm2, %v3356_v18, 0.0  ;;  %v5412_v29 = vmul.f32 %v5287_v31, %v5144_v61  ;;  %v5416_v39 = vmul.f32 %v5285_v15, %v5164_v1  ;;  %v3358_v16 = vmul.f32 %v5328_v19, %v5328_v19  ;;  %v5426_v0 = vpop.f32.mrb[36].mxu1 }
 0x13b   : > { %v3516_v8 = vadd.f32 %v3515_v55, %v3514_v26  ;;  %v4139_v30 = vpack.c.bf16 %v2326_v43, %v2326_v43  ;;  %v4137_v61 = vpack.c.bf16 %v2324_v7, %v2324_v7  ;;  %v3126_v31 = vsel %vm3060_vm2, %v2324_v7, 0.0  ;;  %v5433_v20 = vpop.f32.mrb[37].mxu1 }
 0x13c   : > { %6571 = vst [vmem:[#allocation39_spill] sm:$0xff] %v5412_v29  ;;  %6572 = vst [vmem:[#allocation40_spill] sm:$0xff] %v5416_v39  ;;  %v3357_v1 = vmul.f32 %v2324_v7, %v2324_v7  ;;  %v4184_v15 = vpack.c.bf16 %v5412_v29, %v5412_v29  ;;  %v3127_v23 = vadd.f32 %v3126_v31, %v3125_v44  ;;  %v5439_v58 = vpop.f32.mrb[38].mxu1 }
 0x13d   : > { %v5351_v59 = vpop.permute.xlu1 %2078  ;;  %v5353_v4 = vpop.permute.xlu0 %2073  ;;  %2967 = vst.msk [vmem:[%s4926_s13 + $0x8c] sm:$0xf] %vm2931_vm1, %v4139_v30  ;;  %2965 = vst.msk [vmem:[%s4926_s13 + $0x84] sm:$0xf] %vm2931_vm1, %v4137_v61  ;;  %v4185_v26 = vpack.c.bf16 %v5416_v39, %v5416_v39  ;;  %v3519_v30 = vsel %vm3060_vm2, %v3358_v16, 0.0  ;;  %v2329_v19 = vmul.f32 %v5291_v6, %v4899_v33  ;;  %v5465_v39 = vmul.f32 %v5150_v28, %v5320_v14 }
 0x13e   : > { %v5357_v9 = vpop.f32.mrb[40].mxu0  ;;  %v3517_v7 = vsel %vm3060_vm2, %v3357_v1, 0.0  ;;  %3012 = vst.msk [vmem:[%s4926_s13 + $0x140] sm:$0xf] %vm2931_vm1, %v4184_v15  ;;  %v3129_v31 = vadd.f32 %v3128_v42, %v3127_v23  ;;  %v5459_v1 = vpop.f32.mrb[39].mxu1  ;;  %v3359_v15 = vmul.f32 %v2326_v43, %v2326_v43  ;;  %v5469_v16 = vmul.f32 %v5138_v53, %v5322_v52 }
 0x13f   : > { %v5368_v47 = vpop.f32.mrb[41].mxu0  ;;  %v3518_v29 = vadd.f32 %v3517_v7, %v3516_v8  ;;  %3013 = vst.msk [vmem:[%s4926_s13 + $0x144] sm:$0xf] %vm2931_vm1, %v4185_v26  ;;  %6573 = vst [vmem:[#allocation41_spill] sm:$0xff] %v5465_v39  ;;  %v2327_v33 = vmul.f32 %v4893_v25, %v5303_v10  ;;  %v4142_v8 = vpack.c.bf16 %v2329_v19, %v2329_v19  ;;  %v3130_v14 = vsel %vm3060_vm2, %v2326_v43, 0.0  ;;  %v5486_v25 = vpop.f32.mrb[40].mxu1 }
 0x140   : > { %v5380_v35 = vpop.f32.mrb[42].mxu0  ;;  %6574 = vst [vmem:[#allocation42_spill] sm:$0xff] %v5469_v16  ;;  %v4187_v23 = vpack.c.bf16 %v5465_v39, %v5465_v39  ;;  %v4186_v42 = vpack.c.bf16 %v5469_v16, %v5469_v16  ;;  %6575 = vst [vmem:[#allocation43_spill] sm:$0xff] %v5486_v25  ;;  %v3521_v10 = vsel %vm3060_vm2, %v3359_v15, 0.0  ;;  %v5496_v43 = vpop.f32.mrb[41].mxu1  ;;  %v2330_v16 = vmul.f32 %v5315_v63, %v4897_v32 }
 0x141   : > { %v5386_v45 = vpop.permute.xlu1 %2088  ;;  %v5388_v36 = vpop.permute.xlu0 %2083  ;;  %v3520_v6 = vadd.f32 %v3519_v30, %v3518_v29  ;;  %2970 = vst.msk [vmem:[%s4926_s13 + $0x98] sm:$0xf] %vm2931_vm1, %v4142_v8  ;;  %v4140_v53 = vpack.c.bf16 %v2327_v33, %v2327_v33  ;;  %v3131_v29 = vadd.f32 %v3130_v14, %v3129_v31  ;;  %v3132_v26 = vsel %vm3060_vm2, %v2327_v33, 0.0 }
 0x142   : > { %v5393_v11 = vpop.f32.mrb[43].mxu0  ;;  %3015 = vst.msk [vmem:[%s4926_s13 + $0x14c] sm:$0xf] %vm2931_vm1, %v4187_v23  ;;  %3014 = vst.msk [vmem:[%s4926_s13 + $0x148] sm:$0xf] %vm2931_vm1, %v4186_v42  ;;  %v3360_v30 = vmul.f32 %v2327_v33, %v2327_v33  ;;  %v2328_v15 = vmul.f32 %v4891_v24, %v5330_v54  ;;  %v5506_v42 = vpop.f32.mrb[42].mxu1  ;;  %v5511_v14 = vmul.f32 %v5353_v4, %v5192_v21 }
 0x143   : > { %2968 = vst.msk [vmem:[%s4926_s13 + $0x90] sm:$0xf] %vm2931_vm1, %v4140_v53  ;;  %v3522_v8 = vadd.f32 %v3521_v10, %v3520_v6  ;;  %6576 = vst [vmem:[#allocation44_spill] sm:$0xff] %v5506_v42  ;;  %v3133_v31 = vadd.f32 %v3132_v26, %v3131_v29  ;;  %v5515_v6 = vmul.f32 %v5351_v59, %v5210_v56  ;;  %v5523_v29 = vpop.f32.mrb[43].mxu1 }
 0x144   : > { %v3523_v33 = vsel %vm3060_vm2, %v3360_v30, 0.0  ;;  %6577 = vst [vmem:[#allocation45_spill] sm:$0xff] %v5511_v14  ;;  %v3362_v63 = vmul.f32 %v2329_v19, %v2329_v19  ;;  %v4143_v53 = vpack.c.bf16 %v2330_v16, %v2330_v16  ;;  %v4141_v26 = vpack.c.bf16 %v2328_v15, %v2328_v15 }
 0x145   : > { %v5418_v50 = vpop.permute.xlu1 %2098  ;;  %v5420_v62 = vpop.permute.xlu0 %2093  ;;  %6578 = vst [vmem:[#allocation46_spill] sm:$0xff] %v5515_v6  ;;  %v3524_v54 = vadd.f32 %v3523_v33, %v3522_v8  ;;  %v3134_v21 = vsel %vm3060_vm2, %v2328_v15, 0.0  ;;  %v3361_v4 = vmul.f32 %v2328_v15, %v2328_v15  ;;  %v4188_v56 = vpack.c.bf16 %v5511_v14, %v5511_v14 }
 0x146   : > { %v5424_v22 = vpop.f32.mrb[44].mxu0  ;;  %2971 = vst.msk [vmem:[%s4926_s13 + $0x9c] sm:$0xf] %vm2931_vm1, %v4143_v53  ;;  %v3135_v59 = vadd.f32 %v3134_v21, %v3133_v31  ;;  %v3136_v30 = vsel %vm3060_vm2, %v2329_v19, 0.0  ;;  %2969 = vst.msk [vmem:[%s4926_s13 + $0x94] sm:$0xf] %vm2931_vm1, %v4141_v26  ;;  %v4189_v33 = vpack.c.bf16 %v5515_v6, %v5515_v6  ;;  %v2333_v19 = vmul.f32 %v5357_v9, %v4911_v49 }
 0x147   : > { %v5431_v18 = vpop.f32.mrb[45].mxu0  ;;  %v3525_v8 = vsel %vm3060_vm2, %v3361_v4, 0.0  ;;  %3016 = vst.msk [vmem:[%s4926_s13 + $0x150] sm:$0xf] %vm2931_vm1, %v4188_v56  ;;  %v3527_v14 = vsel %vm3060_vm2, %v3362_v63, 0.0  ;;  %v5547_v26 = vpop.f32.mrb[44].mxu1  ;;  %v3363_v21 = vmul.f32 %v2330_v16, %v2330_v16  ;;  %v5553_v4 = vmul.f32 %v5201_v37, %v5386_v45 }
 0x148   : > { %v5437_v38 = vpop.f32.mrb[46].mxu0  ;;  %v3137_v53 = vadd.f32 %v3136_v30, %v3135_v59  ;;  %v3526_v42 = vadd.f32 %v3525_v8, %v3524_v54  ;;  %3017 = vst.msk [vmem:[%s4926_s13 + $0x154] sm:$0xf] %vm2931_vm1, %v4189_v33  ;;  %v5557_v63 = vmul.f32 %v5181_v13, %v5388_v36  ;;  %v2331_v49 = vmul.f32 %v4905_v41, %v5368_v47  ;;  %v5563_v54 = vpop.f32.mrb[45].mxu1 }
 0x149   : > { %v5450_v55 = vpop.permute.xlu1 %2108  ;;  %v5452_v44 = vpop.permute.xlu0 %2103  ;;  %6579 = vst [vmem:[#allocation47_spill] sm:$0xff] %v5553_v4  ;;  %v4146_v59 = vpack.c.bf16 %v2333_v19, %v2333_v19  ;;  %v4191_v13 = vpack.c.bf16 %v5553_v4, %v5553_v4  ;;  %v3138_v41 = vsel %vm3060_vm2, %v2330_v16, 0.0 }
 0x14a   : > { %v5457_v61 = vpop.f32.mrb[47].mxu0  ;;  %6580 = vst [vmem:[#allocation48_spill] sm:$0xff] %v5557_v63  ;;  %v3528_v56 = vadd.f32 %v3527_v14, %v3526_v42  ;;  %v5567_v37 = vpop.f32.mrb[46].mxu1  ;;  %v4190_v45 = vpack.c.bf16 %v5557_v63, %v5557_v63  ;;  %v4144_v47 = vpack.c.bf16 %v2331_v49, %v2331_v49  ;;  %v3529_v14 = vsel %vm3060_vm2, %v3363_v21, 0.0 }
 0x14b   : > { %2974 = vst.msk [vmem:[%s4926_s13 + $0xa8] sm:$0xf] %vm2931_vm1, %v4146_v59  ;;  %v5578_v42 = vpop.f32.mrb[47].mxu1  ;;  %3019 = vst.msk [vmem:[%s4926_s13 + $0x15c] sm:$0xf] %vm2931_vm1, %v4191_v13  ;;  %v3139_v8 = vadd.f32 %v3138_v41, %v3137_v53  ;;  %v3140_v33 = vsel %vm3060_vm2, %v2331_v49, 0.0  ;;  %v3364_v4 = vmul.f32 %v2331_v49, %v2331_v49  ;;  %v2334_v59 = vmul.f32 %v5380_v35, %v4909_v48 }
 0x14c   : > { %3018 = vst.msk [vmem:[%s4926_s13 + $0x158] sm:$0xf] %vm2931_vm1, %v4190_v45  ;;  %2972 = vst.msk [vmem:[%s4926_s13 + $0xa0] sm:$0xf] %vm2931_vm1, %v4144_v47  ;;  %v3530_v16 = vadd.f32 %v3529_v14, %v3528_v56  ;;  %v2332_v63 = vmul.f32 %v4903_v40, %v5393_v11  ;;  %v5595_v13 = vmul.f32 %v5420_v62, %v5245_v5 }
 0x14d   : > { %v5477_v7 = vpop.permute.xlu1 %2118  ;;  %v5479_v28 = vpop.permute.xlu0 %2113  ;;  %v3141_v6 = vadd.f32 %v3140_v33, %v3139_v8  ;;  %v3531_v21 = vsel %vm3060_vm2, %v3364_v4, 0.0  ;;  %v5599_v53 = vmul.f32 %v5418_v50, %v5268_v46  ;;  %v3366_v48 = vmul.f32 %v2333_v19, %v2333_v19 }
 0x14e   : > { %v5484_v52 = vpop.f32.mrb[48].mxu0  ;;  %6581 = vst [vmem:[#allocation49_spill] sm:$0xff] %v5595_v13  ;;  %v3532_v35 = vadd.f32 %v3531_v21, %v3530_v16  ;;  %v4147_v40 = vpack.c.bf16 %v2334_v59, %v2334_v59  ;;  %v4145_v45 = vpack.c.bf16 %v2332_v63, %v2332_v63  ;;  %v3142_v5 = vsel %vm3060_vm2, %v2332_v63, 0.0 }
 0x14f   : > { %v5494_v39 = vpop.f32.mrb[49].mxu0  ;;  %6582 = vst [vmem:[#allocation50_spill] sm:$0xff] %v5599_v53  ;;  %v5607_v4 = vpop.f32.mrb[48].mxu1  ;;  %v3365_v62 = vmul.f32 %v2332_v63, %v2332_v63  ;;  %v4192_v46 = vpack.c.bf16 %v5595_v13, %v5595_v13  ;;  %v3143_v47 = vadd.f32 %v3142_v5, %v3141_v6  ;;  %v3144_v33 = vsel %vm3060_vm2, %v2333_v19, 0.0 }
 0x150   : > { %v5504_v23 = vpop.f32.mrb[50].mxu0  ;;  %v5614_v41 = vpop.f32.mrb[49].mxu1  ;;  %2975 = vst.msk [vmem:[%s4926_s13 + $0xac] sm:$0xf] %vm2931_vm1, %v4147_v40  ;;  %2973 = vst.msk [vmem:[%s4926_s13 + $0xa4] sm:$0xf] %vm2931_vm1, %v4145_v45  ;;  %v4193_v16 = vpack.c.bf16 %v5599_v53, %v5599_v53  ;;  %v2337_v6 = vmul.f32 %v5424_v22, %v4931_v3  ;;  %v3367_v45 = vmul.f32 %v2334_v59, %v2334_v59 }
 0x151   : > { %v5517_v32 = vpop.permute.xlu1 %2128  ;;  %v5519_v24 = vpop.permute.xlu0 %2123  ;;  %v3533_v63 = vsel %vm3060_vm2, %v3365_v62, 0.0  ;;  %3020 = vst.msk [vmem:[%s4926_s13 + $0x160] sm:$0xf] %vm2931_vm1, %v4192_v46  ;;  %v3535_v21 = vsel %vm3060_vm2, %v3366_v48, 0.0  ;;  %v3145_v40 = vadd.f32 %v3144_v33, %v3143_v47  ;;  %v5641_v62 = vmul.f32 %v5251_v27, %v5450_v55 }
 0x152   : > { %v5521_v10 = vpop.f32.mrb[51].mxu0  ;;  %v5620_v8 = vpop.f32.mrb[50].mxu1  ;;  %v3534_v13 = vadd.f32 %v3533_v63, %v3532_v35  ;;  %3021 = vst.msk [vmem:[%s4926_s13 + $0x164] sm:$0xf] %vm2931_vm1, %v4193_v16  ;;  %v5645_v48 = vmul.f32 %v5233_v34, %v5452_v44  ;;  %v2335_v3 = vmul.f32 %v4918_v57, %v5431_v18  ;;  %v4150_v35 = vpack.c.bf16 %v2337_v6, %v2337_v6 }
 0x153   : > { %v5635_v19 = vpop.f32.mrb[51].mxu1  ;;  %6583 = vst [vmem:[#allocation51_spill] sm:$0xff] %v5641_v62  ;;  %v4195_v46 = vpack.c.bf16 %v5641_v62, %v5641_v62  ;;  %v3146_v55 = vsel %vm3060_vm2, %v2334_v59, 0.0  ;;  %v3537_v18 = vsel %vm3060_vm2, %v3367_v45, 0.0  ;;  %v6586_v62 = vld [vmem:[#allocation3_spill] sm:$0xff]  ;;  %v6587_v45 = vld [vmem:[#allocation2_spill] sm:$0xff] }
 0x154   : > { %6584 = vst [vmem:[#allocation52_spill] sm:$0xff] %v5645_v48  ;;  %v3536_v22 = vadd.f32 %v3535_v21, %v3534_v13  ;;  %v4194_v47 = vpack.c.bf16 %v5645_v48, %v5645_v48  ;;  %2978 = vst.msk [vmem:[%s4926_s13 + $0xb8] sm:$0xf] %vm2931_vm1, %v4150_v35  ;;  %v4148_v34 = vpack.c.bf16 %v2335_v3, %v2335_v3  ;;  %v3148_v63 = vsel %vm3060_vm2, %v2335_v3, 0.0 }
 0x155   : > { %v5538_v25 = vpop.permute.xlu1 %2138  ;;  %v5540_v15 = vpop.permute.xlu0 %2133  ;;  %3023 = vst.msk [vmem:[%s4926_s13 + $0x16c] sm:$0xf] %vm2931_vm1, %v4195_v46  ;;  %v3147_v13 = vadd.f32 %v3146_v55, %v3145_v40  ;;  %v3368_v16 = vmul.f32 %v2335_v3, %v2335_v3  ;;  %v2338_v48 = vmul.f32 %v5437_v38, %v6586_v62  ;;  %v2336_v53 = vmul.f32 %v6587_v45, %v5457_v61 }
 0x156   : > { %v5545_v31 = vpop.f32.mrb[52].mxu0  ;;  %3022 = vst.msk [vmem:[%s4926_s13 + $0x168] sm:$0xf] %vm2931_vm1, %v4194_v47  ;;  %2976 = vst.msk [vmem:[%s4926_s13 + $0xb0] sm:$0xf] %vm2931_vm1, %v4148_v34  ;;  %v3538_v35 = vadd.f32 %v3537_v18, %v3536_v22  ;;  %v5687_v55 = vmul.f32 %v5479_v28, %v5305_v51  ;;  %v5691_v22 = vmul.f32 %v5477_v7, %v5332_v60 }
 0x157   : > { %v5561_v9 = vpop.f32.mrb[53].mxu0  ;;  %v5662_v57 = vpop.f32.mrb[52].mxu1  ;;  %v3149_v47 = vadd.f32 %v3148_v63, %v3147_v13  ;;  %v3539_v3 = vsel %vm3060_vm2, %v3368_v16, 0.0  ;;  %v3370_v38 = vmul.f32 %v2337_v6, %v2337_v6  ;;  %v4151_v62 = vpack.c.bf16 %v2338_v48, %v2338_v48 }
 0x158   : > { %v5565_v30 = vpop.f32.mrb[54].mxu0  ;;  %6585 = vst [vmem:[#allocation53_spill] sm:$0xff] %v5662_v57  ;;  %v5672_v59 = vpop.f32.mrb[53].mxu1  ;;  %6589 = vst [vmem:[#allocation2_spill] sm:$0xff] %v5687_v55  ;;  %v3540_v61 = vadd.f32 %v3539_v3, %v3538_v35  ;;  %v4149_v13 = vpack.c.bf16 %v2336_v53, %v2336_v53  ;;  %v3150_v63 = vsel %vm3060_vm2, %v2336_v53, 0.0  ;;  %v3369_v16 = vmul.f32 %v2336_v53, %v2336_v53 }
 0x159   : > { %v5576_v36 = vpop.f32.mrb[55].mxu0  ;;  %v5601_v49 = vpop.permute.xlu1 %2148  ;;  %6590 = vst [vmem:[#allocation54_spill] sm:$0xff] %v5691_v22  ;;  %v4196_v51 = vpack.c.bf16 %v5687_v55, %v5687_v55  ;;  %2979 = vst.msk [vmem:[%s4926_s13 + $0xbc] sm:$0xf] %vm2931_vm1, %v4151_v62  ;;  %v3151_v60 = vadd.f32 %v3150_v63, %v3149_v47  ;;  %v3152_v35 = vsel %vm3060_vm2, %v2337_v6, 0.0  ;;  %v4197_v53 = vpack.c.bf16 %v5691_v22, %v5691_v22 }
 0x15a   : > { %v5603_v56 = vpop.permute.xlu0 %2143  ;;  %v5682_v40 = vpop.f32.mrb[54].mxu1  ;;  %2977 = vst.msk [vmem:[%s4926_s13 + $0xb4] sm:$0xf] %vm2931_vm1, %v4149_v13  ;;  %v3541_v45 = vsel %vm3060_vm2, %v3369_v16, 0.0  ;;  %v3543_v3 = vsel %vm3060_vm2, %v3370_v38, 0.0  ;;  %v3371_v6 = vmul.f32 %v2338_v48, %v2338_v48  ;;  %v5723_v13 = vmul.f32 %v5317_v2, %v5517_v32  ;;  %v6594_v38 = vld [vmem:[#allocation5_spill] sm:$0xff] }
 0x15b   : > { %6588 = vst [vmem:[#allocation3_spill] sm:$0xff] %v5682_v40  ;;  %v5695_v18 = vpop.f32.mrb[55].mxu1  ;;  %3024 = vst.msk [vmem:[%s4926_s13 + $0x170] sm:$0xf] %vm2931_vm1, %v4196_v51  ;;  %v3153_v55 = vadd.f32 %v3152_v35, %v3151_v60  ;;  %v3542_v57 = vadd.f32 %v3541_v45, %v3540_v61  ;;  %v6591_v40 = vld [vmem:[#allocation7_spill] sm:$0xff]  ;;  %v5727_v63 = vmul.f32 %v5293_v12, %v5519_v24  ;;  %v3154_v12 = vsel %vm3060_vm2, %v2338_v48, 0.0 }
 0x15c   : > { %v2341_v47 = vmul.f32 %v5484_v52, %v6591_v40  ;;  %3025 = vst.msk [vmem:[%s4926_s13 + $0x174] sm:$0xf] %vm2931_vm1, %v4197_v53  ;;  %6592 = vst [vmem:[#allocation7_spill] sm:$0xff] %v5723_v13  ;;  %v2339_v61 = vmul.f32 %v6594_v38, %v5494_v39  ;;  %v4199_v2 = vpack.c.bf16 %v5723_v13, %v5723_v13  ;;  %v3545_v35 = vsel %vm3060_vm2, %v3371_v6, 0.0  ;;  %v6595_v38 = vld [vmem:[#allocation6_spill] sm:$0xff]  ;;  %v6596_v13 = vld [vmem:[#allocation4_spill] sm:$0xff] }
 0x15d   : > { %v5653_v33 = vpop.permute.xlu1 %2158  ;;  %6593 = vst [vmem:[#allocation55_spill] sm:$0xff] %v5727_v63  ;;  %v3544_v52 = vadd.f32 %v3543_v3, %v3542_v57  ;;  %v4198_v32 = vpack.c.bf16 %v5727_v63, %v5727_v63  ;;  %v3155_v45 = vadd.f32 %v3154_v12, %v3153_v55  ;;  %v2340_v63 = vmul.f32 %v6596_v13, %v5521_v10  ;;  %v6597_v55 = vld [vmem:[#allocation38_spill] sm:$0xff] }
 0x15e   : > { %v5605_v11 = vpop.f32.mrb[56].mxu0  ;;  %v5655_v27 = vpop.permute.xlu0 %2153  ;;  %v4154_v40 = vpack.c.bf16 %v2341_v47, %v2341_v47  ;;  %v4152_v39 = vpack.c.bf16 %v2339_v61, %v2339_v61  ;;  %3027 = vst.msk [vmem:[%s4926_s13 + $0x17c] sm:$0xf] %vm2931_vm1, %v4199_v2  ;;  %v3156_v53 = vsel %vm3060_vm2, %v2339_v61, 0.0  ;;  %v3372_v3 = vmul.f32 %v2339_v61, %v2339_v61 }
 0x15f   : > { %v5612_v50 = vpop.f32.mrb[57].mxu0  ;;  %v5717_v62 = vpop.f32.mrb[56].mxu1  ;;  %3026 = vst.msk [vmem:[%s4926_s13 + $0x178] sm:$0xf] %vm2931_vm1, %v4198_v32  ;;  %v3546_v48 = vadd.f32 %v3545_v35, %v3544_v52  ;;  %v3157_v22 = vadd.f32 %v3156_v53, %v3155_v45  ;;  %v5763_v2 = vmul.f32 %v5540_v15, %v5370_v17  ;;  %v5767_v61 = vmul.f32 %v5538_v25, %v6597_v55  ;;  %v6599_v55 = vld [vmem:[#allocation11_spill] sm:$0xff] }
 0x160   : > { %v5618_v14 = vpop.f32.mrb[58].mxu0  ;;  %v5731_v16 = vpop.f32.mrb[57].mxu1  ;;  %2982 = vst.msk [vmem:[%s4926_s13 + $0xc8] sm:$0xf] %vm2931_vm1, %v4154_v40  ;;  %2980 = vst.msk [vmem:[%s4926_s13 + $0xc0] sm:$0xf] %vm2931_vm1, %v4152_v39  ;;  %v2342_v40 = vmul.f32 %v5504_v23, %v6595_v38  ;;  %v3374_v52 = vmul.f32 %v2341_v47, %v2341_v47  ;;  %v4153_v39 = vpack.c.bf16 %v2340_v63, %v2340_v63 }
 0x161   : > { %v5633_v5 = vpop.f32.mrb[59].mxu0  ;;  %v5700_v28 = vpop.permute.xlu1 %2168  ;;  %v3547_v6 = vsel %vm3060_vm2, %v3372_v3, 0.0  ;;  %6598 = vst [vmem:[#allocation5_spill] sm:$0xff] %v5767_v61  ;;  %v3158_v10 = vsel %vm3060_vm2, %v2340_v63, 0.0  ;;  %v3373_v13 = vmul.f32 %v2340_v63, %v2340_v63  ;;  %v4200_v35 = vpack.c.bf16 %v5763_v2, %v5763_v2 }
 0x162   : > { %v5704_v7 = vpop.permute.xlu0 %2163  ;;  %v5733_v51 = vpop.f32.mrb[58].mxu1  ;;  %v3548_v32 = vadd.f32 %v3547_v6, %v3546_v48  ;;  %v4155_v23 = vpack.c.bf16 %v2342_v40, %v2342_v40  ;;  %v3159_v25 = vadd.f32 %v3158_v10, %v3157_v22  ;;  %v3160_v3 = vsel %vm3060_vm2, %v2341_v47, 0.0  ;;  %2981 = vst.msk [vmem:[%s4926_s13 + $0xc4] sm:$0xf] %vm2931_vm1, %v4153_v39  ;;  %v6600_v39 = vld [vmem:[#allocation37_spill] sm:$0xff] }
 0x163   : > { %v5746_v57 = vpop.f32.mrb[59].mxu1  ;;  %v3549_v63 = vsel %vm3060_vm2, %v3373_v13, 0.0  ;;  %3028 = vst.msk [vmem:[%s4926_s13 + $0x180] sm:$0xf] %vm2931_vm1, %v4200_v35  ;;  %v4201_v48 = vpack.c.bf16 %v5767_v61, %v5767_v61  ;;  %v3551_v38 = vsel %vm3060_vm2, %v3374_v52, 0.0  ;;  %v3375_v47 = vmul.f32 %v2342_v40, %v2342_v40  ;;  %v6602_v35 = vld [vmem:[#allocation34_spill] sm:$0xff] }
 0x164   : > { %2983 = vst.msk [vmem:[%s4926_s13 + $0xcc] sm:$0xf] %vm2931_vm1, %v4155_v23  ;;  %v3161_v6 = vadd.f32 %v3160_v3, %v3159_v25  ;;  %v3550_v22 = vadd.f32 %v3549_v63, %v3548_v32  ;;  %v2345_v23 = vmul.f32 %v5545_v31, %v6599_v55  ;;  %v5801_v13 = vmul.f32 %v6600_v39, %v5601_v49  ;;  %v6604_v52 = vld [vmem:[#allocation9_spill] sm:$0xff] }
 0x165   : > { %v5739_v60 = vpop.permute.xlu1 %2178  ;;  %3029 = vst.msk [vmem:[%s4926_s13 + $0x184] sm:$0xf] %vm2931_vm1, %v4201_v48  ;;  %v5805_v61 = vmul.f32 %v6602_v35, %v5603_v56  ;;  %v2343_v32 = vmul.f32 %v6604_v52, %v5561_v9  ;;  %v3162_v48 = vsel %vm3060_vm2, %v2342_v40, 0.0  ;;  %v3553_v9 = vsel %vm3060_vm2, %v3375_v47, 0.0  ;;  %v6605_v35 = vld [vmem:[#allocation10_spill] sm:$0xff] }
 0x166   : > { %v5660_v44 = vpop.f32.mrb[60].mxu0  ;;  %v5744_v24 = vpop.permute.xlu0 %2173  ;;  %6601 = vst [vmem:[#allocation6_spill] sm:$0xff] %v5801_v13  ;;  %v3552_v31 = vadd.f32 %v3551_v38, %v3550_v22  ;;  %v4158_v25 = vpack.c.bf16 %v2345_v23, %v2345_v23  ;;  %v4203_v3 = vpack.c.bf16 %v5801_v13, %v5801_v13  ;;  %v3163_v38 = vadd.f32 %v3162_v48, %v3161_v6 }
 0x167   : > { %v5670_v21 = vpop.f32.mrb[61].mxu0  ;;  %v5769_v12 = vpop.f32.mrb[60].mxu1  ;;  %6603 = vst [vmem:[#allocation4_spill] sm:$0xff] %v5805_v61  ;;  %v4202_v63 = vpack.c.bf16 %v5805_v61, %v5805_v61  ;;  %v4156_v49 = vpack.c.bf16 %v2343_v32, %v2343_v32  ;;  %v3164_v22 = vsel %vm3060_vm2, %v2343_v32, 0.0  ;;  %v3376_v39 = vmul.f32 %v2343_v32, %v2343_v32 }
 0x168   : > { %v5680_v46 = vpop.f32.mrb[62].mxu0  ;;  %v5776_v15 = vpop.f32.mrb[61].mxu1  ;;  %2986 = vst.msk [vmem:[%s4926_s13 + $0xd8] sm:$0xf] %vm2931_vm1, %v4158_v25  ;;  %3031 = vst.msk [vmem:[%s4926_s13 + $0x18c] sm:$0xf] %vm2931_vm1, %v4203_v3  ;;  %v3554_v40 = vadd.f32 %v3553_v9, %v3552_v31  ;;  %v2346_v52 = vmul.f32 %v5565_v30, %v6605_v35  ;;  %v3165_v61 = vadd.f32 %v3164_v22, %v3163_v38 }
 0x169   : > { %v5693_v34 = vpop.f32.mrb[63].mxu0  ;;  %v5774_v17 = vpop.permute.xlu1 %2188  ;;  %3030 = vst.msk [vmem:[%s4926_s13 + $0x188] sm:$0xf] %vm2931_vm1, %v4202_v63  ;;  %2984 = vst.msk [vmem:[%s4926_s13 + $0xd0] sm:$0xf] %vm2931_vm1, %v4156_v49  ;;  %v6606_v25 = vld [vmem:[#allocation8_spill] sm:$0xff]  ;;  %v5835_v6 = vmul.f32 %v5655_v27, %v5433_v20  ;;  %v5839_v32 = vmul.f32 %v5653_v33, %v5459_v1  ;;  %v3378_v31 = vmul.f32 %v2345_v23, %v2345_v23 }
 0x16a   : > { %v5780_v45 = vpop.permute.xlu0 %2183  ;;  %v5782_v53 = vpop.f32.mrb[62].mxu1  ;;  %v2344_v13 = vmul.f32 %v6606_v25, %v5576_v36  ;;  %v3555_v47 = vsel %vm3060_vm2, %v3376_v39, 0.0  ;;  %v4159_v63 = vpack.c.bf16 %v2346_v52, %v2346_v52  ;;  %v3168_v1 = vsel %vm3060_vm2, %v2345_v23, 0.0  ;;  %v6607_v39 = vld [vmem:[#allocation15_spill] sm:$0xff] }
 0x16b   : > { %v5795_v10 = vpop.f32.mrb[63].mxu1  ;;  %v3556_v3 = vadd.f32 %v3555_v47, %v3554_v40  ;;  %v4204_v49 = vpack.c.bf16 %v5835_v6, %v5835_v6  ;;  %v3559_v38 = vsel %vm3060_vm2, %v3378_v31, 0.0  ;;  %v2349_v40 = vmul.f32 %v5605_v11, %v6607_v39  ;;  %v6608_v47 = vld [vmem:[#allocation13_spill] sm:$0xff] }
 0x16c   : > { %v4157_v30 = vpack.c.bf16 %v2344_v13, %v2344_v13  ;;  %v3166_v48 = vsel %vm3060_vm2, %v2344_v13, 0.0  ;;  %v3377_v36 = vmul.f32 %v2344_v13, %v2344_v13  ;;  %2987 = vst.msk [vmem:[%s4926_s13 + $0xdc] sm:$0xf] %vm2931_vm1, %v4159_v63  ;;  %v4205_v13 = vpack.c.bf16 %v5839_v32, %v5839_v32 }
 0x16d   : > { %v5816_v55 = vpop.permute.xlu1 %2198  ;;  %v3167_v20 = vadd.f32 %v3166_v48, %v3165_v61  ;;  %3032 = vst.msk [vmem:[%s4926_s13 + $0x190] sm:$0xf] %vm2931_vm1, %v4204_v49  ;;  %v3379_v35 = vmul.f32 %v2346_v52, %v2346_v52  ;;  %v5865_v23 = vmul.f32 %v5439_v58, %v5700_v28  ;;  %v5869_v25 = vmul.f32 %v5426_v0, %v5704_v7 }
 0x16e   : > { %v5818_v56 = vpop.permute.xlu0 %2193  ;;  %2985 = vst.msk [vmem:[%s4926_s13 + $0xd4] sm:$0xf] %vm2931_vm1, %v4157_v30  ;;  %v3557_v33 = vsel %vm3060_vm2, %v3377_v36, 0.0  ;;  %3033 = vst.msk [vmem:[%s4926_s13 + $0x194] sm:$0xf] %vm2931_vm1, %v4205_v13  ;;  %v2347_v31 = vmul.f32 %v6608_v47, %v5612_v50  ;;  %v4162_v63 = vpack.c.bf16 %v2349_v40, %v2349_v40  ;;  %v3170_v48 = vsel %vm3060_vm2, %v2346_v52, 0.0 }
 0x16f   : > { %v3169_v22 = vadd.f32 %v3168_v1, %v3167_v20  ;;  %v3558_v61 = vadd.f32 %v3557_v33, %v3556_v3  ;;  %v4207_v11 = vpack.c.bf16 %v5865_v23, %v5865_v23  ;;  %v4206_v30 = vpack.c.bf16 %v5869_v25, %v5869_v25  ;;  %v6609_v20 = vld [vmem:[#allocation14_spill] sm:$0xff]  ;;  %v6610_v33 = vld [vmem:[#allocation12_spill] sm:$0xff] }
 0x170   : > { %2990 = vst.msk [vmem:[%s4926_s13 + $0xe8] sm:$0xf] %vm2931_vm1, %v4162_v63  ;;  %v4160_v58 = vpack.c.bf16 %v2347_v31, %v2347_v31  ;;  %v3561_v50 = vsel %vm3060_vm2, %v3379_v35, 0.0  ;;  %v3172_v36 = vsel %vm3060_vm2, %v2347_v31, 0.0  ;;  %v3380_v49 = vmul.f32 %v2347_v31, %v2347_v31 }
 0x171   : > { %v5846_v27 = vpop.permute.xlu1 %2208  ;;  %v3560_v3 = vadd.f32 %v3559_v38, %v3558_v61  ;;  %3035 = vst.msk [vmem:[%s4926_s13 + $0x19c] sm:$0xf] %vm2931_vm1, %v4207_v11  ;;  %3034 = vst.msk [vmem:[%s4926_s13 + $0x198] sm:$0xf] %vm2931_vm1, %v4206_v30  ;;  %v3171_v7 = vadd.f32 %v3170_v48, %v3169_v22  ;;  %v2350_v1 = vmul.f32 %v5618_v14, %v6609_v20  ;;  %v6613_v20 = vld [vmem:[#allocation43_spill] sm:$0xff] }
 0x172   : > { %v5848_v9 = vpop.permute.xlu0 %2203  ;;  %2988 = vst.msk [vmem:[%s4926_s13 + $0xe0] sm:$0xf] %vm2931_vm1, %v4160_v58  ;;  %v2348_v13 = vmul.f32 %v6610_v33, %v5633_v5  ;;  %v3563_v61 = vsel %vm3060_vm2, %v3380_v49, 0.0  ;;  %v5899_v22 = vmul.f32 %v5744_v24, %v5496_v43  ;;  %v5903_v39 = vmul.f32 %v5739_v60, %v5523_v29 }
 0x173   : > { %v3562_v52 = vadd.f32 %v3561_v50, %v3560_v3  ;;  %v3173_v38 = vadd.f32 %v3172_v36, %v3171_v7  ;;  %v3382_v35 = vmul.f32 %v2349_v40, %v2349_v40  ;;  %v4163_v31 = vpack.c.bf16 %v2350_v1, %v2350_v1  ;;  %v6611_v7 = vld [vmem:[#allocation19_spill] sm:$0xff] }
 0x174   : > { %v4161_v14 = vpack.c.bf16 %v2348_v13, %v2348_v13  ;;  %v3174_v3 = vsel %vm3060_vm2, %v2348_v13, 0.0  ;;  %v3381_v5 = vmul.f32 %v2348_v13, %v2348_v13  ;;  %v4208_v63 = vpack.c.bf16 %v5899_v22, %v5899_v22  ;;  %v6614_v13 = vld [vmem:[#allocation17_spill] sm:$0xff] }
 0x175   : > { %v5880_v28 = vpop.permute.xlu1 %2218  ;;  %v3564_v47 = vadd.f32 %v3563_v61, %v3562_v52  ;;  %2991 = vst.msk [vmem:[%s4926_s13 + $0xec] sm:$0xf] %vm2931_vm1, %v4163_v31  ;;  %v3175_v43 = vadd.f32 %v3174_v3, %v3173_v38  ;;  %v3176_v29 = vsel %vm3060_vm2, %v2349_v40, 0.0  ;;  %v4209_v30 = vpack.c.bf16 %v5903_v39, %v5903_v39  ;;  %v6612_v40 = vld [vmem:[#allocation44_spill] sm:$0xff] }
 0x176   : > { %v5882_v0 = vpop.permute.xlu0 %2213  ;;  %2989 = vst.msk [vmem:[%s4926_s13 + $0xe4] sm:$0xf] %vm2931_vm1, %v4161_v14  ;;  %v3565_v60 = vsel %vm3060_vm2, %v3381_v5, 0.0  ;;  %3036 = vst.msk [vmem:[%s4926_s13 + $0x1a0] sm:$0xf] %vm2931_vm1, %v4208_v63  ;;  %v3567_v48 = vsel %vm3060_vm2, %v3382_v35, 0.0  ;;  %v2353_v36 = vmul.f32 %v5660_v44, %v6611_v7  ;;  %v3383_v49 = vmul.f32 %v2350_v1, %v2350_v1 }
 0x177   : > { %v3177_v58 = vadd.f32 %v3176_v29, %v3175_v43  ;;  %v3566_v50 = vadd.f32 %v3565_v60, %v3564_v47  ;;  %3037 = vst.msk [vmem:[%s4926_s13 + $0x1a4] sm:$0xf] %vm2931_vm1, %v4209_v30  ;;  %v5929_v52 = vmul.f32 %v6612_v40, %v5774_v17  ;;  %v5933_v33 = vmul.f32 %v6613_v20, %v5780_v45  ;;  %v6615_v43 = vld [vmem:[#allocation18_spill] sm:$0xff]  ;;  %v6616_v60 = vld [vmem:[#allocation16_spill] sm:$0xff] }
 0x178   : > { %v2351_v38 = vmul.f32 %v6614_v13, %v5670_v21  ;;  %v4166_v35 = vpack.c.bf16 %v2353_v36, %v2353_v36  ;;  %v3178_v31 = vsel %vm3060_vm2, %v2350_v1, 0.0  ;;  %v3569_v21 = vsel %vm3060_vm2, %v3383_v49, 0.0 }
 0x179   : > { %v5910_v24 = vpop.permute.xlu1 %2228  ;;  %v3568_v61 = vadd.f32 %v3567_v48, %v3566_v50  ;;  %v4211_v44 = vpack.c.bf16 %v5929_v52, %v5929_v52  ;;  %v4210_v47 = vpack.c.bf16 %v5933_v33, %v5933_v33  ;;  %v3179_v3 = vadd.f32 %v3178_v31, %v3177_v58 }
 0x17a   : > { %v5912_v11 = vpop.permute.xlu0 %2223  ;;  %2994 = vst.msk [vmem:[%s4926_s13 + $0xf8] sm:$0xf] %vm2931_vm1, %v4166_v35  ;;  %v4164_v17 = vpack.c.bf16 %v2351_v38, %v2351_v38  ;;  %v3180_v5 = vsel %vm3060_vm2, %v2351_v38, 0.0  ;;  %v3384_v63 = vmul.f32 %v2351_v38, %v2351_v38  ;;  %v2354_v29 = vmul.f32 %v5680_v46, %v6615_v43 }
 0x17b   : > { %3039 = vst.msk [vmem:[%s4926_s13 + $0x1ac] sm:$0xf] %vm2931_vm1, %v4211_v44  ;;  %3038 = vst.msk [vmem:[%s4926_s13 + $0x1a8] sm:$0xf] %vm2931_vm1, %v4210_v47  ;;  %v3570_v1 = vadd.f32 %v3569_v21, %v3568_v61  ;;  %v2352_v30 = vmul.f32 %v6616_v60, %v5693_v34  ;;  %v3181_v48 = vadd.f32 %v3180_v5, %v3179_v3  ;;  %v6617_v61 = vld [vmem:[#allocation20_spill] sm:$0xff]  ;;  %v3184_v35 = vsel %vm3060_vm2, %v2353_v36, 0.0 }
 0x17c   : > { %2992 = vst.msk [vmem:[%s4926_s13 + $0xf0] sm:$0xf] %vm2931_vm1, %v4164_v17  ;;  %v3571_v50 = vsel %vm3060_vm2, %v3384_v63, 0.0  ;;  %v5963_v7 = vmul.f32 %v5818_v56, %v5563_v54  ;;  %v5967_v58 = vmul.f32 %v5816_v55, %v5578_v42  ;;  %v3386_v49 = vmul.f32 %v2353_v36, %v2353_v36  ;;  %v6618_v60 = vld [vmem:[#allocation21_spill] sm:$0xff] }
 0x17d   : > { %v5944_v14 = vpop.permute.xlu1 %2238  ;;  %v3572_v40 = vadd.f32 %v3571_v50, %v3570_v1  ;;  %v4167_v20 = vpack.c.bf16 %v2354_v29, %v2354_v29  ;;  %v4165_v46 = vpack.c.bf16 %v2352_v30, %v2352_v30  ;;  %v3182_v13 = vsel %vm3060_vm2, %v2352_v30, 0.0 }
 0x17e   : > { %v5946_v45 = vpop.permute.xlu0 %2233  ;;  %v3385_v34 = vmul.f32 %v2352_v30, %v2352_v30  ;;  %v4212_v38 = vpack.c.bf16 %v5963_v7, %v5963_v7  ;;  %v3388_v54 = vmul.f32 %v6617_v61, %v6617_v61  ;;  %v3183_v56 = vadd.f32 %v3182_v13, %v3181_v48 }
 0x17f   : > { %2995 = vst.msk [vmem:[%s4926_s13 + $0xfc] sm:$0xf] %vm2931_vm1, %v4167_v20  ;;  %v3387_v44 = vmul.f32 %v2354_v29, %v2354_v29  ;;  %2993 = vst.msk [vmem:[%s4926_s13 + $0xf4] sm:$0xf] %vm2931_vm1, %v4165_v46  ;;  %v4213_v31 = vpack.c.bf16 %v5967_v58, %v5967_v58  ;;  %v3575_v17 = vsel %vm3060_vm2, %v3386_v49, 0.0  ;;  %v5991_v5 = vmul.f32 %v5567_v37, %v5846_v27  ;;  %v6619_v20 = vld [vmem:[#allocation23_spill] sm:$0xff] }
 0x180   : > { %v3573_v47 = vsel %vm3060_vm2, %v3385_v34, 0.0  ;;  %3040 = vst.msk [vmem:[%s4926_s13 + $0x1b0] sm:$0xf] %vm2931_vm1, %v4212_v38  ;;  %v3185_v21 = vadd.f32 %v3184_v35, %v3183_v56  ;;  %v3186_v36 = vsel %vm3060_vm2, %v2354_v29, 0.0  ;;  %v5998_v63 = vmul.f32 %v5547_v26, %v5848_v9  ;;  %v6620_v38 = vld [vmem:[#allocation22_spill] sm:$0xff] }
 0x181   : > { %v5976_v42 = vpop.permute.xlu1 %2248  ;;  %v3574_v3 = vadd.f32 %v3573_v47, %v3572_v40  ;;  %3041 = vst.msk [vmem:[%s4926_s13 + $0x1b4] sm:$0xf] %vm2931_vm1, %v4213_v31  ;;  %v6002_v1 = vmul.f32 %v5882_v0, %v5614_v41  ;;  %v6006_v43 = vmul.f32 %v5880_v28, %v5635_v19  ;;  %v3389_v37 = vmul.f32 %v6618_v60, %v6618_v60 }
 0x182   : > { %v5978_v55 = vpop.permute.xlu0 %2243  ;;  %v3187_v27 = vadd.f32 %v3186_v36, %v3185_v21  ;;  %v4215_v30 = vpack.c.bf16 %v5991_v5, %v5991_v5  ;;  %v3188_v26 = vsel %vm3060_vm2, %v6617_v61, 0.0  ;;  %v3577_v9 = vsel %vm3060_vm2, %v3387_v44, 0.0 }
 0x183   : > { %v3576_v29 = vadd.f32 %v3575_v17, %v3574_v3  ;;  %v4214_v41 = vpack.c.bf16 %v5998_v63, %v5998_v63  ;;  %v4216_v0 = vpack.c.bf16 %v6002_v1, %v6002_v1  ;;  %v3579_v49 = vsel %vm3060_vm2, %v3388_v54, 0.0 }
 0x184   : > { %v3189_v19 = vadd.f32 %v3188_v26, %v3187_v27  ;;  %3043 = vst.msk [vmem:[%s4926_s13 + $0x1bc] sm:$0xf] %vm2931_vm1, %v4215_v30  ;;  %v3190_v40 = vsel %vm3060_vm2, %v6618_v60, 0.0  ;;  %v3390_v46 = vmul.f32 %v6619_v20, %v6619_v20  ;;  %v4217_v13 = vpack.c.bf16 %v6006_v43, %v6006_v43 }
 0x185   : > { %v3578_v28 = vadd.f32 %v3577_v9, %v3576_v29  ;;  %v6021_v48 = vpop.permute.xlu1 %2258  ;;  %3042 = vst.msk [vmem:[%s4926_s13 + $0x1b8] sm:$0xf] %vm2931_vm1, %v4214_v41  ;;  %v3581_v34 = vsel %vm3060_vm2, %v3389_v37, 0.0  ;;  %v3391_v61 = vmul.f32 %v6620_v38, %v6620_v38  ;;  %3044 = vst.msk [vmem:[%s4926_s13 + $0x1c0] sm:$0xf] %vm2931_vm1, %v4216_v0  ;;  %v3192_v54 = vsel %vm3060_vm2, %v6619_v20, 0.0 }
 0x186   : > { %v2254_v50 = vpop.permute.xlu0 %2253  ;;  %v3191_v56 = vadd.f32 %v3190_v40, %v3189_v19  ;;  %3045 = vst.msk [vmem:[%s4926_s13 + $0x1c4] sm:$0xf] %vm2931_vm1, %v4217_v13  ;;  %v6043_v44 = vmul.f32 %v5620_v8, %v5910_v24  ;;  %v6047_v47 = vmul.f32 %v5607_v4, %v5912_v11  ;;  %v6051_v31 = vmul.f32 %v5946_v45, %v5672_v59  ;;  %v6621_v24 = vld [vmem:[#allocation24_spill] sm:$0xff]  ;;  %v6624_v20 = vld [vmem:[#allocation27_spill] sm:$0xff] }
 0x187   : > { %v3580_v35 = vadd.f32 %v3579_v49, %v3578_v28  ;;  %v3194_v17 = vsel %vm3060_vm2, %v6620_v38, 0.0  ;;  %v6057_v36 = vmul.f32 %v5944_v14, %v5695_v18  ;;  %v3583_v8 = vsel %vm3060_vm2, %v3390_v46, 0.0  ;;  %v6622_v14 = vld [vmem:[#allocation25_spill] sm:$0xff]  ;;  %v6623_v49 = vld [vmem:[#allocation26_spill] sm:$0xff]  ;;  %v6625_v13 = vld [vmem:[#allocation3_spill] sm:$0xff] }
 0x188   : > { %v3193_v21 = vadd.f32 %v3192_v54, %v3191_v56  ;;  %v3392_v4 = vmul.f32 %v6621_v24, %v6621_v24  ;;  %v4219_v59 = vpack.c.bf16 %v6043_v44, %v6043_v44  ;;  %v4218_v11 = vpack.c.bf16 %v6047_v47, %v6047_v47  ;;  %v6626_v56 = vld [vmem:[#allocation53_spill] sm:$0xff] }
 0x189   : > { %v3582_v3 = vadd.f32 %v3581_v34, %v3580_v35  ;;  %v2269_v37 = vpop.permute.xlu1 %2268  ;;  %v3585_v29 = vsel %vm3060_vm2, %v3391_v61, 0.0  ;;  %v3196_v18 = vsel %vm3060_vm2, %v6621_v24, 0.0  ;;  %v3393_v30 = vmul.f32 %v6622_v14, %v6622_v14 }
 0x18a   : > { %v3195_v45 = vadd.f32 %v3194_v17, %v3193_v21  ;;  %v2264_v27 = vpop.permute.xlu0 %2263  ;;  %3047 = vst.msk [vmem:[%s4926_s13 + $0x1cc] sm:$0xf] %vm2931_vm1, %v4219_v59  ;;  %3046 = vst.msk [vmem:[%s4926_s13 + $0x1c8] sm:$0xf] %vm2931_vm1, %v4218_v11  ;;  %v4220_v26 = vpack.c.bf16 %v6051_v31, %v6051_v31  ;;  %v3198_v9 = vsel %vm3060_vm2, %v6622_v14, 0.0  ;;  %v4221_v28 = vpack.c.bf16 %v6057_v36, %v6057_v36  ;;  %v6627_v11 = vld [vmem:[#allocation28_spill] sm:$0xff] }
 0x18b   : > { %v3584_v60 = vadd.f32 %v3583_v8, %v3582_v3  ;;  %v3587_v0 = vsel %vm3060_vm2, %v3392_v4, 0.0  ;;  %v3395_v40 = vmul.f32 %v6623_v49, %v6623_v49  ;;  %v3394_v46 = vmul.f32 %v6624_v20, %v6624_v20 }
 0x18c   : > { %v3197_v41 = vadd.f32 %v3196_v18, %v3195_v45  ;;  %3048 = vst.msk [vmem:[%s4926_s13 + $0x1d0] sm:$0xf] %vm2931_vm1, %v4220_v26  ;;  %v6090_v34 = vmul.f32 %v6625_v13, %v5976_v42  ;;  %3049 = vst.msk [vmem:[%s4926_s13 + $0x1d4] sm:$0xf] %vm2931_vm1, %v4221_v28  ;;  %v6096_v35 = vmul.f32 %v6626_v56, %v5978_v55  ;;  %v3589_v17 = vsel %vm3060_vm2, %v3393_v30, 0.0  ;;  %v6628_v26 = vld [vmem:[#allocation29_spill] sm:$0xff] }
 0x18d   : > { %v3586_v19 = vadd.f32 %v3585_v29, %v3584_v60  ;;  %v6099_v54 = vmul.f32 %v2254_v50, %v5731_v16  ;;  %v3200_v21 = vsel %vm3060_vm2, %v6624_v20, 0.0  ;;  %v3202_v3 = vsel %vm3060_vm2, %v6623_v49, 0.0  ;;  %v2279_v16 = vpop.permute.xlu1 %2278  ;;  %v6629_v20 = vld [vmem:[#allocation31_spill] sm:$0xff] }
 0x18e   : > { %v3199_v38 = vadd.f32 %v3198_v9, %v3197_v41  ;;  %v4223_v42 = vpack.c.bf16 %v6090_v34, %v6090_v34  ;;  %v4222_v55 = vpack.c.bf16 %v6096_v35, %v6096_v35  ;;  %v2274_v50 = vpop.permute.xlu0 %2273  ;;  %v3593_v4 = vsel %vm3060_vm2, %v3395_v40, 0.0 }
 0x18f   : > { %v3588_v61 = vadd.f32 %v3587_v0, %v3586_v19  ;;  %v3591_v59 = vsel %vm3060_vm2, %v3394_v46, 0.0  ;;  %v3396_v45 = vmul.f32 %v6627_v11, %v6627_v11  ;;  %v4224_v60 = vpack.c.bf16 %v6099_v54, %v6099_v54 }
 0x190   : > { %v3201_v8 = vadd.f32 %v3200_v21, %v3199_v38  ;;  %3051 = vst.msk [vmem:[%s4926_s13 + $0x1dc] sm:$0xf] %vm2931_vm1, %v4223_v42  ;;  %v3204_v29 = vsel %vm3060_vm2, %v6627_v11, 0.0  ;;  %3050 = vst.msk [vmem:[%s4926_s13 + $0x1d8] sm:$0xf] %vm2931_vm1, %v4222_v55  ;;  %v6124_v30 = vmul.f32 %v6021_v48, %v5746_v57  ;;  %v3397_v9 = vmul.f32 %v6628_v26, %v6628_v26  ;;  %v6630_v38 = vld [vmem:[#allocation30_spill] sm:$0xff] }
 0x191   : > { %v3590_v24 = vadd.f32 %v3589_v17, %v3588_v61  ;;  %3052 = vst.msk [vmem:[%s4926_s13 + $0x1e0] sm:$0xf] %vm2931_vm1, %v4224_v60  ;;  %v6131_v41 = vmul.f32 %v5733_v51, %v2269_v37  ;;  %v6134_v19 = vmul.f32 %v5717_v62, %v2264_v27  ;;  %v6137_v28 = vmul.f32 %v2274_v50, %v5776_v15  ;;  %v2289_v46 = vpop.permute.xlu1 %2288  ;;  %v6631_v55 = vld [vmem:[#allocation32_spill] sm:$0xff] }
 0x192   : > { %v3203_v18 = vadd.f32 %v3202_v3, %v3201_v8  ;;  %v4225_v57 = vpack.c.bf16 %v6124_v30, %v6124_v30  ;;  %v3595_v48 = vsel %vm3060_vm2, %v3396_v45, 0.0  ;;  %v3206_v40 = vsel %vm3060_vm2, %v6628_v26, 0.0  ;;  %v2284_v21 = vpop.permute.xlu0 %2283 }
 0x193   : > { %v3592_v14 = vadd.f32 %v3591_v59, %v3590_v24  ;;  %v3398_v51 = vmul.f32 %v6629_v20, %v6629_v20  ;;  %v4227_v62 = vpack.c.bf16 %v6131_v41, %v6131_v41  ;;  %v4226_v27 = vpack.c.bf16 %v6134_v19, %v6134_v19 }
 0x194   : > { %v3205_v0 = vadd.f32 %v3204_v29, %v3203_v18  ;;  %3053 = vst.msk [vmem:[%s4926_s13 + $0x1e4] sm:$0xf] %vm2931_vm1, %v4225_v57  ;;  %v3597_v13 = vsel %vm3060_vm2, %v3397_v9, 0.0  ;;  %v3399_v61 = vmul.f32 %v6630_v38, %v6630_v38  ;;  %v3208_v56 = vsel %vm3060_vm2, %v6629_v20, 0.0 }
 0x195   : > { %v3594_v49 = vadd.f32 %v3593_v4, %v3592_v14  ;;  %3055 = vst.msk [vmem:[%s4926_s13 + $0x1ec] sm:$0xf] %vm2931_vm1, %v4227_v62  ;;  %v4228_v17 = vpack.c.bf16 %v6137_v28, %v6137_v28  ;;  %v3210_v42 = vsel %vm3060_vm2, %v6630_v38, 0.0  ;;  %3054 = vst.msk [vmem:[%s4926_s13 + $0x1e8] sm:$0xf] %vm2931_vm1, %v4226_v27  ;;  %v3599_v24 = vsel %vm3060_vm2, %v3398_v51, 0.0 }
 0x196   : > { %v3207_v15 = vadd.f32 %v3206_v40, %v3205_v0  ;;  %v3400_v50 = vmul.f32 %v6631_v55, %v6631_v55  ;;  %v6171_v4 = vmul.f32 %v2279_v16, %v5795_v10  ;;  %v6174_v59 = vmul.f32 %v5782_v53, %v2289_v46  ;;  %v6632_v14 = vld [vmem:[#allocation33_spill] sm:$0xff]  ;;  %v6634_v62 = vld [vmem:[#allocation35_spill] sm:$0xff] }
 0x197   : > { %v3596_v37 = vadd.f32 %v3595_v48, %v3594_v49  ;;  %3056 = vst.msk [vmem:[%s4926_s13 + $0x1f0] sm:$0xf] %vm2931_vm1, %v4228_v17  ;;  %v6177_v60 = vmul.f32 %v5769_v12, %v2284_v21  ;;  %v3601_v29 = vsel %vm3060_vm2, %v3399_v61, 0.0  ;;  %v3212_v18 = vsel %vm3060_vm2, %v6631_v55, 0.0  ;;  %v6633_v49 = vld [vmem:[#allocation36_spill] sm:$0xff]  ;;  %v6635_v61 = vld [vmem:[#allocation39_spill] sm:$0xff] }
 0x198   : > { %v3209_v3 = vadd.f32 %v3208_v56, %v3207_v15  ;;  %v3401_v26 = vmul.f32 %v6632_v14, %v6632_v14  ;;  %v4229_v10 = vpack.c.bf16 %v6171_v4, %v6171_v4  ;;  %v4231_v9 = vpack.c.bf16 %v6174_v59, %v6174_v59 }
 0x199   : > { %v3598_v8 = vadd.f32 %v3597_v13, %v3596_v37  ;;  %v3603_v12 = vsel %vm3060_vm2, %v3400_v50, 0.0  ;;  %v3214_v0 = vsel %vm3060_vm2, %v6632_v14, 0.0  ;;  %v3402_v57 = vmul.f32 %v6633_v49, %v6633_v49 }
 0x19a   : > { %v3211_v11 = vadd.f32 %v3210_v42, %v3209_v3  ;;  %3057 = vst.msk [vmem:[%s4926_s13 + $0x1f4] sm:$0xf] %vm2931_vm1, %v4229_v10  ;;  %v4230_v48 = vpack.c.bf16 %v6177_v60, %v6177_v60  ;;  %3059 = vst.msk [vmem:[%s4926_s13 + $0x1fc] sm:$0xf] %vm2931_vm1, %v4231_v9  ;;  %v3605_v51 = vsel %vm3060_vm2, %v3401_v26, 0.0  ;;  %v3403_v15 = vmul.f32 %v6634_v62, %v6634_v62 }
 0x19b   : > { %v3600_v45 = vadd.f32 %v3599_v24, %v3598_v8  ;;  %v3216_v37 = vsel %vm3060_vm2, %v6633_v49, 0.0  ;;  %v3218_v13 = vsel %vm3060_vm2, %v6634_v62, 0.0  ;;  %v3607_v38 = vsel %vm3060_vm2, %v3402_v57, 0.0  ;;  %v6636_v8 = vld [vmem:[#allocation40_spill] sm:$0xff] }
 0x19c   : > { %v3213_v53 = vadd.f32 %v3212_v18, %v3211_v11  ;;  %3058 = vst.msk [vmem:[%s4926_s13 + $0x1f8] sm:$0xf] %vm2931_vm1, %v4230_v48  ;;  %v3404_v56 = vmul.f32 %v6635_v61, %v6635_v61  ;;  %v3609_v42 = vsel %vm3060_vm2, %v3403_v15, 0.0  ;;  %v3220_v3 = vsel %vm3060_vm2, %v6635_v61, 0.0  ;;  %v6639_v48 = vld [vmem:[#allocation45_spill] sm:$0xff] }
 0x19d   : > { %v3602_v16 = vadd.f32 %v3601_v29, %v3600_v45  ;;  %v3405_v24 = vmul.f32 %v6636_v8, %v6636_v8  ;;  %v3222_v45 = vsel %vm3060_vm2, %v6636_v8, 0.0  ;;  %v6637_v29 = vld [vmem:[#allocation42_spill] sm:$0xff]  ;;  %v3228_v15 = vsel %vm3060_vm2, %v6639_v48, 0.0  ;;  %v6642_v8 = vld [vmem:[#allocation47_spill] sm:$0xff] }
 0x19e   : > { %v3215_v40 = vadd.f32 %v3214_v0, %v3213_v53  ;;  %v3611_v11 = vsel %vm3060_vm2, %v3404_v56, 0.0  ;;  %v3406_v18 = vmul.f32 %v6637_v29, %v6637_v29  ;;  %v6638_v53 = vld [vmem:[#allocation41_spill] sm:$0xff]  ;;  %v3224_v9 = vsel %vm3060_vm2, %v6637_v29, 0.0  ;;  %v6641_v56 = vld [vmem:[#allocation48_spill] sm:$0xff] }
 0x19f   : > { %v3604_v20 = vadd.f32 %v3603_v12, %v3602_v16  ;;  %v3613_v10 = vsel %vm3060_vm2, %v3405_v24, 0.0  ;;  %v3407_v16 = vmul.f32 %v6638_v53, %v6638_v53  ;;  %v3226_v49 = vsel %vm3060_vm2, %v6638_v53, 0.0 }
 0x1a0   : > { %v3217_v27 = vadd.f32 %v3216_v37, %v3215_v40  ;;  %v3615_v57 = vsel %vm3060_vm2, %v3406_v18, 0.0  ;;  %v3408_v40 = vmul.f32 %v6639_v48, %v6639_v48  ;;  %v6640_v37 = vld [vmem:[#allocation46_spill] sm:$0xff]  ;;  %v3411_v24 = vmul.f32 %v6642_v8, %v6642_v8  ;;  %v6643_v18 = vld [vmem:[#allocation49_spill] sm:$0xff] }
 0x1a1   : > { %v3606_v46 = vadd.f32 %v3605_v51, %v3604_v20  ;;  %v3617_v62 = vsel %vm3060_vm2, %v3407_v16, 0.0  ;;  %v3230_v61 = vsel %vm3060_vm2, %v6640_v37, 0.0  ;;  %v3236_v16 = vsel %vm3060_vm2, %v6643_v18, 0.0 }
 0x1a2   : > { %v3219_v17 = vadd.f32 %v3218_v13, %v3217_v27  ;;  %v3409_v27 = vmul.f32 %v6640_v37, %v6640_v37  ;;  %v3625_v53 = vsel %vm3060_vm2, %v3411_v24, 0.0  ;;  %v6646_v37 = vld [vmem:[#allocation51_spill] sm:$0xff] }
 0x1a3   : > { %v3608_v21 = vadd.f32 %v3607_v38, %v3606_v46  ;;  %v3619_v38 = vsel %vm3060_vm2, %v3408_v40, 0.0  ;;  %v6645_v40 = vld [vmem:[#allocation52_spill] sm:$0xff] }
 0x1a4   : > { %v3221_v55 = vadd.f32 %v3220_v3, %v3219_v17  ;;  %v3410_v17 = vmul.f32 %v6641_v56, %v6641_v56  ;;  %v3621_v3 = vsel %vm3060_vm2, %v3409_v27, 0.0  ;;  %v3415_v27 = vmul.f32 %v6646_v37, %v6646_v37 }
 0x1a5   : > { %v3610_v50 = vadd.f32 %v3609_v42, %v3608_v21 }
 0x1a6   : > { %v3223_v14 = vadd.f32 %v3222_v45, %v3221_v55  ;;  %v3232_v55 = vsel %vm3060_vm2, %v6641_v56, 0.0  ;;  %v3234_v45 = vsel %vm3060_vm2, %v6642_v8, 0.0  ;;  %v3623_v29 = vsel %vm3060_vm2, %v3410_v17, 0.0  ;;  %v6647_v17 = vld [vmem:[#allocation2_spill] sm:$0xff] }
 0x1a7   : > { %v3612_v26 = vadd.f32 %v3611_v11, %v3610_v50  ;;  %v3633_v8 = vsel %vm3060_vm2, %v3415_v27, 0.0  ;;  %v3244_v24 = vsel %vm3060_vm2, %v6647_v17, 0.0  ;;  %v6651_v27 = vld [vmem:[#allocation5_spill] sm:$0xff] }
 0x1a8   : > { %v3225_v12 = vadd.f32 %v3224_v9, %v3223_v14  ;;  %v3412_v14 = vmul.f32 %v6643_v18, %v6643_v18  ;;  %v6644_v9 = vld [vmem:[#allocation50_spill] sm:$0xff] }
 0x1a9   : > { %v3614_v0 = vadd.f32 %v3613_v10, %v3612_v26  ;;  %v3238_v48 = vsel %vm3060_vm2, %v6644_v9, 0.0 }
 0x1aa   : > { %v3227_v20 = vadd.f32 %v3226_v49, %v3225_v12  ;;  %v3413_v12 = vmul.f32 %v6644_v9, %v6644_v9  ;;  %v6650_v9 = vld [vmem:[#allocation7_spill] sm:$0xff] }
 0x1ab   : > { %v3616_v51 = vadd.f32 %v3615_v57, %v3614_v0  ;;  %v3627_v57 = vsel %vm3060_vm2, %v3412_v14, 0.0  ;;  %v6649_v14 = vld [vmem:[#allocation55_spill] sm:$0xff] }
 0x1ac   : > { %v3229_v46 = vadd.f32 %v3228_v15, %v3227_v20  ;;  %v3414_v20 = vmul.f32 %v6645_v40, %v6645_v40  ;;  %v3629_v15 = vsel %vm3060_vm2, %v3413_v12, 0.0  ;;  %v3419_v12 = vmul.f32 %v6650_v9, %v6650_v9 }
 0x1ad   : > { %v3618_v13 = vadd.f32 %v3617_v62, %v3616_v51 }
 0x1ae   : > { %v3231_v42 = vadd.f32 %v3230_v61, %v3229_v46  ;;  %v3240_v46 = vsel %vm3060_vm2, %v6645_v40, 0.0  ;;  %v3242_v61 = vsel %vm3060_vm2, %v6646_v37, 0.0  ;;  %v3631_v56 = vsel %vm3060_vm2, %v3414_v20, 0.0 }
 0x1af   : > { %v3620_v21 = vadd.f32 %v3619_v38, %v3618_v13  ;;  %v3420_v20 = vmul.f32 %v5763_v2, %v5763_v2  ;;  %v3252_v37 = vsel %vm3060_vm2, %v5763_v2, 0.0 }
 0x1b0   : > { %v3233_v50 = vadd.f32 %v3232_v55, %v3231_v42  ;;  %v6648_v55 = vld [vmem:[#allocation54_spill] sm:$0xff] }
 0x1b1   : > { %v3622_v11 = vadd.f32 %v3621_v3, %v3620_v21  ;;  %v3416_v21 = vmul.f32 %v6647_v17, %v6647_v17  ;;  %v3246_v18 = vsel %vm3060_vm2, %v6648_v55, 0.0  ;;  %v6652_v17 = vld [vmem:[#allocation4_spill] sm:$0xff] }
 0x1b2   : > { %v3235_v26 = vadd.f32 %v3234_v45, %v3233_v50  ;;  %v3417_v50 = vmul.f32 %v6648_v55, %v6648_v55  ;;  %v3256_v55 = vsel %vm3060_vm2, %v6652_v17, 0.0 }
 0x1b3   : > { %v3624_v10 = vadd.f32 %v3623_v29, %v3622_v11  ;;  %v3635_v29 = vsel %vm3060_vm2, %v3416_v21, 0.0  ;;  %v3422_v21 = vmul.f32 %v6652_v17, %v6652_v17 }
 0x1b4   : > { %v3237_v0 = vadd.f32 %v3236_v16, %v3235_v26  ;;  %v3418_v26 = vmul.f32 %v6649_v14, %v6649_v14  ;;  %v3637_v16 = vsel %vm3060_vm2, %v3417_v50, 0.0 }
 0x1b5   : > { %v3626_v49 = vadd.f32 %v3625_v53, %v3624_v10 }
 0x1b6   : > { %v3239_v51 = vadd.f32 %v3238_v48, %v3237_v0  ;;  %v3248_v0 = vsel %vm3060_vm2, %v6649_v14, 0.0  ;;  %v3250_v48 = vsel %vm3060_vm2, %v6650_v9, 0.0  ;;  %v3639_v40 = vsel %vm3060_vm2, %v3418_v26, 0.0 }
 0x1b7   : > { %v3628_v62 = vadd.f32 %v3627_v57, %v3626_v49 }
 0x1b8   : > { %v3241_v13 = vadd.f32 %v3240_v46, %v3239_v51  ;;  %v3421_v46 = vmul.f32 %v6651_v27, %v6651_v27 }
 0x1b9   : > { %v3630_v38 = vadd.f32 %v3629_v15, %v3628_v62  ;;  %v3641_v15 = vsel %vm3060_vm2, %v3419_v12, 0.0 }
 0x1ba   : > { %v3243_v42 = vadd.f32 %v3242_v61, %v3241_v13  ;;  %v3643_v61 = vsel %vm3060_vm2, %v3420_v20, 0.0 }
 0x1bb   : > { %v3632_v3 = vadd.f32 %v3631_v56, %v3630_v38  ;;  %v3254_v56 = vsel %vm3060_vm2, %v6651_v27, 0.0  ;;  %v3428_v27 = vmul.f32 %v5899_v22, %v5899_v22 }
 0x1bc   : > { %v3245_v11 = vadd.f32 %v3244_v24, %v3243_v42  ;;  %v6653_v24 = vld [vmem:[#allocation6_spill] sm:$0xff] }
 0x1bd   : > { %v3634_v45 = vadd.f32 %v3633_v8, %v3632_v3  ;;  %v3645_v8 = vsel %vm3060_vm2, %v3421_v46, 0.0  ;;  %v3423_v2 = vmul.f32 %v6653_v24, %v6653_v24 }
 0x1be   : > { %v3247_v10 = vadd.f32 %v3246_v18, %v3245_v11  ;;  %v3424_v18 = vmul.f32 %v5835_v6, %v5835_v6 }
 0x1bf   : > { %v3636_v53 = vadd.f32 %v3635_v29, %v3634_v45  ;;  %v3258_v45 = vsel %vm3060_vm2, %v6653_v24, 0.0  ;;  %v3647_v29 = vsel %vm3060_vm2, %v3422_v21, 0.0  ;;  %v3659_v21 = vsel %vm3060_vm2, %v3428_v27, 0.0 }
 0x1c0   : > { %v3249_v49 = vadd.f32 %v3248_v0, %v3247_v10  ;;  %v3649_v10 = vsel %vm3060_vm2, %v3423_v2, 0.0  ;;  %v3651_v0 = vsel %vm3060_vm2, %v3424_v18, 0.0  ;;  %v3272_v2 = vsel %vm3060_vm2, %v5933_v33, 0.0 }
 0x1c1   : > { %v3638_v57 = vadd.f32 %v3637_v16, %v3636_v53  ;;  %v3260_v53 = vsel %vm3060_vm2, %v5835_v6, 0.0  ;;  %v3425_v16 = vmul.f32 %v5839_v32, %v5839_v32  ;;  %v3427_v6 = vmul.f32 %v5865_v23, %v5865_v23 }
 0x1c2   : > { %v3251_v51 = vadd.f32 %v3250_v48, %v3249_v49  ;;  %v3262_v49 = vsel %vm3060_vm2, %v5839_v32, 0.0 }
 0x1c3   : > { %v3640_v62 = vadd.f32 %v3639_v40, %v3638_v57  ;;  %v3426_v57 = vmul.f32 %v5869_v25, %v5869_v25  ;;  %v3653_v20 = vsel %vm3060_vm2, %v3425_v16, 0.0 }
 0x1c4   : > { %v3253_v13 = vadd.f32 %v3252_v37, %v3251_v51  ;;  %v3264_v51 = vsel %vm3060_vm2, %v5869_v25, 0.0  ;;  %v3266_v37 = vsel %vm3060_vm2, %v5865_v23, 0.0  ;;  %v3429_v25 = vmul.f32 %v5903_v39, %v5903_v39 }
 0x1c5   : > { %v3642_v38 = vadd.f32 %v3641_v15, %v3640_v62  ;;  %v3655_v32 = vsel %vm3060_vm2, %v3426_v57, 0.0  ;;  %v3270_v23 = vsel %vm3060_vm2, %v5903_v39, 0.0  ;;  %v3280_v57 = vsel %vm3060_vm2, %v5998_v63, 0.0 }
 0x1c6   : > { %v3255_v42 = vadd.f32 %v3254_v56, %v3253_v13  ;;  %v3661_v24 = vsel %vm3060_vm2, %v3429_v25, 0.0 }
 0x1c7   : > { %v3644_v3 = vadd.f32 %v3643_v61, %v3642_v38  ;;  %v3657_v38 = vsel %vm3060_vm2, %v3427_v6, 0.0  ;;  %v3268_v61 = vsel %vm3060_vm2, %v5899_v22, 0.0  ;;  %v3431_v22 = vmul.f32 %v5929_v52, %v5929_v52 }
 0x1c8   : > { %v3257_v50 = vadd.f32 %v3256_v55, %v3255_v42  ;;  %v3430_v42 = vmul.f32 %v5933_v33, %v5933_v33  ;;  %v3433_v33 = vmul.f32 %v5967_v58, %v5967_v58  ;;  %v3436_v6 = vmul.f32 %v6002_v1, %v6002_v1 }
 0x1c9   : > { %v3646_v11 = vadd.f32 %v3645_v8, %v3644_v3 }
 0x1ca   : > { %v3259_v14 = vadd.f32 %v3258_v45, %v3257_v50  ;;  %v3663_v39 = vsel %vm3060_vm2, %v3430_v42, 0.0  ;;  %v3432_v45 = vmul.f32 %v5963_v7, %v5963_v7  ;;  %v3440_v42 = vmul.f32 %v6051_v31, %v6051_v31 }
 0x1cb   : > { %v3648_v26 = vadd.f32 %v3647_v29, %v3646_v11  ;;  %v3274_v11 = vsel %vm3060_vm2, %v5929_v52, 0.0  ;;  %v3278_v52 = vsel %vm3060_vm2, %v5967_v58, 0.0 }
 0x1cc   : > { %v3261_v9 = vadd.f32 %v3260_v53, %v3259_v14  ;;  %v3665_v14 = vsel %vm3060_vm2, %v3431_v22, 0.0  ;;  %v3667_v16 = vsel %vm3060_vm2, %v3432_v45, 0.0  ;;  %v3292_v22 = vsel %vm3060_vm2, %v6051_v31, 0.0 }
 0x1cd   : > { %v3650_v12 = vadd.f32 %v3649_v10, %v3648_v26  ;;  %v3276_v26 = vsel %vm3060_vm2, %v5963_v7, 0.0  ;;  %v3435_v7 = vmul.f32 %v5991_v5, %v5991_v5  ;;  %v3443_v31 = vmul.f32 %v6090_v34, %v6090_v34 }
 0x1ce   : > { %v3263_v48 = vadd.f32 %v3262_v49, %v3261_v9  ;;  %v3434_v9 = vmul.f32 %v5998_v63, %v5998_v63  ;;  %v3669_v49 = vsel %vm3060_vm2, %v3433_v33, 0.0  ;;  %v3437_v63 = vmul.f32 %v6006_v43, %v6006_v43 }
 0x1cf   : > { %v3652_v40 = vadd.f32 %v3651_v0, %v3650_v12  ;;  %v3298_v33 = vsel %vm3060_vm2, %v6090_v34, 0.0  ;;  %v3302_v34 = vsel %vm3060_vm2, %v6124_v30, 0.0 }
 0x1d0   : > { %v3265_v62 = vadd.f32 %v3264_v51, %v3263_v48  ;;  %v3671_v58 = vsel %vm3060_vm2, %v3434_v9, 0.0  ;;  %v3677_v25 = vsel %vm3060_vm2, %v3437_v63, 0.0  ;;  %v3300_v9 = vsel %vm3060_vm2, %v6099_v54, 0.0 }
 0x1d1   : > { %v3654_v15 = vadd.f32 %v3653_v20, %v3652_v40  ;;  %v3282_v20 = vsel %vm3060_vm2, %v5991_v5, 0.0  ;;  %v3286_v5 = vsel %vm3060_vm2, %v6006_v43, 0.0 }
 0x1d2   : > { %v3267_v46 = vadd.f32 %v3266_v37, %v3265_v62  ;;  %v3284_v37 = vsel %vm3060_vm2, %v6002_v1, 0.0  ;;  %v3439_v1 = vmul.f32 %v6043_v44, %v6043_v44 }
 0x1d3   : > { %v3656_v13 = vadd.f32 %v3655_v32, %v3654_v15  ;;  %v3673_v15 = vsel %vm3060_vm2, %v3435_v7, 0.0  ;;  %v3446_v7 = vmul.f32 %v6134_v19, %v6134_v19 }
 0x1d4   : > { %v3269_v56 = vadd.f32 %v3268_v61, %v3267_v46  ;;  %v3675_v46 = vsel %vm3060_vm2, %v3436_v6, 0.0 }
 0x1d5   : > { %v3658_v17 = vadd.f32 %v3657_v38, %v3656_v13  ;;  %v3438_v13 = vmul.f32 %v6047_v47, %v6047_v47 }
 0x1d6   : > { %v3271_v3 = vadd.f32 %v3270_v23, %v3269_v56  ;;  %v3288_v56 = vsel %vm3060_vm2, %v6047_v47, 0.0  ;;  %v3290_v23 = vsel %vm3060_vm2, %v6043_v44, 0.0  ;;  %v3441_v47 = vmul.f32 %v6057_v36, %v6057_v36 }
 0x1d7   : > { %v3660_v8 = vadd.f32 %v3659_v21, %v3658_v17  ;;  %v3679_v43 = vsel %vm3060_vm2, %v3438_v13, 0.0  ;;  %v3294_v44 = vsel %vm3060_vm2, %v6057_v36, 0.0  ;;  %v3450_v13 = vmul.f32 %v6177_v60, %v6177_v60 }
 0x1d8   : > { %v3273_v55 = vadd.f32 %v3272_v2, %v3271_v3 }
 0x1d9   : > { %v3662_v50 = vadd.f32 %v3661_v24, %v3660_v8  ;;  %v3681_v24 = vsel %vm3060_vm2, %v3439_v1, 0.0  ;;  %v3312_v1 = vsel %vm3060_vm2, %v6177_v60, 0.0 }
 0x1da   : > { %v3275_v29 = vadd.f32 %v3274_v11, %v3273_v55  ;;  %v3442_v11 = vmul.f32 %v6096_v35, %v6096_v35 }
 0x1db   : > { %v3664_v18 = vadd.f32 %v3663_v39, %v3662_v50  ;;  %v3683_v50 = vsel %vm3060_vm2, %v3440_v42, 0.0 }
 0x1dc   : > { %v3277_v10 = vadd.f32 %v3276_v26, %v3275_v29  ;;  %v3685_v29 = vsel %vm3060_vm2, %v3441_v47, 0.0  ;;  %v3687_v36 = vsel %vm3060_vm2, %v3442_v11, 0.0 }
 0x1dd   : > { %v3666_v53 = vadd.f32 %v3665_v14, %v3664_v18  ;;  %v3296_v18 = vsel %vm3060_vm2, %v6096_v35, 0.0  ;;  %v3445_v35 = vmul.f32 %v6124_v30, %v6124_v30  ;;  %v3695_v30 = vsel %vm3060_vm2, %v3446_v7, 0.0 }
 0x1de   : > { %v3279_v0 = vadd.f32 %v3278_v52, %v3277_v10  ;;  %v3444_v10 = vmul.f32 %v6099_v54, %v6099_v54  ;;  %v3689_v52 = vsel %vm3060_vm2, %v3443_v31, 0.0  ;;  %v3447_v54 = vmul.f32 %v6131_v41, %v6131_v41 }
 0x1df   : > { %v3668_v12 = vadd.f32 %v3667_v16, %v3666_v53 }
 0x1e0   : > { %v3281_v40 = vadd.f32 %v3280_v57, %v3279_v0  ;;  %v3697_v63 = vsel %vm3060_vm2, %v3447_v54, 0.0 }
 0x1e1   : > { %v3670_v48 = vadd.f32 %v3669_v49, %v3668_v12  ;;  %v3691_v49 = vsel %vm3060_vm2, %v3444_v10, 0.0 }
 0x1e2   : > { %v3283_v62 = vadd.f32 %v3282_v20, %v3281_v40  ;;  %v3693_v40 = vsel %vm3060_vm2, %v3445_v35, 0.0  ;;  %v3304_v20 = vsel %vm3060_vm2, %v6134_v19, 0.0  ;;  %v3449_v19 = vmul.f32 %v6171_v4, %v6171_v4 }
 0x1e3   : > { %v3672_v51 = vadd.f32 %v3671_v58, %v3670_v48 }
 0x1e4   : > { %v3285_v32 = vadd.f32 %v3284_v37, %v3283_v62  ;;  %v3448_v62 = vmul.f32 %v6137_v28, %v6137_v28 }
 0x1e5   : > { %v3674_v27 = vadd.f32 %v3673_v15, %v3672_v51  ;;  %v3306_v51 = vsel %vm3060_vm2, %v6131_v41, 0.0 }
 0x1e6   : > { %v3287_v61 = vadd.f32 %v3286_v5, %v3285_v32  ;;  %v3308_v32 = vsel %vm3060_vm2, %v6137_v28, 0.0  ;;  %v3699_v41 = vsel %vm3060_vm2, %v3448_v62, 0.0  ;;  %v3310_v5 = vsel %vm3060_vm2, %v6171_v4, 0.0 }
 0x1e7   : > { %v3676_v38 = vadd.f32 %v3675_v46, %v3674_v27  ;;  %v3451_v28 = vmul.f32 %v6174_v59, %v6174_v59  ;;  %v3703_v4 = vsel %vm3060_vm2, %v3450_v13, 0.0 }
 0x1e8   : > { %v3289_v21 = vadd.f32 %v3288_v56, %v3287_v61 }
 0x1e9   : > { %v3678_v17 = vadd.f32 %v3677_v25, %v3676_v38  ;;  %v3701_v25 = vsel %vm3060_vm2, %v3449_v19, 0.0  ;;  %v3705_v42 = vsel %vm3060_vm2, %v3451_v28, 0.0 }
 0x1ea   : > { %v3291_v8 = vadd.f32 %v3290_v23, %v3289_v21  ;;  %v3314_v21 = vsel %vm3060_vm2, %v6174_v59, 0.0 }
 0x1eb   : > { %v3680_v3 = vadd.f32 %v3679_v43, %v3678_v17 }
 0x1ec   : > { %v3293_v2 = vadd.f32 %v3292_v22, %v3291_v8 }
 0x1ed   : > { %v3682_v55 = vadd.f32 %v3681_v24, %v3680_v3 }
 0x1ee   : > { %v3295_v45 = vadd.f32 %v3294_v44, %v3293_v2 }
 0x1ef   : > { %v3684_v39 = vadd.f32 %v3683_v50, %v3682_v55 }
 0x1f0   : > { %v3297_v26 = vadd.f32 %v3296_v18, %v3295_v45 }
 0x1f1   : > { %v3686_v14 = vadd.f32 %v3685_v29, %v3684_v39 }
 0x1f2   : > { %v3299_v16 = vadd.f32 %v3298_v33, %v3297_v26 }
 0x1f3   : > { %v3688_v53 = vadd.f32 %v3687_v36, %v3686_v14 }
 0x1f4   : > { %v3301_v12 = vadd.f32 %v3300_v9, %v3299_v16 }
 0x1f5   : > { %v3690_v0 = vadd.f32 %v3689_v52, %v3688_v53 }
 0x1f6   : > { %v3303_v48 = vadd.f32 %v3302_v34, %v3301_v12 }
 0x1f7   : > { %v3692_v57 = vadd.f32 %v3691_v49, %v3690_v0 }
 0x1f8   : > { %v3305_v6 = vadd.f32 %v3304_v20, %v3303_v48 }
 0x1f9   : > { %v3694_v58 = vadd.f32 %v3693_v40, %v3692_v57 }
 0x1fa   : > { %v3307_v37 = vadd.f32 %v3306_v51, %v3305_v6 }
 0x1fb   : > { %v3696_v15 = vadd.f32 %v3695_v30, %v3694_v58 }
 0x1fc   : > { %v3309_v27 = vadd.f32 %v3308_v32, %v3307_v37 }
 0x1fd   : > { %v3698_v46 = vadd.f32 %v3697_v63, %v3696_v15 }
 0x1fe   : > { %v3311_v61 = vadd.f32 %v3310_v5, %v3309_v27 }
 0x1ff   : > { %v3700_v38 = vadd.f32 %v3699_v41, %v3698_v46 }
 0x200   : > { %v3313_v17 = vadd.f32 %v3312_v1, %v3311_v61 }
 0x201   : > { %v3702_v56 = vadd.f32 %v3701_v25, %v3700_v38 }
 0x202   : > { %v3315_v23 = vadd.f32 %v3314_v21, %v3313_v17 }
 0x203   : > { %v3704_v43 = vadd.f32 %v3703_v4, %v3702_v56 }
 0x204   : > { %v3316_v3 = vrot.slane %v3315_v23, 4 }
 0x205   : > { %v3706_v8 = vadd.f32 %v3705_v42, %v3704_v43 }
 0x206   : > { %v3317_v24 = vadd.f32 %v3316_v3, %v3315_v23 }
 0x207   : > { %v3707_v22 = vrot.slane %v3706_v8, 4 }
 0x208   : > { %v3318_v47 = vrot.slane %v3317_v24, 2 }
 0x209   : > { %v3708_v2 = vadd.f32 %v3707_v22, %v3706_v8 }
 0x20a   : > { %v3319_v60 = vadd.f32 %v3318_v47, %v3317_v24 }
 0x20b   : > { %v3709_v55 = vrot.slane %v3708_v2, 2 }
 0x20c   : > { %v3320_v50 = vrot.slane %v3319_v60, 1 }
 0x20d   : > { %v3710_v44 = vadd.f32 %v3709_v55, %v3708_v2 }
 0x20e   : > { %v3321_v59 = vadd.f32 %v3320_v50, %v3319_v60 }
 0x20f   : > { %v3711_v11 = vrot.slane %v3710_v44, 1 }
 0x210   : > { %3323 = vst.msk [vmem:[%s311_s17] sm:$0x1] %vm3322_vm3, %v3321_v59 }
 0x211   : > { %v3712_v39 = vadd.f32 %v3711_v11, %v3710_v44 }
 0x213   : > { %3713 = vst.msk [vmem:[%s311_s17 + $0x1] sm:$0x1] %vm3322_vm3, %v3712_v39 }
 0x214 PF: > { %s16_s18 = sadd.s32 1, %s4523_s18  }
 0x215   : > { %p13_p6 = scmp.ge.s32.totalorder %s16_s18, 4  }
 0x217   :  { %15 = sbr.rel (!%p13_p6) target bundleno = 1 (0x1), region = 84 }

// kernel: critic_forward.6
= control target key start
LH: loop header
LB: loop body
LE: loop exit
PB: predicated region body
PF: predicated region fallthrough
CT: control target
= control target key end

     0   :  { %s1606_s18 = smov 0   ;;  %s2007_s0 = inlined_call_operand.vmem [shape: bf16[520,128], index: 0, kind: input, shape index: {}, may-alias: {0,1}]   ;;  %s2008_s1 = inlined_call_operand.vmem [shape: bf16[520,128], index: 1, kind: input, shape index: {}, may-alias: {0,1}]   ;;  %s2009_s2 = inlined_call_operand.vmem [shape: f32[512,1], index: 2, kind: input, shape index: {}]   ;;  %s2010_s3 = inlined_call_operand.vmem [shape: bf16[1,128,16], index: 3, kind: input, shape index: {}]   ;;  %s2011_s4 = inlined_call_operand.vmem [shape: bf16[512,16], index: 4, kind: output, shape index: {0}]   ;;  %s2012_s5 = inlined_call_operand.vmem [shape: f32[2,2,16], index: 5, kind: output, shape index: {1}]  }
   0x1 LB: > { %s1612_s1 = sadd.s32 4294967295, %s1573_s18   ;;  %p1342_p0 = scmp.ge.s32.totalorder %s1573_s18, 1  ;;  %s1573_s18 = sphi %s1606_s18, %s16_s18  }
   0x2   : > { %p227_p1 = scmp.lt.s32.totalorder %s1573_s18, 3 }
   0x4   : > { %p228_p2 = pnand %p1342_p0, %p227_p1 }
   0x5   : > { %v1543_v0 = vld [vmem:[%s2010_s3] sm:$0xff] (!%p228_p2)   ;;  %s1343_s21 = sshll.u32 (!%p228_p2), %s1612_s1, 5  ;;  %v1544_v1 = vld [vmem:[%s2010_s3 + $0x8] sm:$0xff] (!%p228_p2)   ;;  %v1545_v2 = vld [vmem:[%s2010_s3 + $0x10] sm:$0xff] (!%p228_p2)   ;;  %v1575_v3 = vmov (!%p228_p2), 0   ;;  %vm1018_vm0 = vcmask (!%p228_p2), 125952  }
   0x6   : > { %231 = sbr.rel (%p228_p2) target bundleno = 338 (0x152), region = 36  ;;  %p279_p3 = scmp.lt.s32.totalorder (!%p228_p2), %s1343_s21, 64  ;;  %1468 = vmatprep.subr.bf16.mxu0 (!%p228_p2), %v1543_v0  ;;  %1516 = vmatprep.subr.bf16.mxu1 (!%p228_p2), %v1543_v0  ;;  %v1546_v4 = vld [vmem:[%s2010_s3 + $0x18] sm:$0xff] (!%p228_p2)   ;;  %v1547_v7 = vld [vmem:[%s2010_s3 + $0x20] sm:$0xff] (!%p228_p2)   ;;  %v1548_v8 = vld [vmem:[%s2010_s3 + $0x28] sm:$0xff] (!%p228_p2)   ;;  %vm1051_vm1 = vcmask (!%p228_p2), 130048  }
   0x7   : > { %1469 = vmatpush3.bf16.msra.mxu0 (!%p228_p2), %v1543_v0  ;;  %1524 = vmatpush3.bf16.msra.mxu1 (!%p228_p2), %v1543_v0  ;;  %p297_p4 = scmp.lt.s32.totalorder (!%p228_p2), %s1343_s21, 63  ;;  %v1549_v9 = vld [vmem:[%s2010_s3 + $0x30] sm:$0xff] (!%p228_p2)   ;;  %v1550_v11 = vld [vmem:[%s2010_s3 + $0x38] sm:$0xff] (!%p228_p2)   ;;  %p308_p5 = scmp.lt.s32.totalorder (!%p228_p2), %s1612_s1, 1  ;;  %vm1121_vm2 = vcmask (!%p228_p2), 122880  }
   0x8   : > { %1470 = vmatprep.subr.bf16.mxu0 (!%p228_p2), %v1544_v1  ;;  %1517 = vmatprep.subr.bf16.mxu1 (!%p228_p2), %v1544_v1 }
   0x9   : > { %1541 = vset.pattern.permute.xlu0 (!%p228_p2), %v1575_v3  ;;  %1542 = vset.pattern.permute.xlu1 (!%p228_p2), %v1575_v3 }
   0xb   : > { %1471 = vmatpush3.bf16.msra.mxu0 (!%p228_p2), %v1544_v1  ;;  %1525 = vmatpush3.bf16.msra.mxu1 (!%p228_p2), %v1544_v1 }
   0xc   : > { %1472 = vmatprep.subr.bf16.mxu0 (!%p228_p2), %v1545_v2  ;;  %1518 = vmatprep.subr.bf16.mxu1 (!%p228_p2), %v1545_v2 }
   0xd   : > { %s280_s24 = scalar_select %p279_p3, %s1343_s21, 64 }
   0xe   : > { %s2014_s21 = smov (!%p297_p4, %s1343_s21), 63  ;;  %s2016_s1 = smov (!%p308_p5, %s1612_s1), 1 }
   0xf   : > { %s1344_s27 = sshll.u32 %s280_s24, 2  ;;  %1473 = vmatpush3.bf16.msra.mxu0 %v1545_v2  ;;  %1526 = vmatpush3.bf16.msra.mxu1 %v1545_v2  ;;  %s1346_s10 = sshll.u32 %s2014_s21, 3 }
  0x10   : > { %s1629_s30 = scalar_lea.vmem %s2007_s0, %s1344_s27  ;;  %1474 = vmatprep.subr.bf16.mxu0 %v1546_v4  ;;  %1519 = vmatprep.subr.bf16.mxu1 %v1546_v4  ;;  %s1648_s15 = scalar_lea.vmem %s2009_s2, %s1346_s10 }
  0x11   : > { %v1551_v5 = vld [vmem:[%s1629_s30] sm:$0xff]   ;;  %v668_v12 = vld [vmem:[%s1648_s15 + $0x10] sm:$0xff]  ;;  %v667_v13 = vld [vmem:[%s1648_s15 + $0x8] sm:$0xff]  ;;  %s1348_s22 = sshll.u32 %s2014_s21, 2  ;;  %s1349_s21 = sshll.u32 %s2016_s1, 1 }
  0x12   : > { %v1552_v6 = vld [vmem:[%s1629_s30 + $0x40] sm:$0xff]   ;;  %1484 = vmatprep.mubr.bf16.mxu0 %v1551_v5  ;;  %710 = vperm.xlu1 %1542, %v668_v12   ;;  %v669_v14 = vld [vmem:[%s1648_s15 + $0x18] sm:$0xff]  ;;  %v1553_v16 = vld [vmem:[%s1629_s30 + $0x8] sm:$0xff]   ;;  %s1732_s25 = scalar_lea.vmem %s2011_s4, %s1348_s22  ;;  %s311_s28 = scalar_lea.vmem %s2012_s5, %s1349_s21 }
  0x13   : > { %1500 = vmatprep.mubr.bf16.mxu1 %v1552_v6  ;;  %1475 = vmatpush3.bf16.msra.mxu0 %v1546_v4  ;;  %v666_v10 = vld [vmem:[%s1648_s15] sm:$0xff]  ;;  %v1554_v17 = vld [vmem:[%s1629_s30 + $0x48] sm:$0xff]   ;;  %v672_v19 = vld [vmem:[%s1648_s15 + $0x30] sm:$0xff] }
  0x14   : > { %1527 = vmatpush3.bf16.msra.mxu1 %v1546_v4  ;;  %1476 = vmatprep.subr.bf16.mxu0 %v1547_v7  ;;  %v670_v15 = vld [vmem:[%s1648_s15 + $0x20] sm:$0xff]  ;;  %v671_v18 = vld [vmem:[%s1648_s15 + $0x28] sm:$0xff]  ;;  %v1555_v20 = vld [vmem:[%s1629_s30 + $0x10] sm:$0xff]  }
  0x15   : > { %1520 = vmatprep.subr.bf16.mxu1 %v1547_v7  ;;  %700 = vperm.xlu0 %1541, %v666_v10   ;;  %v1556_v21 = vld [vmem:[%s1629_s30 + $0x50] sm:$0xff]   ;;  %v673_v22 = vld [vmem:[%s1648_s15 + $0x38] sm:$0xff]  ;;  %v674_v23 = vld [vmem:[%s1648_s15 + $0x40] sm:$0xff] }
  0x16   : > { %715 = vperm.xlu1 %1542, %v669_v14   ;;  %v1557_v24 = vld [vmem:[%s1629_s30 + $0x18] sm:$0xff]   ;;  %v675_v26 = vld [vmem:[%s1648_s15 + $0x48] sm:$0xff]  ;;  %v676_v27 = vld [vmem:[%s1648_s15 + $0x50] sm:$0xff] }
  0x17   : > { %1477 = vmatpush3.bf16.msra.mxu0 %v1547_v7  ;;  %v1558_v25 = vld [vmem:[%s1629_s30 + $0x58] sm:$0xff]   ;;  %v1559_v28 = vld [vmem:[%s1629_s30 + $0x20] sm:$0xff]   ;;  %v1561_v32 = vld [vmem:[%s1629_s30 + $0x28] sm:$0xff]  }
  0x18   : > { %1528 = vmatpush3.bf16.msra.mxu1 %v1547_v7  ;;  %1478 = vmatprep.subr.bf16.mxu0 %v1548_v8  ;;  %v1560_v29 = vld [vmem:[%s1629_s30 + $0x60] sm:$0xff]   ;;  %v677_v30 = vld [vmem:[%s1648_s15 + $0x58] sm:$0xff]  ;;  %v1562_v33 = vld [vmem:[%s1629_s30 + $0x68] sm:$0xff]  }
  0x19   : > { %1521 = vmatprep.subr.bf16.mxu1 %v1548_v8  ;;  %705 = vperm.xlu0 %1541, %v667_v13   ;;  %v678_v31 = vld [vmem:[%s1648_s15 + $0x60] sm:$0xff]  ;;  %v679_v34 = vld [vmem:[%s1648_s15 + $0x68] sm:$0xff]  ;;  %v680_v35 = vld [vmem:[%s1648_s15 + $0x70] sm:$0xff] }
  0x1a   : > { %725 = vperm.xlu1 %1542, %v671_v18   ;;  %v1563_v36 = vld [vmem:[%s1629_s30 + $0x30] sm:$0xff]   ;;  %v681_v38 = vld [vmem:[%s1648_s15 + $0x78] sm:$0xff]  ;;  %v682_v39 = vld [vmem:[%s1648_s15 + $0x80] sm:$0xff] }
  0x1b   : > { %1479 = vmatpush3.bf16.msra.mxu0 %v1548_v8  ;;  %v1564_v37 = vld [vmem:[%s1629_s30 + $0x70] sm:$0xff]   ;;  %v1565_v40 = vld [vmem:[%s1629_s30 + $0x38] sm:$0xff]   ;;  %v683_v42 = vld [vmem:[%s1648_s15 + $0x88] sm:$0xff] }
  0x1c   : > { %1529 = vmatpush3.bf16.msra.mxu1 %v1548_v8  ;;  %1480 = vmatprep.subr.bf16.mxu0 %v1549_v9  ;;  %v1566_v41 = vld [vmem:[%s1629_s30 + $0x78] sm:$0xff]   ;;  %v684_v43 = vld [vmem:[%s1648_s15 + $0x90] sm:$0xff]  ;;  %v686_v45 = vld [vmem:[%s1648_s15 + $0xa0] sm:$0xff] }
  0x1d   : > { %1522 = vmatprep.subr.bf16.mxu1 %v1549_v9  ;;  %720 = vperm.xlu0 %1541, %v670_v15   ;;  %v685_v44 = vld [vmem:[%s1648_s15 + $0x98] sm:$0xff]  ;;  %v687_v46 = vld [vmem:[%s1648_s15 + $0xa8] sm:$0xff]  ;;  %v688_v47 = vld [vmem:[%s1648_s15 + $0xb0] sm:$0xff] }
  0x1e   : > { %735 = vperm.xlu1 %1542, %v673_v22   ;;  %v689_v48 = vld [vmem:[%s1648_s15 + $0xb8] sm:$0xff]  ;;  %v690_v49 = vld [vmem:[%s1648_s15 + $0xc0] sm:$0xff]  ;;  %v691_v50 = vld [vmem:[%s1648_s15 + $0xc8] sm:$0xff] }
  0x1f   : > { %1481 = vmatpush3.bf16.msra.mxu0 %v1549_v9  ;;  %v692_v51 = vld [vmem:[%s1648_s15 + $0xd0] sm:$0xff]  ;;  %v693_v52 = vld [vmem:[%s1648_s15 + $0xd8] sm:$0xff]  ;;  %v694_v53 = vld [vmem:[%s1648_s15 + $0xe0] sm:$0xff] }
  0x20   : > { %1530 = vmatpush3.bf16.msra.mxu1 %v1549_v9  ;;  %1482 = vmatprep.subr.bf16.mxu0 %v1550_v11  ;;  %v695_v54 = vld [vmem:[%s1648_s15 + $0xe8] sm:$0xff]  ;;  %v696_v55 = vld [vmem:[%s1648_s15 + $0xf0] sm:$0xff]  ;;  %v697_v56 = vld [vmem:[%s1648_s15 + $0xf8] sm:$0xff] }
  0x21   : > { %1523 = vmatprep.subr.bf16.mxu1 %v1550_v11  ;;  %730 = vperm.xlu0 %1541, %v672_v19  }
  0x22   : > { %745 = vperm.xlu1 %1542, %v675_v26  }
  0x23   : > { %1483 = vmatpush3.bf16.msra.mxu0 %v1550_v11 }
  0x24   : > { %1531 = vmatpush3.bf16.msra.mxu1 %v1550_v11 }
  0x25   : > { %740 = vperm.xlu0 %1541, %v674_v23  }
  0x26   : > { %1485 = vmatmul.mubr.bf16.vlgmr.msra.gmra.mrb[0].mxu0 %v1553_v16  ;;  %755 = vperm.xlu1 %1542, %v677_v30  }
  0x27   : > { %1501 = vmatmul.mubr.bf16.vlgmr.msra.gmra.mrb[0].mxu1 %v1554_v17  ;;  %1488 = vmatprep.mubr.bf16.mxu0 %v1555_v20 }
  0x28   : > { %1504 = vmatprep.mubr.bf16.mxu1 %v1556_v21 }
  0x29   : > { %750 = vperm.xlu0 %1541, %v676_v27  }
  0x2a   : > { %765 = vperm.xlu1 %1542, %v679_v34  }
  0x2d   : > { %760 = vperm.xlu0 %1541, %v678_v31  }
  0x2e   : > { %1489 = vmatmul.mubr.bf16.gmra.mrb[4].mxu0 %v1557_v24  ;;  %775 = vperm.xlu1 %1542, %v681_v38  }
  0x2f   : > { %1505 = vmatmul.mubr.bf16.gmra.mrb[4].mxu1 %v1558_v25  ;;  %1492 = vmatprep.mubr.bf16.mxu0 %v1559_v28 }
  0x30   : > { %1508 = vmatprep.mubr.bf16.mxu1 %v1560_v29 }
  0x31   : > { %770 = vperm.xlu0 %1541, %v680_v35  }
  0x32   : > { %785 = vperm.xlu1 %1542, %v683_v42  }
  0x35   : > { %780 = vperm.xlu0 %1541, %v682_v39  }
  0x36   : > { %1493 = vmatmul.mubr.bf16.gmra.mrb[8].mxu0 %v1561_v32  ;;  %795 = vperm.xlu1 %1542, %v685_v44  }
  0x37   : > { %1509 = vmatmul.mubr.bf16.gmra.mrb[8].mxu1 %v1562_v33  ;;  %1496 = vmatprep.mubr.bf16.mxu0 %v1563_v36 }
  0x38   : > { %1512 = vmatprep.mubr.bf16.mxu1 %v1564_v37 }
  0x39   : > { %790 = vperm.xlu0 %1541, %v684_v43  }
  0x3a   : > { %805 = vperm.xlu1 %1542, %v687_v46  }
  0x3d   : > { %800 = vperm.xlu0 %1541, %v686_v45  }
  0x3e   : > { %1497 = vmatmul.mubr.bf16.gmra.mrb[12].mxu0 %v1565_v40  ;;  %815 = vperm.xlu1 %1542, %v689_v48  }
  0x3f   : > { %1513 = vmatmul.mubr.bf16.gmra.mrb[12].mxu1 %v1566_v41 }
  0x41   : > { %810 = vperm.xlu0 %1541, %v688_v47  }
  0x42   : > { %825 = vperm.xlu1 %1542, %v691_v50  }
  0x45   : > { %820 = vperm.xlu0 %1541, %v690_v49  }
  0x46   : > { %835 = vperm.xlu1 %1542, %v693_v52  }
  0x49   : > { %830 = vperm.xlu0 %1541, %v692_v51  }
  0x4a   : > { %845 = vperm.xlu1 %1542, %v695_v54  }
  0x4d   : > { %840 = vperm.xlu0 %1541, %v694_v53  }
  0x4e   : > { %855 = vperm.xlu1 %1542, %v697_v56  }
  0x51   : > { %850 = vperm.xlu0 %1541, %v696_v55  }
  0x91   : > { %v711_v58 = vpop.permute.xlu1 %710 }
  0x94   : > { %v701_v57 = vpop.permute.xlu0 %700 }
  0x95   : > { %v716_v60 = vpop.permute.xlu1 %715 }
  0x98   : > { %v706_v59 = vpop.permute.xlu0 %705 }
  0x99   : > { %v1704_v62 = vpop.permute.xlu1 %725 }
  0x9c   : > { %v1702_v61 = vpop.permute.xlu0 %720 }
  0x9d   : > { %v1708_v0 = vpop.permute.xlu1 %735 }
  0xa0   : > { %v1706_v63 = vpop.permute.xlu0 %730 }
  0xa1   : > { %v1712_v2 = vpop.permute.xlu1 %745 }
  0xa4   : > { %v1710_v1 = vpop.permute.xlu0 %740 }
  0xa5   : > { %v1716_v4 = vpop.permute.xlu1 %755 }
  0xa8   : > { %v1714_v3 = vpop.permute.xlu0 %750 }
  0xa9   : > { %v1720_v6 = vpop.permute.xlu1 %765 }
  0xac   : > { %v1718_v5 = vpop.permute.xlu0 %760 }
  0xad   : > { %v1724_v8 = vpop.permute.xlu1 %775 }
  0xb0   : > { %v1722_v7 = vpop.permute.xlu0 %770 }
  0xb1   : > { %v786_v10 = vpop.permute.xlu1 %785 }
  0xb4   : > { %v781_v9 = vpop.permute.xlu0 %780 }
  0xb5   : > { %v796_v12 = vpop.permute.xlu1 %795 }
  0xb8   : > { %v791_v11 = vpop.permute.xlu0 %790 }
  0xb9   : > { %v1748_v32 = vpop.permute.xlu1 %805 }
  0xbc   : > { %v801_v13 = vpop.permute.xlu0 %800 }
  0xc0   : > { %v811_v33 = vpop.permute.xlu0 %810 }
  0xf9   : > { %v1486_v14 = vpop.f32.mrb[0].mxu0 }
  0xfa   : > { %v1502_v15 = vpop.f32.mrb[0].mxu1  ;;  %v860_v16 = vmul.f32 %v1486_v14, %v711_v58  ;;  %v539_v18 = vpop.f32.mrb[1].mxu0 }
  0xfb   : > { %v1727_v17 = vmul.f32 %v1502_v15, %v791_v11  ;;  %v603_v19 = vpop.f32.mrb[1].mxu1  ;;  %v858_v20 = vmul.f32 %v701_v57, %v539_v18  ;;  %v1487_v22 = vpop.f32.mrb[2].mxu0 }
  0xfc   : > { %v1734_v21 = vmul.f32 %v781_v9, %v603_v19  ;;  %v1503_v23 = vpop.f32.mrb[2].mxu1  ;;  %v1414_v24 = vpack.c.bf16 %v860_v16, %v860_v16  ;;  %v542_v26 = vpop.f32.mrb[3].mxu0  ;;  %v861_v30 = vmul.f32 %v1487_v22, %v716_v60  ;;  %v1125_v40 = vmul.f32 %v860_v16, %v860_v16 }
  0xfd   : > { %v1430_v25 = vpack.c.bf16 %v1727_v17, %v1727_v17  ;;  %v606_v27 = vpop.f32.mrb[3].mxu1  ;;  %v1412_v28 = vpack.c.bf16 %v858_v20, %v858_v20  ;;  %v1746_v31 = vmul.f32 %v1503_v23, %v796_v12  ;;  %v1123_v34 = vmul.f32 %v858_v20, %v858_v20  ;;  %v821_v18 = vpop.permute.xlu0 %820 }
  0xfe   : > { %1021 = vst.msk [vmem:[%s1732_s25 + $0x8] sm:$0xf] %vm1018_vm0, %v1414_v24  ;;  %v1428_v29 = vpack.c.bf16 %v1734_v21, %v1734_v21  ;;  %v859_v35 = vmul.f32 %v706_v59, %v542_v26  ;;  %v1752_v36 = vmul.f32 %v786_v10, %v606_v27  ;;  %v1415_v37 = vpack.c.bf16 %v861_v30, %v861_v30 }
  0xff   : > { %1037 = vst.msk [vmem:[%s1732_s25 + $0x48] sm:$0xf] %vm1018_vm0, %v1430_v25  ;;  %1019 = vst.msk [vmem:[%s1732_s25] sm:$0xf] %vm1018_vm0, %v1412_v28  ;;  %v1431_v41 = vpack.c.bf16 %v1746_v31, %v1746_v31  ;;  %v1052_v45 = vsel %vm1051_vm1, %v858_v20, 0.0  ;;  %v1055_v51 = vsel %vm1051_vm1, %v860_v16, 0.0  ;;  %v1126_v53 = vmul.f32 %v861_v30, %v861_v30  ;;  %v816_v16 = vpop.permute.xlu1 %815 }
 0x100   : > { %1035 = vst.msk [vmem:[%s1732_s25 + $0x40] sm:$0xf] %vm1018_vm0, %v1428_v29  ;;  %v1413_v42 = vpack.c.bf16 %v859_v35, %v859_v35  ;;  %1022 = vst.msk [vmem:[%s1732_s25 + $0xc] sm:$0xf] %vm1018_vm0, %v1415_v37  ;;  %v1053_v46 = vsel %vm1051_vm1, %v859_v35, 0.0  ;;  %v1124_v47 = vmul.f32 %v859_v35, %v859_v35  ;;  %v1429_v48 = vpack.c.bf16 %v1752_v36, %v1752_v36 }
 0x101   : > { %v1490_v38 = vpop.f32.mrb[4].mxu0  ;;  %v1155_v52 = vsel %vm1051_vm1, %v1123_v34, 0.0  ;;  %1038 = vst.msk [vmem:[%s1732_s25 + $0x4c] sm:$0xf] %vm1018_vm0, %v1431_v41  ;;  %v1054_v54 = vadd.f32 %v1053_v46, %v1052_v45  ;;  %v1158_v12 = vsel %vm1051_vm1, %v1125_v40, 0.0  ;;  %v1160_v22 = vsel %vm1051_vm1, %v1126_v53, 0.0 }
 0x102   : > { %v1506_v39 = vpop.f32.mrb[4].mxu1  ;;  %v555_v43 = vpop.f32.mrb[5].mxu0  ;;  %1020 = vst.msk [vmem:[%s1732_s25 + $0x4] sm:$0xf] %vm1018_vm0, %v1413_v42  ;;  %v1156_v57 = vsel %vm1051_vm1, %v1124_v47, 0.0  ;;  %v864_v58 = vmul.f32 %v1490_v38, %v1706_v63  ;;  %v1057_v63 = vsel %vm1051_vm1, %v861_v30, 0.0 }
 0x103   : > { %v619_v44 = vpop.f32.mrb[5].mxu1  ;;  %v1491_v49 = vpop.f32.mrb[6].mxu0  ;;  %1036 = vst.msk [vmem:[%s1732_s25 + $0x44] sm:$0xf] %vm1018_vm0, %v1429_v48  ;;  %v1772_v59 = vmul.f32 %v1506_v39, %v811_v33  ;;  %v862_v60 = vmul.f32 %v1702_v61, %v555_v43  ;;  %v1056_v9 = vadd.f32 %v1055_v51, %v1054_v54  ;;  %v1157_v10 = vadd.f32 %v1156_v57, %v1155_v52 }
 0x104   : > { %v1507_v50 = vpop.f32.mrb[6].mxu1  ;;  %v558_v55 = vpop.f32.mrb[7].mxu0  ;;  %v1775_v11 = vmul.f32 %v801_v13, %v619_v44  ;;  %v1418_v14 = vpack.c.bf16 %v864_v58, %v864_v58  ;;  %v865_v34 = vmul.f32 %v1491_v49, %v1708_v0  ;;  %v1129_v46 = vmul.f32 %v864_v58, %v864_v58 }
 0x105   : > { %v622_v56 = vpop.f32.mrb[7].mxu1  ;;  %v1434_v15 = vpack.c.bf16 %v1772_v59, %v1772_v59  ;;  %v1159_v19 = vadd.f32 %v1158_v12, %v1157_v10  ;;  %v1416_v20 = vpack.c.bf16 %v862_v60, %v862_v60  ;;  %v1058_v61 = vadd.f32 %v1057_v63, %v1056_v9  ;;  %v831_v49 = vpop.permute.xlu0 %830 }
 0x106   : > { %1025 = vst.msk [vmem:[%s1732_s25 + $0x18] sm:$0xf] %vm1018_vm0, %v1418_v14  ;;  %v1059_v13 = vsel %vm1051_vm1, %v862_v60, 0.0  ;;  %v1127_v23 = vmul.f32 %v862_v60, %v862_v60  ;;  %v1432_v27 = vpack.c.bf16 %v1775_v11, %v1775_v11  ;;  %v1795_v39 = vmul.f32 %v1507_v50, %v816_v16 }
 0x107   : > { %1041 = vst.msk [vmem:[%s1732_s25 + $0x58] sm:$0xf] %vm1018_vm0, %v1434_v15  ;;  %1023 = vst.msk [vmem:[%s1732_s25 + $0x10] sm:$0xf] %vm1018_vm0, %v1416_v20  ;;  %v1161_v26 = vadd.f32 %v1160_v22, %v1159_v19  ;;  %v1060_v30 = vadd.f32 %v1059_v13, %v1058_v61  ;;  %v863_v40 = vmul.f32 %v1704_v62, %v558_v55  ;;  %v1063_v50 = vsel %vm1051_vm1, %v864_v58, 0.0 }
 0x108   : > { %v1162_v33 = vsel %vm1051_vm1, %v1127_v23, 0.0  ;;  %1039 = vst.msk [vmem:[%s1732_s25 + $0x50] sm:$0xf] %vm1018_vm0, %v1432_v27  ;;  %v1799_v41 = vmul.f32 %v1748_v32, %v622_v56  ;;  %v1419_v44 = vpack.c.bf16 %v865_v34, %v865_v34  ;;  %v1435_v0 = vpack.c.bf16 %v1795_v39, %v1795_v39  ;;  %v826_v32 = vpop.permute.xlu1 %825 }
 0x109   : > { %v1494_v24 = vpop.f32.mrb[8].mxu0  ;;  %v1163_v38 = vadd.f32 %v1162_v33, %v1161_v26  ;;  %v1417_v45 = vpack.c.bf16 %v863_v40, %v863_v40  ;;  %v1061_v47 = vsel %vm1051_vm1, %v863_v40, 0.0  ;;  %v1128_v48 = vmul.f32 %v863_v40, %v863_v40  ;;  %v841_v26 = vpop.permute.xlu0 %840 }
 0x10a   : > { %v1510_v25 = vpop.f32.mrb[8].mxu1  ;;  %v571_v28 = vpop.f32.mrb[9].mxu0  ;;  %1026 = vst.msk [vmem:[%s1732_s25 + $0x1c] sm:$0xf] %vm1018_vm0, %v1419_v44  ;;  %v1433_v62 = vpack.c.bf16 %v1799_v41, %v1799_v41  ;;  %v1130_v51 = vmul.f32 %v865_v34, %v865_v34  ;;  %1042 = vst.msk [vmem:[%s1732_s25 + $0x5c] sm:$0xf] %vm1018_vm0, %v1435_v0  ;;  %v1062_v52 = vadd.f32 %v1061_v47, %v1060_v30 }
 0x10b   : > { %v635_v29 = vpop.f32.mrb[9].mxu1  ;;  %v1495_v35 = vpop.f32.mrb[10].mxu0  ;;  %1024 = vst.msk [vmem:[%s1732_s25 + $0x14] sm:$0xf] %vm1018_vm0, %v1417_v45  ;;  %v1164_v53 = vsel %vm1051_vm1, %v1128_v48, 0.0  ;;  %v868_v54 = vmul.f32 %v1494_v24, %v1714_v3  ;;  %v1817_v55 = vmul.f32 %v1510_v25, %v831_v49  ;;  %v866_v56 = vmul.f32 %v1710_v1, %v571_v28 }
 0x10c   : > { %v1511_v37 = vpop.f32.mrb[10].mxu1  ;;  %v574_v42 = vpop.f32.mrb[11].mxu0  ;;  %1040 = vst.msk [vmem:[%s1732_s25 + $0x54] sm:$0xf] %vm1018_vm0, %v1433_v62  ;;  %v1064_v9 = vadd.f32 %v1063_v50, %v1062_v52  ;;  %v1165_v58 = vadd.f32 %v1164_v53, %v1163_v38  ;;  %v1820_v10 = vmul.f32 %v821_v18, %v635_v29  ;;  %v1166_v15 = vsel %vm1051_vm1, %v1129_v46, 0.0 }
 0x10d   : > { %v638_v43 = vpop.f32.mrb[11].mxu1  ;;  %v1422_v16 = vpack.c.bf16 %v868_v54, %v868_v54  ;;  %v1438_v3 = vpack.c.bf16 %v1817_v55, %v1817_v55  ;;  %v1065_v19 = vsel %vm1051_vm1, %v865_v34, 0.0  ;;  %v1420_v22 = vpack.c.bf16 %v866_v56, %v866_v56  ;;  %v836_v29 = vpop.permute.xlu1 %835 }
 0x10e   : > { %v1167_v20 = vadd.f32 %v1166_v15, %v1165_v58  ;;  %v1168_v13 = vsel %vm1051_vm1, %v1130_v51, 0.0  ;;  %v1066_v23 = vadd.f32 %v1065_v19, %v1064_v9  ;;  %v1067_v24 = vsel %vm1051_vm1, %v866_v56, 0.0  ;;  %v851_v62 = vpop.permute.xlu0 %850 }
 0x10f   : > { %1029 = vst.msk [vmem:[%s1732_s25 + $0x28] sm:$0xf] %vm1018_vm0, %v1422_v16  ;;  %1045 = vst.msk [vmem:[%s1732_s25 + $0x68] sm:$0xf] %vm1018_vm0, %v1438_v3  ;;  %v1131_v25 = vmul.f32 %v866_v56, %v866_v56  ;;  %v1436_v28 = vpack.c.bf16 %v1820_v10, %v1820_v10  ;;  %v869_v34 = vmul.f32 %v1495_v35, %v1716_v4 }
 0x110   : > { %1027 = vst.msk [vmem:[%s1732_s25 + $0x20] sm:$0xf] %vm1018_vm0, %v1420_v22  ;;  %v1169_v27 = vadd.f32 %v1168_v13, %v1167_v20  ;;  %v1068_v30 = vadd.f32 %v1067_v24, %v1066_v23  ;;  %v1848_v40 = vmul.f32 %v1511_v37, %v836_v29  ;;  %v867_v44 = vmul.f32 %v1712_v2, %v574_v42 }
 0x111   : > { %v1498_v57 = vpop.f32.mrb[12].mxu0  ;;  %v1170_v33 = vsel %vm1051_vm1, %v1131_v25, 0.0  ;;  %1043 = vst.msk [vmem:[%s1732_s25 + $0x60] sm:$0xf] %vm1018_vm0, %v1436_v28  ;;  %v1851_v0 = vmul.f32 %v826_v32, %v638_v43  ;;  %v1423_v45 = vpack.c.bf16 %v869_v34, %v869_v34  ;;  %v1133_v48 = vmul.f32 %v868_v54, %v868_v54  ;;  %v846_v32 = vpop.permute.xlu1 %845 }
 0x112   : > { %v1514_v60 = vpop.f32.mrb[12].mxu1  ;;  %v587_v12 = vpop.f32.mrb[13].mxu0  ;;  %v1171_v38 = vadd.f32 %v1170_v33, %v1169_v27  ;;  %v1439_v46 = vpack.c.bf16 %v1848_v40, %v1848_v40  ;;  %v1421_v47 = vpack.c.bf16 %v867_v44, %v867_v44  ;;  %v1069_v4 = vsel %vm1051_vm1, %v867_v44, 0.0 }
 0x113   : > { %v651_v14 = vpop.f32.mrb[13].mxu1  ;;  %v1825_v63 = vpop.f32.mrb[14].mxu0  ;;  %1030 = vst.msk [vmem:[%s1732_s25 + $0x2c] sm:$0xf] %vm1018_vm0, %v1423_v45  ;;  %v1132_v35 = vmul.f32 %v867_v44, %v867_v44  ;;  %v1437_v37 = vpack.c.bf16 %v1851_v0, %v1851_v0  ;;  %v1071_v2 = vsel %vm1051_vm1, %v868_v54, 0.0  ;;  %v1134_v42 = vmul.f32 %v869_v34, %v869_v34 }
 0x114   : > { %v1827_v1 = vpop.f32.mrb[14].mxu1  ;;  %v1830_v61 = vpop.f32.mrb[15].mxu0  ;;  %1046 = vst.msk [vmem:[%s1732_s25 + $0x6c] sm:$0xf] %vm1018_vm0, %v1439_v46  ;;  %1028 = vst.msk [vmem:[%s1732_s25 + $0x24] sm:$0xf] %vm1018_vm0, %v1421_v47  ;;  %v1070_v43 = vadd.f32 %v1069_v4, %v1068_v30  ;;  %v872_v50 = vmul.f32 %v1498_v57, %v1722_v7  ;;  %v1869_v51 = vmul.f32 %v1514_v60, %v851_v62 }
 0x115   : > { %v1832_v18 = vpop.f32.mrb[15].mxu1  ;;  %v1172_v49 = vsel %vm1051_vm1, %v1132_v35, 0.0  ;;  %1044 = vst.msk [vmem:[%s1732_s25 + $0x64] sm:$0xf] %vm1018_vm0, %v1437_v37  ;;  %v870_v52 = vmul.f32 %v1718_v5, %v587_v12  ;;  %v1872_v56 = vmul.f32 %v841_v26, %v651_v14  ;;  %v1174_v9 = vsel %vm1051_vm1, %v1133_v48, 0.0  ;;  %v856_v20 = vpop.permute.xlu1 %855 }
 0x116   : > { %v1072_v53 = vadd.f32 %v1071_v2, %v1070_v43  ;;  %v1173_v54 = vadd.f32 %v1172_v49, %v1171_v38  ;;  %v1426_v58 = vpack.c.bf16 %v872_v50, %v872_v50  ;;  %v1442_v15 = vpack.c.bf16 %v1869_v51, %v1869_v51 }
 0x117   : > { %v1073_v16 = vsel %vm1051_vm1, %v869_v34, 0.0  ;;  %v1424_v7 = vpack.c.bf16 %v870_v52, %v870_v52  ;;  %v1176_v57 = vsel %vm1051_vm1, %v1134_v42, 0.0  ;;  %v1075_v60 = vsel %vm1051_vm1, %v870_v52, 0.0 }
 0x118   : > { %v1175_v3 = vadd.f32 %v1174_v9, %v1173_v54  ;;  %1033 = vst.msk [vmem:[%s1732_s25 + $0x38] sm:$0xf] %vm1018_vm0, %v1426_v58  ;;  %1049 = vst.msk [vmem:[%s1732_s25 + $0x78] sm:$0xf] %vm1018_vm0, %v1442_v15  ;;  %v1074_v5 = vadd.f32 %v1073_v16, %v1072_v53  ;;  %v1135_v12 = vmul.f32 %v870_v52, %v870_v52  ;;  %v1083_v35 = vsel %vm1051_vm1, %v1734_v21, 0.0 }
 0x119   : > { %1031 = vst.msk [vmem:[%s1732_s25 + $0x30] sm:$0xf] %vm1018_vm0, %v1424_v7  ;;  %v1440_v19 = vpack.c.bf16 %v1872_v56, %v1872_v56  ;;  %v873_v23 = vmul.f32 %v1825_v63, %v1724_v8  ;;  %v1894_v25 = vmul.f32 %v1827_v1, %v856_v20  ;;  %v871_v26 = vmul.f32 %v1720_v6, %v1830_v61 }
 0x11a   : > { %v1177_v14 = vadd.f32 %v1176_v57, %v1175_v3  ;;  %v1076_v22 = vadd.f32 %v1075_v60, %v1074_v5  ;;  %v1178_v13 = vsel %vm1051_vm1, %v1135_v12, 0.0  ;;  %v1899_v27 = vmul.f32 %v846_v32, %v1832_v18 }
 0x11b   : > { %1047 = vst.msk [vmem:[%s1732_s25 + $0x70] sm:$0xf] %vm1018_vm0, %v1440_v19  ;;  %v1427_v28 = vpack.c.bf16 %v873_v23, %v873_v23  ;;  %v1443_v29 = vpack.c.bf16 %v1894_v25, %v1894_v25  ;;  %v1425_v30 = vpack.c.bf16 %v871_v26, %v871_v26  ;;  %v1137_v33 = vmul.f32 %v872_v50, %v872_v50 }
 0x11c   : > { %v1179_v24 = vadd.f32 %v1178_v13, %v1177_v14  ;;  %v1077_v8 = vsel %vm1051_vm1, %v871_v26, 0.0  ;;  %v1136_v63 = vmul.f32 %v871_v26, %v871_v26  ;;  %v1441_v1 = vpack.c.bf16 %v1899_v27, %v1899_v27 }
 0x11d   : > { %1034 = vst.msk [vmem:[%s1732_s25 + $0x3c] sm:$0xf] %vm1018_vm0, %v1427_v28  ;;  %1050 = vst.msk [vmem:[%s1732_s25 + $0x7c] sm:$0xf] %vm1018_vm0, %v1443_v29  ;;  %v1078_v6 = vadd.f32 %v1077_v8, %v1076_v22  ;;  %v1079_v61 = vsel %vm1051_vm1, %v872_v50, 0.0  ;;  %v1138_v18 = vmul.f32 %v873_v23, %v873_v23  ;;  %v1139_v45 = vmul.f32 %v1734_v21, %v1734_v21 }
 0x11e   : > { %1032 = vst.msk [vmem:[%s1732_s25 + $0x34] sm:$0xf] %vm1018_vm0, %v1425_v30  ;;  %v1180_v34 = vsel %vm1051_vm1, %v1136_v63, 0.0  ;;  %1048 = vst.msk [vmem:[%s1732_s25 + $0x74] sm:$0xf] %vm1018_vm0, %v1441_v1  ;;  %v1182_v46 = vsel %vm1051_vm1, %v1137_v33, 0.0  ;;  %v1140_v37 = vmul.f32 %v1752_v36, %v1752_v36  ;;  %v1141_v43 = vmul.f32 %v1727_v17, %v1727_v17 }
 0x11f   : > { %v1080_v38 = vadd.f32 %v1079_v61, %v1078_v6  ;;  %v1181_v44 = vadd.f32 %v1180_v34, %v1179_v24  ;;  %v1081_v47 = vsel %vm1051_vm1, %v873_v23, 0.0  ;;  %v1184_v62 = vsel %vm1051_vm1, %v1138_v18, 0.0 }
 0x120   : > { %v1186_v32 = vsel %vm1051_vm1, %v1139_v45, 0.0  ;;  %v1085_v49 = vsel %vm1051_vm1, %v1752_v36, 0.0  ;;  %v1087_v21 = vsel %vm1051_vm1, %v1727_v17, 0.0  ;;  %v1142_v53 = vmul.f32 %v1746_v31, %v1746_v31 }
 0x121   : > { %v1082_v48 = vadd.f32 %v1081_v47, %v1080_v38  ;;  %v1183_v4 = vadd.f32 %v1182_v46, %v1181_v44  ;;  %v1188_v54 = vsel %vm1051_vm1, %v1140_v37, 0.0  ;;  %v1190_v15 = vsel %vm1051_vm1, %v1141_v43, 0.0 }
 0x122   : > { %v1089_v16 = vsel %vm1051_vm1, %v1746_v31, 0.0  ;;  %v1143_v36 = vmul.f32 %v1775_v11, %v1775_v11  ;;  %v1192_v57 = vsel %vm1051_vm1, %v1142_v53, 0.0  ;;  %v1091_v17 = vsel %vm1051_vm1, %v1775_v11, 0.0 }
 0x123   : > { %v1084_v2 = vadd.f32 %v1083_v35, %v1082_v48  ;;  %v1185_v42 = vadd.f32 %v1184_v62, %v1183_v4  ;;  %v1144_v5 = vmul.f32 %v1799_v41, %v1799_v41  ;;  %v1145_v14 = vmul.f32 %v1772_v59, %v1772_v59 }
 0x124   : > { %v1194_v31 = vsel %vm1051_vm1, %v1143_v36, 0.0  ;;  %v1093_v19 = vsel %vm1051_vm1, %v1799_v41, 0.0  ;;  %v1095_v13 = vsel %vm1051_vm1, %v1772_v59, 0.0  ;;  %v1146_v11 = vmul.f32 %v1795_v39, %v1795_v39 }
 0x125   : > { %v1086_v50 = vadd.f32 %v1085_v49, %v1084_v2  ;;  %v1187_v52 = vadd.f32 %v1186_v32, %v1185_v42  ;;  %v1196_v23 = vsel %vm1051_vm1, %v1144_v5, 0.0  ;;  %v1198_v28 = vsel %vm1051_vm1, %v1145_v14, 0.0 }
 0x126   : > { %v1097_v29 = vsel %vm1051_vm1, %v1795_v39, 0.0  ;;  %v1147_v41 = vmul.f32 %v1820_v10, %v1820_v10  ;;  %v1200_v8 = vsel %vm1051_vm1, %v1146_v11, 0.0  ;;  %v1099_v59 = vsel %vm1051_vm1, %v1820_v10, 0.0 }
 0x127   : > { %v1088_v9 = vadd.f32 %v1087_v21, %v1086_v50  ;;  %v1189_v58 = vadd.f32 %v1188_v54, %v1187_v52  ;;  %v1148_v63 = vmul.f32 %v1851_v0, %v1851_v0  ;;  %v1149_v61 = vmul.f32 %v1817_v55, %v1817_v55 }
 0x128   : > { %v1202_v39 = vsel %vm1051_vm1, %v1147_v41, 0.0  ;;  %v1101_v18 = vsel %vm1051_vm1, %v1851_v0, 0.0  ;;  %v1103_v44 = vsel %vm1051_vm1, %v1817_v55, 0.0  ;;  %v1150_v10 = vmul.f32 %v1848_v40, %v1848_v40 }
 0x129   : > { %v1090_v3 = vadd.f32 %v1089_v16, %v1088_v9  ;;  %v1191_v7 = vadd.f32 %v1190_v15, %v1189_v58  ;;  %v1204_v45 = vsel %vm1051_vm1, %v1148_v63, 0.0  ;;  %v1206_v48 = vsel %vm1051_vm1, %v1149_v61, 0.0 }
 0x12a   : > { %v1105_v4 = vsel %vm1051_vm1, %v1848_v40, 0.0  ;;  %v1151_v0 = vmul.f32 %v1872_v56, %v1872_v56  ;;  %v1208_v62 = vsel %vm1051_vm1, %v1150_v10, 0.0  ;;  %v1107_v55 = vsel %vm1051_vm1, %v1872_v56, 0.0 }
 0x12b   : > { %v1092_v60 = vadd.f32 %v1091_v17, %v1090_v3  ;;  %v1193_v12 = vadd.f32 %v1192_v57, %v1191_v7  ;;  %v1152_v2 = vmul.f32 %v1899_v27, %v1899_v27  ;;  %v1153_v32 = vmul.f32 %v1869_v51, %v1869_v51 }
 0x12c   : > { %v1210_v40 = vsel %vm1051_vm1, %v1151_v0, 0.0  ;;  %v1109_v49 = vsel %vm1051_vm1, %v1899_v27, 0.0  ;;  %v1111_v56 = vsel %vm1051_vm1, %v1869_v51, 0.0  ;;  %v1154_v21 = vmul.f32 %v1894_v25, %v1894_v25 }
 0x12d   : > { %v1195_v20 = vadd.f32 %v1194_v31, %v1193_v12  ;;  %v1094_v22 = vadd.f32 %v1093_v19, %v1092_v60  ;;  %v1212_v53 = vsel %vm1051_vm1, %v1152_v2, 0.0  ;;  %v1214_v58 = vsel %vm1051_vm1, %v1153_v32, 0.0 }
 0x12e   : > { %v1113_v15 = vsel %vm1051_vm1, %v1894_v25, 0.0  ;;  %v1216_v36 = vsel %vm1051_vm1, %v1154_v21, 0.0 }
 0x12f   : > { %v1096_v24 = vadd.f32 %v1095_v13, %v1094_v22  ;;  %v1197_v26 = vadd.f32 %v1196_v23, %v1195_v20 }
 0x131   : > { %v1098_v30 = vadd.f32 %v1097_v29, %v1096_v24  ;;  %v1199_v33 = vadd.f32 %v1198_v28, %v1197_v26 }
 0x133   : > { %v1100_v1 = vadd.f32 %v1099_v59, %v1098_v30  ;;  %v1201_v6 = vadd.f32 %v1200_v8, %v1199_v33 }
 0x135   : > { %v1102_v34 = vadd.f32 %v1101_v18, %v1100_v1  ;;  %v1203_v38 = vadd.f32 %v1202_v39, %v1201_v6 }
 0x137   : > { %v1104_v46 = vadd.f32 %v1103_v44, %v1102_v34  ;;  %v1205_v47 = vadd.f32 %v1204_v45, %v1203_v38 }
 0x139   : > { %v1106_v35 = vadd.f32 %v1105_v4, %v1104_v46  ;;  %v1207_v37 = vadd.f32 %v1206_v48, %v1205_v47 }
 0x13b   : > { %v1108_v42 = vadd.f32 %v1107_v55, %v1106_v35  ;;  %v1209_v43 = vadd.f32 %v1208_v62, %v1207_v37 }
 0x13d   : > { %v1110_v50 = vadd.f32 %v1109_v49, %v1108_v42  ;;  %v1211_v52 = vadd.f32 %v1210_v40, %v1209_v43 }
 0x13f   : > { %v1112_v54 = vadd.f32 %v1111_v56, %v1110_v50  ;;  %v1213_v9 = vadd.f32 %v1212_v53, %v1211_v52 }
 0x141   : > { %v1114_v27 = vadd.f32 %v1113_v15, %v1112_v54  ;;  %v1215_v16 = vadd.f32 %v1214_v58, %v1213_v9 }
 0x143   : > { %v1115_v3 = vrot.slane %v1114_v27, 4  ;;  %v1217_v7 = vadd.f32 %v1216_v36, %v1215_v16 }
 0x145   : > { %v1116_v51 = vadd.f32 %v1115_v3, %v1114_v27  ;;  %v1218_v57 = vrot.slane %v1217_v7, 4 }
 0x147   : > { %v1117_v17 = vrot.slane %v1116_v51, 2  ;;  %v1219_v5 = vadd.f32 %v1218_v57, %v1217_v7 }
 0x149   : > { %v1118_v60 = vadd.f32 %v1117_v17, %v1116_v51  ;;  %v1220_v12 = vrot.slane %v1219_v5, 2 }
 0x14b   : > { %v1119_v14 = vrot.slane %v1118_v60, 1  ;;  %v1221_v31 = vadd.f32 %v1220_v12, %v1219_v5 }
 0x14d   : > { %v1120_v25 = vadd.f32 %v1119_v14, %v1118_v60  ;;  %v1222_v19 = vrot.slane %v1221_v31, 1 }
 0x14f   : > { %1122 = vst.msk [vmem:[%s311_s28] sm:$0x1] %vm1121_vm2, %v1120_v25  ;;  %v1223_v20 = vadd.f32 %v1222_v19, %v1221_v31 }
 0x151   : > { %1224 = vst.msk [vmem:[%s311_s28 + $0x1] sm:$0x1] %vm1121_vm2, %v1223_v20 }
 0x152 PF: > { %s16_s18 = sadd.s32 1, %s1573_s18  }
 0x153   : > { %p13_p6 = scmp.ge.s32.totalorder %s16_s18, 4  }
 0x155   :  { %15 = sbr.rel (!%p13_p6) target bundleno = 1 (0x1), region = 84 }

// kernel: critic_forward.7
= control target key start
LH: loop header
LB: loop body
LE: loop exit
PB: predicated region body
PF: predicated region fallthrough
CT: control target
= control target key end

     0   :  { %s1169_s18 = smov 0   ;;  %s1349_s0 = inlined_call_operand.vmem [shape: bf16[152,128], index: 0, kind: input, shape index: {}, may-alias: {0,1}]   ;;  %s1350_s1 = inlined_call_operand.vmem [shape: bf16[152,128], index: 1, kind: input, shape index: {}, may-alias: {0,1}]   ;;  %s1351_s2 = inlined_call_operand.vmem [shape: f32[144,1], index: 2, kind: input, shape index: {}]   ;;  %s1352_s3 = inlined_call_operand.vmem [shape: bf16[2,128,32], index: 3, kind: input, shape index: {}]   ;;  %s1353_s4 = inlined_call_operand.vmem [shape: bf16[144,32], index: 4, kind: output, shape index: {0}]   ;;  %s1354_s5 = inlined_call_operand.vmem [shape: f32[2,2,32], index: 5, kind: output, shape index: {1}]  }
   0x1 LB: > { %s1175_s19 = sadd.s32 4294967295, %s1134_s18   ;;  %p916_p0 = scmp.ge.s32.totalorder %s1134_s18, 1  ;;  %s1134_s18 = sphi %s1169_s18, %s16_s18  }
   0x2   : > { %p227_p1 = scmp.lt.s32.totalorder %s1134_s18, 3 }
   0x4   : > { %p228_p2 = pnand %p916_p0, %p227_p1 }
   0x5   : > { %v1103_v0 = vld [vmem:[%s1352_s3 + $0x40] sm:$0xff] (!%p228_p2)   ;;  %v1136_v1 = vmov (!%p228_p2), 0.0   ;;  %v1105_v3 = vld [vmem:[%s1352_s3 + $0x48] sm:$0xff] (!%p228_p2)   ;;  %vm1137_vm0 = vmmov (!%p228_p2), 0   ;;  %v1107_v5 = vld [vmem:[%s1352_s3 + $0x50] sm:$0xff] (!%p228_p2)   ;;  %s274_s7 = smul.u32 (!%p228_p2), 9, %s1175_s19 }
   0x6   : > { %231 = sbr.rel (%p228_p2) target bundleno = 305 (0x131), region = 36  ;;  %1009 = vmatprep.subr.bf16.mxu1 (!%p228_p2), %v1136_v1  ;;  %1045 = vmatprep.subr.bf16.mxu0 (!%p228_p2), %v1136_v1  ;;  %v1104_v2 = vld [vmem:[%s1352_s3] sm:$0xff] (!%p228_p2)   ;;  %v1106_v4 = vld [vmem:[%s1352_s3 + $0x8] sm:$0xff] (!%p228_p2)   ;;  %v1108_v6 = vld [vmem:[%s1352_s3 + $0x10] sm:$0xff] (!%p228_p2)   ;;  %v1138_v8 = vmov (!%p228_p2), 0   ;;  %s288_s14 = sadd.s32 (!%p228_p2), 1, %s1175_s19 }
   0x7   : > { %1010 = vmatpush3.bf16.msra.mxu1 (!%p228_p2), %v1103_v0  ;;  %1025 = vmatprep.mubr.msk.bf16.mxu1 (!%p228_p2), %vm1137_vm0, %v1136_v1  ;;  %v1109_v7 = vld [vmem:[%s1352_s3 + $0x58] sm:$0xff] (!%p228_p2)   ;;  %p297_p3 = scmp.lt.s32.totalorder (!%p228_p2), %s274_s7, 17  ;;  %p279_p4 = scmp.lt.s32.totalorder (!%p228_p2), %s274_s7, 18  ;;  %v1111_v10 = vld [vmem:[%s1352_s3 + $0x60] sm:$0xff] (!%p228_p2)   ;;  %v1113_v12 = vld [vmem:[%s1352_s3 + $0x68] sm:$0xff] (!%p228_p2)   ;;  %vm732_vm1 = vcmask (!%p228_p2), 257024  }
   0x8   : > { %1046 = vmatpush3.bf16.msra.mxu0 (!%p228_p2), %v1104_v2  ;;  %1011 = vmatprep.subr.bf16.mxu1 (!%p228_p2), %v1136_v1  ;;  %v1110_v9 = vld [vmem:[%s1352_s3 + $0x18] sm:$0xff] (!%p228_p2)   ;;  %v1112_v11 = vld [vmem:[%s1352_s3 + $0x20] sm:$0xff] (!%p228_p2)   ;;  %v1114_v13 = vld [vmem:[%s1352_s3 + $0x28] sm:$0xff] (!%p228_p2)   ;;  %s289_s15 = smul.u32 (!%p228_p2), 9, %s288_s14  ;;  %vm742_vm2 = vcmask (!%p228_p2), 261120   ;;  %p308_p6 = scmp.lt.s32.totalorder (!%p228_p2), %s1175_s19, 1 }
   0x9   : > { %1047 = vmatprep.subr.bf16.mxu0 (!%p228_p2), %v1136_v1  ;;  %1061 = vmatprep.mubr.msk.bf16.mxu0 (!%p228_p2), %vm1137_vm0, %v1136_v1  ;;  %v1115_v16 = vld [vmem:[%s1352_s3 + $0x70] sm:$0xff] (!%p228_p2)   ;;  %v1117_v20 = vld [vmem:[%s1352_s3 + $0x78] sm:$0xff] (!%p228_p2)   ;;  %vm766_vm3 = vcmask (!%p228_p2), 253952  }
   0xa   : > { %1101 = vset.pattern.permute.xlu0 (!%p228_p2), %v1138_v8  ;;  %1102 = vset.pattern.permute.xlu1 (!%p228_p2), %v1138_v8  ;;  %v1116_v17 = vld [vmem:[%s1352_s3 + $0x30] sm:$0xff] (!%p228_p2)   ;;  %v1118_v23 = vld [vmem:[%s1352_s3 + $0x38] sm:$0xff] (!%p228_p2)   ;;  %p290_p5 = scmp.lt.s32.totalorder (!%p228_p2), %s289_s15, 18 }
   0xb   : > { %1012 = vmatpush3.bf16.msra.mxu1 (!%p228_p2), %v1105_v3 }
   0xc   : > { %1048 = vmatpush3.bf16.msra.mxu0 (!%p228_p2), %v1106_v4  ;;  %1013 = vmatprep.subr.bf16.mxu1 (!%p228_p2), %v1136_v1 }
   0xd   : > { %1049 = vmatprep.subr.bf16.mxu0 %v1136_v1  ;;  %s1223_s16 = scalar_select %p297_p3, %s274_s7, 17 }
   0xe   : > { %s1356_s7 = smov (!%p279_p4, %s274_s7), 18  ;;  %s1358_s15 = smov (!%p290_p5, %s289_s15), 18 }
   0xf   : > { %1014 = vmatpush3.bf16.msra.mxu1 %v1107_v5  ;;  %s919_s23 = sshll.u32 %s1223_s16, 3  ;;  %s917_s24 = sshll.u32 %s1356_s7, 2 }
  0x10   : > { %1050 = vmatpush3.bf16.msra.mxu0 %v1108_v6  ;;  %1015 = vmatprep.subr.bf16.mxu1 %v1136_v1  ;;  %s1238_s27 = scalar_lea.vmem %s1351_s2, %s919_s23  ;;  %s1252_s9 = scalar_lea.vmem %s1349_s0, %s917_s24 }
  0x11   : > { %1051 = vmatprep.subr.bf16.mxu0 %v1136_v1  ;;  %v632_v14 = vld [vmem:[%s1238_s27] sm:$0xff]  ;;  %v634_v15 = vld [vmem:[%s1238_s27 + $0x10] sm:$0xff]  ;;  %v633_v18 = vld [vmem:[%s1238_s27 + $0x8] sm:$0xff]  ;;  %s918_s17 = sshll.u32 %s1358_s15, 2  ;;  %s920_s23 = sshll.u32 %s1223_s16, 2 }
  0x12   : > { %643 = vperm.xlu0 %1101, %v632_v14   ;;  %653 = vperm.xlu1 %1102, %v634_v15   ;;  %v635_v19 = vld [vmem:[%s1238_s27 + $0x18] sm:$0xff]  ;;  %v314_v21 = vld [vmem:[%s1252_s9 + $0x4] sm:$0xf]  ;;  %v315_v22 = vld [vmem:[%s1252_s9 + $0x8] sm:$0xf]  ;;  %s293_s22 = scalar_lea.vmem %s1350_s1, %s918_s17  ;;  %s1303_s26 = scalar_lea.vmem %s1353_s4, %s920_s23 }
  0x13   : > { %1016 = vmatpush3.bf16.msra.mxu1 %v1109_v7  ;;  %v313_v24 = vld [vmem:[%s1252_s9] sm:$0xf]  ;;  %v922_v26 = vcombine.low %v314_v21, %v315_v22  ;;  %v637_v27 = vld [vmem:[%s1238_s27 + $0x28] sm:$0xff]  ;;  %v638_v29 = vld [vmem:[%s1238_s27 + $0x30] sm:$0xff]  ;;  %s1360_s19 = smov (!%p308_p6, %s1175_s19), 1 }
  0x14   : > { %1052 = vmatpush3.bf16.msra.mxu0 %v1110_v9  ;;  %1017 = vmatprep.subr.bf16.mxu1 %v1136_v1  ;;  %v636_v25 = vld [vmem:[%s1238_s27 + $0x20] sm:$0xff]  ;;  %v950_v28 = vcombine.low %v313_v24, %v314_v21  ;;  %v639_v30 = vld [vmem:[%s1238_s27 + $0x38] sm:$0xff]  ;;  %v316_v31 = vld [vmem:[%s1252_s9 + $0xc] sm:$0xf]  ;;  %s921_s16 = sshll.u32 %s1360_s19, 1 }
  0x15   : > { %1053 = vmatprep.subr.bf16.mxu0 %v1136_v1  ;;  %v317_v32 = vld [vmem:[%s1252_s9 + $0x10] sm:$0xf]  ;;  %v640_v33 = vld [vmem:[%s1238_s27 + $0x40] sm:$0xff]  ;;  %v951_v35 = vcombine.low %v315_v22, %v316_v31  ;;  %v318_v36 = vld [vmem:[%s1252_s9 + $0x14] sm:$0xf]  ;;  %s311_s29 = scalar_lea.vmem %s1354_s5, %s921_s16 }
  0x16   : > { %648 = vperm.xlu0 %1101, %v633_v18   ;;  %658 = vperm.xlu1 %1102, %v635_v19   ;;  %v923_v34 = vcombine.low %v316_v31, %v317_v32  ;;  %v319_v37 = vld [vmem:[%s1252_s9 + $0x18] sm:$0xf]  ;;  %v952_v39 = vcombine.low %v317_v32, %v318_v36  ;;  %v320_v40 = vld [vmem:[%s1252_s9 + $0x1c] sm:$0xf]  ;;  %v321_v41 = vld [vmem:[%s1252_s9 + $0x20] sm:$0xf] }
  0x17   : > { %1018 = vmatpush3.bf16.msra.mxu1 %v1111_v10  ;;  %v924_v38 = vcombine.low %v318_v36, %v319_v37  ;;  %v925_v42 = vcombine.low %v320_v40, %v321_v41  ;;  %v953_v43 = vcombine.low %v319_v37, %v320_v40  ;;  %v338_v44 = vld [vmem:[%s293_s22] sm:$0xf]  ;;  %v954_v45 = vcombine.low %v321_v41, %v321_v41 }
  0x18   : > { %1054 = vmatpush3.bf16.msra.mxu0 %v1112_v11  ;;  %1019 = vmatprep.subr.bf16.mxu1 %v1136_v1 }
  0x19   : > { %1055 = vmatprep.subr.bf16.mxu0 %v1136_v1 }
  0x1a   : > { %663 = vperm.xlu0 %1101, %v636_v25   ;;  %668 = vperm.xlu1 %1102, %v637_v27  }
  0x1b   : > { %1020 = vmatpush3.bf16.msra.mxu1 %v1113_v12 }
  0x1c   : > { %1056 = vmatpush3.bf16.msra.mxu0 %v1114_v13  ;;  %1021 = vmatprep.subr.bf16.mxu1 %v1136_v1 }
  0x1d   : > { %1057 = vmatprep.subr.bf16.mxu0 %v1136_v1 }
  0x1e   : > { %673 = vperm.xlu0 %1101, %v638_v29   ;;  %678 = vperm.xlu1 %1102, %v639_v30  }
  0x1f   : > { %1022 = vmatpush3.bf16.msra.mxu1 %v1115_v16 }
  0x20   : > { %1058 = vmatpush3.bf16.msra.mxu0 %v1116_v17  ;;  %1023 = vmatprep.subr.bf16.mxu1 %v1136_v1 }
  0x21   : > { %1059 = vmatprep.subr.bf16.mxu0 %v1136_v1 }
  0x22   : > { %683 = vperm.xlu0 %1101, %v640_v33  }
  0x23   : > { %1024 = vmatpush3.bf16.msra.mxu1 %v1117_v20 }
  0x24   : > { %1060 = vmatpush3.bf16.msra.mxu0 %v1118_v23 }
  0x26   : > { %1026 = vmatmul.mubr.bf16.vlgmr.msra.gmra.mrb[0].mxu1 %v922_v26 }
  0x27   : > { %1062 = vmatmul.mubr.bf16.vlgmr.msra.gmra.mrb[0].mxu0 %v950_v28  ;;  %1029 = vmatprep.mubr.msk.bf16.mxu1 %vm1137_vm0, %v1136_v1 }
  0x28   : > { %1065 = vmatprep.mubr.msk.bf16.mxu0 %vm1137_vm0, %v1136_v1 }
  0x2e   : > { %1030 = vmatmul.mubr.bf16.gmra.mrb[4].mxu1 %v923_v34 }
  0x2f   : > { %1066 = vmatmul.mubr.bf16.gmra.mrb[4].mxu0 %v951_v35  ;;  %1033 = vmatprep.mubr.msk.bf16.mxu1 %vm1137_vm0, %v1136_v1 }
  0x30   : > { %1069 = vmatprep.mubr.msk.bf16.mxu0 %vm1137_vm0, %v1136_v1 }
  0x36   : > { %1034 = vmatmul.mubr.bf16.gmra.mrb[8].mxu1 %v924_v38 }
  0x37   : > { %1070 = vmatmul.mubr.bf16.gmra.mrb[8].mxu0 %v952_v39  ;;  %1037 = vmatprep.mubr.msk.bf16.mxu1 %vm1137_vm0, %v1136_v1 }
  0x38   : > { %1073 = vmatprep.mubr.msk.bf16.mxu0 %vm1137_vm0, %v1136_v1 }
  0x3e   : > { %1038 = vmatmul.mubr.bf16.gmra.mrb[12].mxu1 %v925_v42 }
  0x3f   : > { %1074 = vmatmul.mubr.bf16.gmra.mrb[12].mxu0 %v953_v43  ;;  %1041 = vmatprep.mubr.msk.bf16.mxu1 %vm1137_vm0, %v1136_v1 }
  0x40   : > { %1077 = vmatprep.mubr.msk.bf16.mxu0 %vm1137_vm0, %v1136_v1 }
  0x46   : > { %1042 = vmatmul.mubr.bf16.gmra.mrb[16].mxu1 %v338_v44 }
  0x47   : > { %1078 = vmatmul.mubr.bf16.gmra.mrb[16].mxu0 %v954_v45 }
  0x91   : > { %v644_v46 = vpop.permute.xlu0 %643  ;;  %v654_v47 = vpop.permute.xlu1 %653 }
  0x95   : > { %v649_v49 = vpop.permute.xlu0 %648  ;;  %v659_v4 = vpop.permute.xlu1 %658 }
  0x99   : > { %v664_v24 = vpop.permute.xlu0 %663  ;;  %v669_v44 = vpop.permute.xlu1 %668 }
  0xf9   : > { %v462_v48 = vpop.f32.mrb[0].mxu1 }
  0xfa   : > { %v594_v50 = vpop.f32.mrb[0].mxu0  ;;  %v1027_v51 = vpop.f32.mrb[1].mxu1 }
  0xfb   : > { %v595_v52 = vadd.f32 %v594_v50, %v462_v48  ;;  %v1063_v53 = vpop.f32.mrb[1].mxu0  ;;  %v465_v54 = vpop.f32.mrb[2].mxu1 }
  0xfc   : > { %v597_v55 = vpop.f32.mrb[2].mxu0  ;;  %v1028_v56 = vpop.f32.mrb[3].mxu1 }
  0xfd   : > { %v686_v57 = vmul.f32 %v644_v46, %v595_v52  ;;  %v598_v58 = vadd.f32 %v597_v55, %v465_v54  ;;  %v1064_v59 = vpop.f32.mrb[3].mxu0  ;;  %v674_v50 = vpop.permute.xlu0 %673 }
  0xff   : > { %v974_v60 = vpack.c.bf16 %v686_v57, %v686_v57  ;;  %v768_v61 = vmul.f32 %v686_v57, %v686_v57  ;;  %v687_v62 = vmul.f32 %v649_v49, %v598_v58  ;;  %v743_v0 = vsel %vm742_vm2, %v686_v57, 0.0 }
 0x101   : > { %733 = vst.msk [vmem:[%s1303_s26] sm:$0xf] %vm732_vm1, %v974_v60  ;;  %v975_v63 = vpack.c.bf16 %v687_v62, %v687_v62  ;;  %v744_v1 = vsel %vm742_vm2, %v687_v62, 0.0  ;;  %v769_v2 = vmul.f32 %v687_v62, %v687_v62  ;;  %v470_v3 = vpop.f32.mrb[4].mxu1  ;;  %v777_v8 = vsel %vm742_vm2, %v768_v61, 0.0 }
 0x102   : > { %v745_v5 = vadd.f32 %v744_v1, %v743_v0  ;;  %v602_v6 = vpop.f32.mrb[4].mxu0  ;;  %v1031_v7 = vpop.f32.mrb[5].mxu1 }
 0x103   : > { %734 = vst.msk [vmem:[%s1303_s26 + $0x4] sm:$0xf] %vm732_vm1, %v975_v63  ;;  %v778_v9 = vsel %vm742_vm2, %v769_v2, 0.0  ;;  %v603_v10 = vadd.f32 %v602_v6, %v470_v3  ;;  %v1067_v11 = vpop.f32.mrb[5].mxu0  ;;  %v473_v12 = vpop.f32.mrb[6].mxu1 }
 0x104   : > { %v779_v13 = vadd.f32 %v778_v9, %v777_v8  ;;  %v605_v14 = vpop.f32.mrb[6].mxu0  ;;  %v1032_v15 = vpop.f32.mrb[7].mxu1 }
 0x105   : > { %v688_v16 = vmul.f32 %v654_v47, %v603_v10  ;;  %v606_v17 = vadd.f32 %v605_v14, %v473_v12  ;;  %v1068_v18 = vpop.f32.mrb[7].mxu0  ;;  %v679_v6 = vpop.permute.xlu1 %678 }
 0x106   : > { %v684_v12 = vpop.permute.xlu0 %683 }
 0x107   : > { %v976_v19 = vpack.c.bf16 %v688_v16, %v688_v16  ;;  %v746_v20 = vsel %vm742_vm2, %v688_v16, 0.0  ;;  %v770_v21 = vmul.f32 %v688_v16, %v688_v16  ;;  %v689_v22 = vmul.f32 %v659_v4, %v606_v17 }
 0x108   : > { %v747_v23 = vadd.f32 %v746_v20, %v745_v5 }
 0x109   : > { %735 = vst.msk [vmem:[%s1303_s26 + $0x8] sm:$0xf] %vm732_vm1, %v976_v19  ;;  %v780_v25 = vsel %vm742_vm2, %v770_v21, 0.0  ;;  %v977_v26 = vpack.c.bf16 %v689_v22, %v689_v22  ;;  %v748_v27 = vsel %vm742_vm2, %v689_v22, 0.0  ;;  %v771_v28 = vmul.f32 %v689_v22, %v689_v22  ;;  %v478_v29 = vpop.f32.mrb[8].mxu1 }
 0x10a   : > { %v749_v30 = vadd.f32 %v748_v27, %v747_v23  ;;  %v781_v31 = vadd.f32 %v780_v25, %v779_v13  ;;  %v610_v32 = vpop.f32.mrb[8].mxu0  ;;  %v1035_v33 = vpop.f32.mrb[9].mxu1 }
 0x10b   : > { %736 = vst.msk [vmem:[%s1303_s26 + $0xc] sm:$0xf] %vm732_vm1, %v977_v26  ;;  %v782_v34 = vsel %vm742_vm2, %v771_v28, 0.0  ;;  %v611_v35 = vadd.f32 %v610_v32, %v478_v29  ;;  %v1071_v36 = vpop.f32.mrb[9].mxu0  ;;  %v481_v37 = vpop.f32.mrb[10].mxu1 }
 0x10c   : > { %v783_v38 = vadd.f32 %v782_v34, %v781_v31  ;;  %v613_v39 = vpop.f32.mrb[10].mxu0  ;;  %v1036_v40 = vpop.f32.mrb[11].mxu1 }
 0x10d   : > { %v690_v41 = vmul.f32 %v664_v24, %v611_v35  ;;  %v614_v42 = vadd.f32 %v613_v39, %v481_v37  ;;  %v1072_v43 = vpop.f32.mrb[11].mxu0 }
 0x10f   : > { %v978_v45 = vpack.c.bf16 %v690_v41, %v690_v41  ;;  %v750_v46 = vsel %vm742_vm2, %v690_v41, 0.0  ;;  %v772_v47 = vmul.f32 %v690_v41, %v690_v41  ;;  %v691_v48 = vmul.f32 %v669_v44, %v614_v42 }
 0x110   : > { %v751_v49 = vadd.f32 %v750_v46, %v749_v30 }
 0x111   : > { %737 = vst.msk [vmem:[%s1303_s26 + $0x10] sm:$0xf] %vm732_vm1, %v978_v45  ;;  %v784_v51 = vsel %vm742_vm2, %v772_v47, 0.0  ;;  %v979_v52 = vpack.c.bf16 %v691_v48, %v691_v48  ;;  %v752_v53 = vsel %vm742_vm2, %v691_v48, 0.0  ;;  %v773_v54 = vmul.f32 %v691_v48, %v691_v48  ;;  %v486_v55 = vpop.f32.mrb[12].mxu1 }
 0x112   : > { %v785_v56 = vadd.f32 %v784_v51, %v783_v38  ;;  %v753_v57 = vadd.f32 %v752_v53, %v751_v49  ;;  %v618_v58 = vpop.f32.mrb[12].mxu0  ;;  %v1039_v59 = vpop.f32.mrb[13].mxu1 }
 0x113   : > { %738 = vst.msk [vmem:[%s1303_s26 + $0x14] sm:$0xf] %vm732_vm1, %v979_v52  ;;  %v786_v60 = vsel %vm742_vm2, %v773_v54, 0.0  ;;  %v619_v61 = vadd.f32 %v618_v58, %v486_v55  ;;  %v1075_v62 = vpop.f32.mrb[13].mxu0  ;;  %v489_v63 = vpop.f32.mrb[14].mxu1 }
 0x114   : > { %v787_v0 = vadd.f32 %v786_v60, %v785_v56  ;;  %v621_v1 = vpop.f32.mrb[14].mxu0  ;;  %v1040_v2 = vpop.f32.mrb[15].mxu1 }
 0x115   : > { %v692_v3 = vmul.f32 %v674_v50, %v619_v61  ;;  %v622_v4 = vadd.f32 %v621_v1, %v489_v63  ;;  %v1076_v5 = vpop.f32.mrb[15].mxu0 }
 0x117   : > { %v980_v7 = vpack.c.bf16 %v692_v3, %v692_v3  ;;  %v754_v8 = vsel %vm742_vm2, %v692_v3, 0.0  ;;  %v774_v9 = vmul.f32 %v692_v3, %v692_v3  ;;  %v693_v10 = vmul.f32 %v679_v6, %v622_v4 }
 0x118   : > { %v755_v11 = vadd.f32 %v754_v8, %v753_v57 }
 0x119   : > { %739 = vst.msk [vmem:[%s1303_s26 + $0x18] sm:$0xf] %vm732_vm1, %v980_v7  ;;  %v788_v13 = vsel %vm742_vm2, %v774_v9, 0.0  ;;  %v981_v14 = vpack.c.bf16 %v693_v10, %v693_v10  ;;  %v756_v15 = vsel %vm742_vm2, %v693_v10, 0.0  ;;  %v775_v16 = vmul.f32 %v693_v10, %v693_v10  ;;  %v494_v17 = vpop.f32.mrb[16].mxu1 }
 0x11a   : > { %v789_v18 = vadd.f32 %v788_v13, %v787_v0  ;;  %v757_v19 = vadd.f32 %v756_v15, %v755_v11  ;;  %v626_v20 = vpop.f32.mrb[16].mxu0  ;;  %v1043_v21 = vpop.f32.mrb[17].mxu1 }
 0x11b   : > { %740 = vst.msk [vmem:[%s1303_s26 + $0x1c] sm:$0xf] %vm732_vm1, %v981_v14  ;;  %v790_v22 = vsel %vm742_vm2, %v775_v16, 0.0  ;;  %v627_v23 = vadd.f32 %v626_v20, %v494_v17  ;;  %v1079_v24 = vpop.f32.mrb[17].mxu0  ;;  %v497_v25 = vpop.f32.mrb[18].mxu1 }
 0x11c   : > { %v791_v26 = vadd.f32 %v790_v22, %v789_v18  ;;  %v629_v27 = vpop.f32.mrb[18].mxu0  ;;  %v1044_v28 = vpop.f32.mrb[19].mxu1 }
 0x11d   : > { %v694_v29 = vmul.f32 %v684_v12, %v627_v23  ;;  %v1080_v30 = vpop.f32.mrb[19].mxu0 }
 0x11f   : > { %v982_v31 = vpack.c.bf16 %v694_v29, %v694_v29  ;;  %v758_v32 = vsel %vm742_vm2, %v694_v29, 0.0  ;;  %v776_v33 = vmul.f32 %v694_v29, %v694_v29 }
 0x120   : > { %v759_v34 = vadd.f32 %v758_v32, %v757_v19 }
 0x121   : > { %741 = vst.msk [vmem:[%s1303_s26 + $0x20] sm:$0xf] %vm732_vm1, %v982_v31  ;;  %v792_v35 = vsel %vm742_vm2, %v776_v33, 0.0 }
 0x122   : > { %v760_v36 = vrot.slane %v759_v34, 4  ;;  %v793_v37 = vadd.f32 %v792_v35, %v791_v26 }
 0x124   : > { %v761_v38 = vadd.f32 %v760_v36, %v759_v34  ;;  %v794_v39 = vrot.slane %v793_v37, 4 }
 0x126   : > { %v762_v40 = vrot.slane %v761_v38, 2  ;;  %v795_v41 = vadd.f32 %v794_v39, %v793_v37 }
 0x128   : > { %v763_v42 = vadd.f32 %v762_v40, %v761_v38  ;;  %v796_v43 = vrot.slane %v795_v41, 2 }
 0x12a   : > { %v764_v44 = vrot.slane %v763_v42, 1  ;;  %v797_v45 = vadd.f32 %v796_v43, %v795_v41 }
 0x12c   : > { %v765_v46 = vadd.f32 %v764_v44, %v763_v42  ;;  %v798_v47 = vrot.slane %v797_v45, 1 }
 0x12e   : > { %767 = vst.msk [vmem:[%s311_s29] sm:$0x1] %vm766_vm3, %v765_v46  ;;  %v799_v48 = vadd.f32 %v798_v47, %v797_v45 }
 0x130   : > { %800 = vst.msk [vmem:[%s311_s29 + $0x1] sm:$0x1] %vm766_vm3, %v799_v48 }
 0x131 PF: > { %s16_s18 = sadd.s32 1, %s1134_s18  }
 0x132   : > { %p13_p7 = scmp.ge.s32.totalorder %s16_s18, 4  }
 0x134   :  { %15 = sbr.rel (!%p13_p7) target bundleno = 1 (0x1), region = 85 }

// kernel: critic_forward.9
= control target key start
LH: loop header
LB: loop body
LE: loop exit
PB: predicated region body
PF: predicated region fallthrough
CT: control target
= control target key end

     0   :  { %v15_v0 = vlaneseq  ;;  %v154_v1 = vmov 1983009808   ;;  %vm129_vm0 = vcmask 1041408   ;;  %vm147_vm1 = vcmask 1024   ;;  %s190_s1 = inlined_call_operand.vmem [shape: f32[1,1024], index: 1, kind: input, shape index: {}]   ;;  %s191_s0 = inlined_call_operand.vmem [shape: f32[2,1024], index: 0, kind: input, shape index: {}]   ;;  %s192_s2 = inlined_call_operand.vmem [shape: f32[2,1], index: 2, kind: output, shape index: {}]  }
   0x1   :  { %v50_v2 = vunpack.c.l.s4 %v154_v1  ;;  %v13_v4 = vld [vmem:[%s190_s1] sm:$0xff]  ;;  %v12_v32 = vld [vmem:[%s191_s0 + $0x8] sm:$0xff] }
   0x2   :  { %v16_v3 = vshrl.u32 %v15_v0, 7  ;;  %v11_v29 = vld [vmem:[%s191_s0] sm:$0xff] }
   0x3   :  { %v51_v5 = vunpack.c.0.s8 %v50_v2 }
   0x4   :  { %v17_v6 = vsub.s32 0, %v16_v3  ;;  %v21_v7 = vsub.s32 1, %v16_v3  ;;  %v25_v8 = vsub.s32 2, %v16_v3  ;;  %v29_v9 = vsub.s32 3, %v16_v3 }
   0x5   :  { %v33_v10 = vsub.s32 4, %v16_v3  ;;  %v37_v11 = vsub.s32 5, %v16_v3  ;;  %v41_v12 = vsub.s32 6, %v16_v3  ;;  %v45_v13 = vsub.s32 7, %v16_v3 }
   0x6   :  { %v18_v14 = vrot.slane %v13_v4, %v17_v6  ;;  %v22_v15 = vrot.slane %v13_v4, %v21_v7  ;;  %v26_v16 = vrot.slane %v13_v4, %v25_v8  ;;  %v30_v17 = vrot.slane %v13_v4, %v29_v9 }
   0x7   :  { %v34_v18 = vrot.slane %v13_v4, %v33_v10  ;;  %v38_v19 = vrot.slane %v13_v4, %v37_v11  ;;  %v42_v20 = vrot.slane %v13_v4, %v41_v12  ;;  %v46_v21 = vrot.slane %v13_v4, %v45_v13 }
   0x8   :  { %v47_v22 = vcombine.low %v18_v14, %v22_v15  ;;  %v48_v23 = vcombine.low %v26_v16, %v30_v17  ;;  %v54_v24 = vsub.s32 %v51_v5, %v16_v3 }
   0x9   :  { %v64_v25 = vcombine.low %v34_v18, %v38_v19  ;;  %v65_v26 = vcombine.low %v42_v20, %v46_v21 }
   0xa   :  { %v55_v27 = vrot.slane %v47_v22, %v54_v24  ;;  %v62_v28 = vrot.slane %v48_v23, %v54_v24 }
   0xb   :  { %v72_v30 = vrot.slane %v64_v25, %v54_v24  ;;  %v79_v31 = vrot.slane %v65_v26, %v54_v24 }
   0xc   :  { %v63_v33 = vcombine.low %v55_v27, %v62_v28 }
   0xd   :  { %v80_v34 = vcombine.low %v72_v30, %v79_v31 }
   0xe   :  { %v83_v35 = vmul.f32 %v63_v33, %v11_v29 }
   0xf   :  { %v84_v36 = vmul.f32 %v80_v34, %v12_v32 }
  0x10   :  { %v87_v37 = vcombine.high %v83_v35, %v83_v35  ;;  %v94_v38 = vrot.slane %v83_v35, %v54_v24 }
  0x11   :  { %v104_v39 = vcombine.high %v84_v36, %v84_v36  ;;  %v111_v42 = vrot.slane %v84_v36, %v54_v24 }
  0x12   :  { %v101_v40 = vrot.slane %v87_v37, %v54_v24  ;;  %v102_v41 = vcombine.high %v94_v38, %v94_v38  ;;  %v130_v43 = vsel %vm129_vm0, %v94_v38, 0.0 }
  0x13   :  { %v118_v48 = vrot.slane %v104_v39, %v54_v24  ;;  %v119_v49 = vcombine.high %v111_v42, %v111_v42  ;;  %v137_v52 = vsel %vm129_vm0, %v111_v42, 0.0 }
  0x14   :  { %v103_v44 = vcombine.high %v101_v40, %v101_v40  ;;  %v131_v45 = vsel %vm129_vm0, %v102_v41, 0.0  ;;  %v133_v46 = vsel %vm129_vm0, %v101_v40, 0.0 }
  0x15   :  { %v132_v47 = vadd.f32 %v131_v45, %v130_v43  ;;  %v120_v54 = vcombine.high %v118_v48, %v118_v48  ;;  %v139_v55 = vsel %vm129_vm0, %v119_v49, 0.0  ;;  %v141_v57 = vsel %vm129_vm0, %v118_v48, 0.0 }
  0x16   :  { %v135_v50 = vsel %vm129_vm0, %v103_v44, 0.0 }
  0x17   :  { %v134_v51 = vadd.f32 %v133_v46, %v132_v47  ;;  %v143_v59 = vsel %vm129_vm0, %v120_v54, 0.0 }
  0x19   :  { %v136_v53 = vadd.f32 %v135_v50, %v134_v51 }
  0x1b   :  { %v138_v56 = vadd.f32 %v137_v52, %v136_v53 }
  0x1d   :  { %v140_v58 = vadd.f32 %v139_v55, %v138_v56 }
  0x1f   :  { %v142_v60 = vadd.f32 %v141_v57, %v140_v58 }
  0x21   :  { %v144_v61 = vadd.f32 %v143_v59, %v142_v60 }
  0x23   :  { %145 = vadd.xlane.f32.xlu0 %v144_v61 }
  0xb0   :  { %v146_v62 = vpop.xlane.xlu0 %145 }
  0xb1   :  { %148 = vst.msk [vmem:[%s192_s2] sm:$0x3] %vm147_vm1, %v146_v62 }

// kernel: critic_forward.8
= control target key start
LH: loop header
LB: loop body
LE: loop exit
PB: predicated region body
PF: predicated region fallthrough
CT: control target
= control target key end

     0   :  { %s1217_s18 = smov 0   ;;  %s1371_s0 = inlined_call_operand.vmem [shape: bf16[88,256], index: 0, kind: input, shape index: {}, may-alias: {0,1}]   ;;  %s1372_s1 = inlined_call_operand.vmem [shape: bf16[88,256], index: 1, kind: input, shape index: {}, may-alias: {0,1}]   ;;  %s1373_s2 = inlined_call_operand.vmem [shape: f32[80,1], index: 2, kind: input, shape index: {}]   ;;  %s1374_s3 = inlined_call_operand.vmem [shape: bf16[2,256,64], index: 3, kind: input, shape index: {}]   ;;  %s1375_s4 = inlined_call_operand.vmem [shape: bf16[80,64], index: 4, kind: output, shape index: {0}]   ;;  %s1376_s5 = inlined_call_operand.vmem [shape: f32[2,2,64], index: 5, kind: output, shape index: {1}]  }
   0x1 LB: > { %s1223_s19 = sadd.s32 4294967295, %s1184_s18   ;;  %p957_p0 = scmp.ge.s32.totalorder %s1184_s18, 1  ;;  %s1184_s18 = sphi %s1217_s18, %s16_s18  }
   0x2   : > { %p231_p1 = scmp.lt.s32.totalorder %s1184_s18, 3 }
   0x4   : > { %p232_p2 = pnand %p957_p0, %p231_p1 }
   0x5   : > { %v1134_v0 = vld [vmem:[%s1374_s3 + $0xc0] sm:$0xff] (!%p232_p2)   ;;  %v1138_v4 = vld [vmem:[%s1374_s3 + $0xc8] sm:$0xff] (!%p232_p2)   ;;  %v1142_v8 = vld [vmem:[%s1374_s3 + $0xd0] sm:$0xff] (!%p232_p2)   ;;  %v1186_v9 = vmov (!%p232_p2), 0   ;;  %s281_s27 = smul.u32 (!%p232_p2), 5, %s1223_s19  ;;  %s298_s9 = sadd.s32 (!%p232_p2), 1, %s1223_s19 }
   0x6   : > { %235 = sbr.rel (%p232_p2) target bundleno = 294 (0x126), region = 36  ;;  %v1135_v1 = vld [vmem:[%s1374_s3 + $0x40] sm:$0xff] (!%p232_p2)   ;;  %1055 = vmatprep.subr.bf16.mxu0 (!%p232_p2), %v1134_v0  ;;  %v1139_v5 = vld [vmem:[%s1374_s3 + $0x48] sm:$0xff] (!%p232_p2)   ;;  %1132 = vset.pattern.permute.xlu0 (!%p232_p2), %v1186_v9  ;;  %v1143_v10 = vld [vmem:[%s1374_s3 + $0x50] sm:$0xff] (!%p232_p2)   ;;  %vm797_vm0 = vcmask (!%p232_p2), 519168   ;;  %vm803_vm1 = vcmask (!%p232_p2), 523264  }
   0x7   : > { %v1136_v2 = vld [vmem:[%s1374_s3 + $0x80] sm:$0xff] (!%p232_p2)   ;;  %1089 = vmatprep.subr.bf16.mxu1 (!%p232_p2), %v1135_v1  ;;  %v1140_v6 = vld [vmem:[%s1374_s3 + $0x88] sm:$0xff] (!%p232_p2)   ;;  %1133 = vset.pattern.permute.xlu1 (!%p232_p2), %v1186_v9  ;;  %v1144_v11 = vld [vmem:[%s1374_s3 + $0x90] sm:$0xff] (!%p232_p2)   ;;  %p287_p3 = scmp.lt.s32.totalorder (!%p232_p2), %s281_s27, 10  ;;  %s299_s16 = smul.u32 (!%p232_p2), 5, %s298_s9  ;;  %vm819_vm2 = vcmask (!%p232_p2), 516096  }
   0x8   : > { %v1137_v3 = vld [vmem:[%s1374_s3] sm:$0xff] (!%p232_p2)   ;;  %1056 = vmatpush3.bf16.msra.mxu0 (!%p232_p2), %v1136_v2  ;;  %v1141_v7 = vld [vmem:[%s1374_s3 + $0x8] sm:$0xff] (!%p232_p2)   ;;  %v1145_v12 = vld [vmem:[%s1374_s3 + $0x10] sm:$0xff] (!%p232_p2)   ;;  %p308_p4 = scmp.lt.s32.totalorder (!%p232_p2), %s281_s27, 9  ;;  %p319_p6 = scmp.lt.s32.totalorder (!%p232_p2), %s1223_s19, 1 }
   0x9   : > { %1090 = vmatpush3.bf16.msra.mxu1 (!%p232_p2), %v1137_v3  ;;  %1057 = vmatprep.subr.bf16.mxu0 (!%p232_p2), %v1138_v4  ;;  %v1146_v13 = vld [vmem:[%s1374_s3 + $0xd8] sm:$0xff] (!%p232_p2)   ;;  %v1150_v17 = vld [vmem:[%s1374_s3 + $0xe0] sm:$0xff] (!%p232_p2)   ;;  %v1154_v21 = vld [vmem:[%s1374_s3 + $0xe8] sm:$0xff] (!%p232_p2)   ;;  %p300_p5 = scmp.lt.s32.totalorder (!%p232_p2), %s299_s16, 10 }
   0xa   : > { %1091 = vmatprep.subr.bf16.mxu1 (!%p232_p2), %v1139_v5  ;;  %v1147_v14 = vld [vmem:[%s1374_s3 + $0x58] sm:$0xff] (!%p232_p2)   ;;  %v1151_v18 = vld [vmem:[%s1374_s3 + $0x60] sm:$0xff] (!%p232_p2)   ;;  %v1155_v22 = vld [vmem:[%s1374_s3 + $0x68] sm:$0xff] (!%p232_p2)  }
   0xb   : > { %v1148_v15 = vld [vmem:[%s1374_s3 + $0x98] sm:$0xff] (!%p232_p2)   ;;  %v1152_v19 = vld [vmem:[%s1374_s3 + $0xa0] sm:$0xff] (!%p232_p2)   ;;  %v1156_v23 = vld [vmem:[%s1374_s3 + $0xa8] sm:$0xff] (!%p232_p2)  }
   0xc   : > { %1058 = vmatpush3.bf16.msra.mxu0 (!%p232_p2), %v1140_v6  ;;  %v1149_v16 = vld [vmem:[%s1374_s3 + $0x18] sm:$0xff] (!%p232_p2)   ;;  %v1153_v20 = vld [vmem:[%s1374_s3 + $0x20] sm:$0xff] (!%p232_p2)   ;;  %v1157_v24 = vld [vmem:[%s1374_s3 + $0x28] sm:$0xff] (!%p232_p2)  }
   0xd   : > { %1092 = vmatpush3.bf16.msra.mxu1 %v1141_v7  ;;  %1059 = vmatprep.subr.bf16.mxu0 %v1142_v8  ;;  %s288_s23 = scalar_select %p287_p3, %s281_s27, 10  ;;  %v1158_v25 = vld [vmem:[%s1374_s3 + $0xf0] sm:$0xff]   ;;  %v1162_v29 = vld [vmem:[%s1374_s3 + $0xf8] sm:$0xff]  }
   0xe   : > { %1093 = vmatprep.subr.bf16.mxu1 %v1143_v10  ;;  %v1159_v26 = vld [vmem:[%s1374_s3 + $0x70] sm:$0xff]   ;;  %s1378_s27 = smov (!%p308_p4, %s281_s27), 9  ;;  %s1380_s16 = smov (!%p300_p5, %s299_s16), 10  ;;  %v1163_v30 = vld [vmem:[%s1374_s3 + $0x78] sm:$0xff]  }
   0xf   : > { %v1160_v27 = vld [vmem:[%s1374_s3 + $0xb0] sm:$0xff]   ;;  %s1048_s8 = sshll.u32 %s288_s23, 3  ;;  %s962_s21 = sshll.u32 %s1378_s27, 3  ;;  %v1164_v31 = vld [vmem:[%s1374_s3 + $0xb8] sm:$0xff]  }
  0x10   : > { %1060 = vmatpush3.bf16.msra.mxu0 %v1144_v11  ;;  %v1161_v28 = vld [vmem:[%s1374_s3 + $0x30] sm:$0xff]   ;;  %s291_s20 = scalar_lea.vmem %s1371_s0, %s1048_s8  ;;  %v1165_v32 = vld [vmem:[%s1374_s3 + $0x38] sm:$0xff]   ;;  %s1049_s26 = sshll.u32 %s1380_s16, 3 }
  0x11   : > { %1094 = vmatpush3.bf16.msra.mxu1 %v1145_v12  ;;  %1061 = vmatprep.subr.bf16.mxu0 %v1146_v13  ;;  %v325_v33 = vld [vmem:[%s291_s20 + $0x8] sm:$0xff]  ;;  %v326_v34 = vld [vmem:[%s291_s20 + $0x10] sm:$0xff]  ;;  %v324_v35 = vld [vmem:[%s291_s20] sm:$0xff]  ;;  %s311_s30 = scalar_lea.vmem %s1373_s2, %s962_s21  ;;  %s304_s8 = scalar_lea.vmem %s1372_s1, %s1049_s26 }
  0x12   : > { %1095 = vmatprep.subr.bf16.mxu1 %v1147_v14  ;;  %v966_v36 = vcombine.high %v325_v33, %v326_v34  ;;  %v1019_v37 = vcombine.low %v324_v35, %v325_v33  ;;  %v1020_v38 = vcombine.high %v324_v35, %v325_v33  ;;  %v965_v39 = vcombine.low %v325_v33, %v326_v34  ;;  %v327_v40 = vld [vmem:[%s291_s20 + $0x18] sm:$0xff]  ;;  %v328_v41 = vld [vmem:[%s291_s20 + $0x20] sm:$0xff]  ;;  %v743_v45 = vld [vmem:[%s311_s30 + $0x10] sm:$0xff]  ;;  %s963_s16 = sshll.u32 %s1378_s27, 2  ;;  %s1382_s19 = smov (!%p319_p6, %s1223_s19), 1 }
  0x13   : > { %v968_v42 = vcombine.high %v327_v40, %v328_v41  ;;  %v1022_v43 = vcombine.high %v326_v34, %v327_v40  ;;  %v741_v44 = vld [vmem:[%s311_s30] sm:$0xff]  ;;  %758 = vperm.xlu1 %1133, %v743_v45   ;;  %v742_v47 = vld [vmem:[%s311_s30 + $0x8] sm:$0xff]  ;;  %v744_v48 = vld [vmem:[%s311_s30 + $0x18] sm:$0xff]  ;;  %v967_v49 = vcombine.low %v327_v40, %v328_v41  ;;  %v1021_v50 = vcombine.low %v326_v34, %v327_v40  ;;  %s1341_s11 = scalar_lea.vmem %s1375_s4, %s963_s16  ;;  %s964_s27 = sshll.u32 %s1382_s19, 1 }
  0x14   : > { %1062 = vmatpush3.bf16.msra.mxu0 %v1148_v15  ;;  %550 = vmatprep.mubr.bf16.mxu0 %v966_v36  ;;  %v361_v46 = vld [vmem:[%s304_s8] sm:$0xff]  ;;  %v1024_v52 = vcombine.high %v328_v41, %v328_v41  ;;  %v1023_v55 = vcombine.low %v328_v41, %v328_v41  ;;  %s322_s14 = scalar_lea.vmem %s1376_s5, %s964_s27 }
  0x15   : > { %1096 = vmatpush3.bf16.msra.mxu1 %v1149_v16  ;;  %1063 = vmatprep.subr.bf16.mxu0 %v1150_v17  ;;  %v970_v51 = vcombine.high %v361_v46, %v361_v46  ;;  %v745_v53 = vld [vmem:[%s311_s30 + $0x20] sm:$0xff]  ;;  %v969_v54 = vcombine.low %v361_v46, %v361_v46 }
  0x16   : > { %1097 = vmatprep.subr.bf16.mxu1 %v1151_v18  ;;  %717 = vmatprep.mubr.bf16.mxu1 %v1020_v38 }
  0x17   : > { %748 = vperm.xlu0 %1132, %v741_v44   ;;  %763 = vperm.xlu1 %1133, %v744_v48  }
  0x18   : > { %1064 = vmatpush3.bf16.msra.mxu0 %v1152_v19 }
  0x19   : > { %1098 = vmatpush3.bf16.msra.mxu1 %v1153_v20  ;;  %1065 = vmatprep.subr.bf16.mxu0 %v1154_v21 }
  0x1a   : > { %1099 = vmatprep.subr.bf16.mxu1 %v1155_v22 }
  0x1b   : > { %753 = vperm.xlu0 %1132, %v742_v47  }
  0x1c   : > { %1066 = vmatpush3.bf16.msra.mxu0 %v1156_v23 }
  0x1d   : > { %1100 = vmatpush3.bf16.msra.mxu1 %v1157_v24  ;;  %1067 = vmatprep.subr.bf16.mxu0 %v1158_v25 }
  0x1e   : > { %1101 = vmatprep.subr.bf16.mxu1 %v1159_v26 }
  0x1f   : > { %768 = vperm.xlu0 %1132, %v745_v53  }
  0x20   : > { %1068 = vmatpush3.bf16.msra.mxu0 %v1160_v27 }
  0x21   : > { %1102 = vmatpush3.bf16.msra.mxu1 %v1161_v28  ;;  %1069 = vmatprep.subr.bf16.mxu0 %v1162_v29 }
  0x22   : > { %1103 = vmatprep.subr.bf16.mxu1 %v1163_v30 }
  0x24   : > { %1070 = vmatpush3.bf16.msra.mxu0 %v1164_v31 }
  0x25   : > { %1104 = vmatpush3.bf16.msra.mxu1 %v1165_v32 }
  0x27   : > { %551 = vmatmul.mubr.bf16.vlgmr.msra.gmra.mrb[0].mxu0 %v965_v39 }
  0x28   : > { %718 = vmatmul.mubr.bf16.vlgmr.msra.gmra.mrb[0].mxu1 %v1019_v37  ;;  %558 = vmatprep.mubr.bf16.mxu0 %v968_v42 }
  0x29   : > { %725 = vmatprep.mubr.bf16.mxu1 %v1022_v43 }
  0x2f   : > { %559 = vmatmul.mubr.bf16.gmra.mrb[4].mxu0 %v967_v49 }
  0x30   : > { %726 = vmatmul.mubr.bf16.gmra.mrb[4].mxu1 %v1021_v50  ;;  %566 = vmatprep.mubr.bf16.mxu0 %v970_v51 }
  0x31   : > { %733 = vmatprep.mubr.bf16.mxu1 %v1024_v52 }
  0x37   : > { %567 = vmatmul.mubr.bf16.gmra.mrb[8].mxu0 %v969_v54 }
  0x38   : > { %734 = vmatmul.mubr.bf16.gmra.mrb[8].mxu1 %v1023_v55 }
  0x92   : > { %v759_v9 = vpop.permute.xlu1 %758 }
  0x96   : > { %v749_v56 = vpop.permute.xlu0 %748  ;;  %v764_v34 = vpop.permute.xlu1 %763 }
  0x9a   : > { %v754_v6 = vpop.permute.xlu0 %753 }
  0xfa   : > { %v1071_v57 = vpop.f32.mrb[0].mxu0 }
  0xfb   : > { %v1105_v58 = vpop.f32.mrb[0].mxu1  ;;  %v1072_v59 = vpop.f32.mrb[1].mxu0 }
  0xfc   : > { %v1106_v60 = vpop.f32.mrb[1].mxu1  ;;  %v1073_v61 = vadd.f32 %v1072_v59, %v1071_v57  ;;  %v1074_v63 = vpop.f32.mrb[2].mxu0 }
  0xfd   : > { %v1107_v62 = vadd.f32 %v1106_v60, %v1105_v58  ;;  %v1108_v0 = vpop.f32.mrb[2].mxu1  ;;  %v1075_v1 = vpop.f32.mrb[3].mxu0 }
  0xfe   : > { %v1109_v2 = vpop.f32.mrb[3].mxu1  ;;  %v1076_v4 = vadd.f32 %v1075_v1, %v1074_v63  ;;  %v769_v60 = vpop.permute.xlu0 %768 }
  0xff   : > { %v720_v3 = vadd.f32 %v1107_v62, %v1073_v61  ;;  %v1110_v5 = vadd.f32 %v1109_v2, %v1108_v0 }
 0x101   : > { %v771_v7 = vmul.f32 %v749_v56, %v720_v3  ;;  %v723_v8 = vadd.f32 %v1110_v5, %v1076_v4 }
 0x102   : > { %v1077_v13 = vpop.f32.mrb[4].mxu0 }
 0x103   : > { %v1050_v10 = vpack.c.bf16 %v771_v7, %v771_v7  ;;  %v821_v11 = vmul.f32 %v771_v7, %v771_v7  ;;  %v772_v12 = vmul.f32 %v754_v6, %v723_v8  ;;  %v1111_v14 = vpop.f32.mrb[4].mxu1  ;;  %v1078_v15 = vpop.f32.mrb[5].mxu0  ;;  %v804_v17 = vsel %vm803_vm1, %v771_v7, 0.0 }
 0x104   : > { %v1112_v16 = vpop.f32.mrb[5].mxu1  ;;  %v1080_v21 = vpop.f32.mrb[6].mxu0  ;;  %v1079_v24 = vadd.f32 %v1078_v15, %v1077_v13 }
 0x105   : > { %798 = vst.msk [vmem:[%s1341_s11] sm:$0xf] %vm797_vm0, %v1050_v10  ;;  %v1051_v18 = vpack.c.bf16 %v772_v12, %v772_v12  ;;  %v805_v19 = vsel %vm803_vm1, %v772_v12, 0.0  ;;  %v822_v20 = vmul.f32 %v772_v12, %v772_v12  ;;  %v1114_v22 = vpop.f32.mrb[6].mxu1  ;;  %v1113_v25 = vadd.f32 %v1112_v16, %v1111_v14  ;;  %v1081_v26 = vpop.f32.mrb[7].mxu0 }
 0x106   : > { %v806_v23 = vadd.f32 %v805_v19, %v804_v17  ;;  %v1115_v27 = vpop.f32.mrb[7].mxu1  ;;  %v826_v28 = vsel %vm803_vm1, %v821_v11, 0.0  ;;  %v1082_v30 = vadd.f32 %v1081_v26, %v1080_v21 }
 0x107   : > { %799 = vst.msk [vmem:[%s1341_s11 + $0x4] sm:$0xf] %vm797_vm0, %v1051_v18  ;;  %v827_v29 = vsel %vm803_vm1, %v822_v20, 0.0  ;;  %v1116_v31 = vadd.f32 %v1115_v27, %v1114_v22  ;;  %v728_v33 = vadd.f32 %v1113_v25, %v1079_v24 }
 0x108   : > { %v828_v32 = vadd.f32 %v827_v29, %v826_v28 }
 0x109   : > { %v731_v35 = vadd.f32 %v1116_v31, %v1082_v30  ;;  %v773_v36 = vmul.f32 %v759_v9, %v728_v33 }
 0x10a   : > { %v1083_v38 = vpop.f32.mrb[8].mxu0 }
 0x10b   : > { %v774_v37 = vmul.f32 %v764_v34, %v731_v35  ;;  %v1117_v39 = vpop.f32.mrb[8].mxu1  ;;  %v1052_v40 = vpack.c.bf16 %v773_v36, %v773_v36  ;;  %v807_v41 = vsel %vm803_vm1, %v773_v36, 0.0  ;;  %v823_v42 = vmul.f32 %v773_v36, %v773_v36  ;;  %v1084_v43 = vpop.f32.mrb[9].mxu0 }
 0x10c   : > { %v1118_v44 = vpop.f32.mrb[9].mxu1  ;;  %v808_v45 = vadd.f32 %v807_v41, %v806_v23  ;;  %v1086_v49 = vpop.f32.mrb[10].mxu0  ;;  %v1085_v52 = vadd.f32 %v1084_v43, %v1083_v38 }
 0x10d   : > { %v1053_v46 = vpack.c.bf16 %v774_v37, %v774_v37  ;;  %v809_v47 = vsel %vm803_vm1, %v774_v37, 0.0  ;;  %v824_v48 = vmul.f32 %v774_v37, %v774_v37  ;;  %v1120_v50 = vpop.f32.mrb[10].mxu1  ;;  %800 = vst.msk [vmem:[%s1341_s11 + $0x8] sm:$0xf] %vm797_vm0, %v1052_v40  ;;  %v829_v51 = vsel %vm803_vm1, %v823_v42, 0.0  ;;  %v1087_v54 = vpop.f32.mrb[11].mxu0 }
 0x10e   : > { %v1119_v53 = vadd.f32 %v1118_v44, %v1117_v39  ;;  %v1121_v55 = vpop.f32.mrb[11].mxu1  ;;  %v830_v56 = vadd.f32 %v829_v51, %v828_v32  ;;  %v810_v57 = vadd.f32 %v809_v47, %v808_v45 }
 0x10f   : > { %801 = vst.msk [vmem:[%s1341_s11 + $0xc] sm:$0xf] %vm797_vm0, %v1053_v46  ;;  %v831_v58 = vsel %vm803_vm1, %v824_v48, 0.0 }
 0x110   : > { %v736_v59 = vadd.f32 %v1119_v53, %v1085_v52  ;;  %v832_v61 = vadd.f32 %v831_v58, %v830_v56 }
 0x112   : > { %v775_v62 = vmul.f32 %v769_v60, %v736_v59 }
 0x114   : > { %v1054_v63 = vpack.c.bf16 %v775_v62, %v775_v62  ;;  %v811_v0 = vsel %vm803_vm1, %v775_v62, 0.0  ;;  %v825_v1 = vmul.f32 %v775_v62, %v775_v62 }
 0x115   : > { %v812_v2 = vadd.f32 %v811_v0, %v810_v57 }
 0x116   : > { %802 = vst.msk [vmem:[%s1341_s11 + $0x10] sm:$0xf] %vm797_vm0, %v1054_v63  ;;  %v833_v3 = vsel %vm803_vm1, %v825_v1, 0.0 }
 0x117   : > { %v813_v4 = vrot.slane %v812_v2, 4  ;;  %v834_v5 = vadd.f32 %v833_v3, %v832_v61 }
 0x119   : > { %v814_v6 = vadd.f32 %v813_v4, %v812_v2  ;;  %v835_v7 = vrot.slane %v834_v5, 4 }
 0x11b   : > { %v815_v8 = vrot.slane %v814_v6, 2  ;;  %v836_v9 = vadd.f32 %v835_v7, %v834_v5 }
 0x11d   : > { %v816_v10 = vadd.f32 %v815_v8, %v814_v6  ;;  %v837_v11 = vrot.slane %v836_v9, 2 }
 0x11f   : > { %v817_v12 = vrot.slane %v816_v10, 1  ;;  %v838_v13 = vadd.f32 %v837_v11, %v836_v9 }
 0x121   : > { %v818_v14 = vadd.f32 %v817_v12, %v816_v10  ;;  %v839_v15 = vrot.slane %v838_v13, 1 }
 0x123   : > { %820 = vst.msk [vmem:[%s322_s14] sm:$0x1] %vm819_vm2, %v818_v14  ;;  %v840_v16 = vadd.f32 %v839_v15, %v838_v13 }
 0x125   : > { %841 = vst.msk [vmem:[%s322_s14 + $0x1] sm:$0x1] %vm819_vm2, %v840_v16 }
 0x126 PF: > { %s16_s18 = sadd.s32 1, %s1184_s18  }
 0x127   : > { %p13_p7 = scmp.ge.s32.totalorder %s16_s18, 4  }
 0x129   :  { %15 = sbr.rel (!%p13_p7) target bundleno = 1 (0x1), region = 85 }

</bundles_post_ra>
